<compile_context>
chip_gen: v6e
topology: v6e:2x2x1
jax: 0.10.0
libtpu: 0.0.40
codegen_flags: <defaults>
</compile_context>

<pallas_src>
import functools

import jax
import jax.numpy as jnp
from jax import lax
from jax.experimental import pallas as pl
from jax.experimental.pallas import tpu as pltpu


def _basic_block_kernel(x_ref, w1_ref, w2_ref, b1_ref, b2_ref, out_ref,
                        xcat_ref, mcat_ref):
    """One (batch n, row-tile h) grid step of the fused BasicBlock.

    x_ref   : (1, H, W, Cin)    whole image, VMEM-resident across h steps
    w1_ref  : (3, 3*Cin, C)     conv1 weights, BN1 scale folded, kw folded into K
    w2_ref  : (3, 3*C,  C)      conv2 weights, BN2 scale folded, kw folded into K
    b1_ref  : (1, 1, C)         BN1 bias (beta - mean*scale)
    b2_ref  : (1, 1, C)         BN2 bias
    out_ref : (1, TH, W, C)     output rows r0 .. r0+TH-1
    xcat_ref: (TH+4, W, 3*Cin)  VMEM: kw-stacked, column-shifted input window
    mcat_ref: (TH+2, W, 3*C)    VMEM: kw-stacked, column-shifted conv1 activation
    """
    H = x_ref.shape[1]
    W = x_ref.shape[2]
    Cin = x_ref.shape[3]
    TH = out_ref.shape[1]
    C = out_ref.shape[3]

    h = pl.program_id(1)
    nh = pl.num_programs(1)
    r0 = pl.multiple_of(h * TH, TH)          # first output row of this tile

    in_dt = xcat_ref.dtype

    # ------------------------------------------------------------------
    # Stage the (TH+4)-row input window (global rows r0-2 .. r0+TH+1) in a
    # kw-stacked layout:
    #   xcat[t, j, kw*Cin + c] = X_pad[r0 - 2 + t, j - 1 + kw, c]
    # so each conv1 tap row is a single MXU matmul with K = 3*Cin.
    # Rows / columns outside the image are zero ("SAME" padding).
    # ------------------------------------------------------------------
    def stack_kw(rows_lo, piece):
        rows_hi = rows_lo + piece.shape[0]
        xcat_ref[rows_lo:rows_hi, 1:W, 0:Cin] = piece[:, 0:W - 1, :]
        xcat_ref[rows_lo:rows_hi, :, Cin:2 * Cin] = piece
        xcat_ref[rows_lo:rows_hi, 0:W - 1, 2 * Cin:3 * Cin] = piece[:, 1:W, :]

    body = x_ref[0, pl.ds(r0, TH), :, :]                     # always in-image
    top = x_ref[0, pl.ds(jnp.maximum(r0 - 2, 0), 2), :, :]   # rows r0-2, r0-1
    top = jnp.where(h > 0, top, jnp.zeros_like(top))
    bot = x_ref[0, pl.ds(jnp.minimum(r0 + TH, H - 2), 2), :, :]  # rows r0+TH, +1
    bot = jnp.where(h < nh - 1, bot, jnp.zeros_like(bot))

    stack_kw(0, top)
    stack_kw(2, body)
    stack_kw(TH + 2, bot)
    # left / right "SAME" padding columns of the kw=0 / kw=2 blocks
    zcol_in = jnp.zeros((TH + 4, 1, Cin), in_dt)
    xcat_ref[:, 0:1, 0:Cin] = zcol_in
    xcat_ref[:, W - 1:W, 2 * Cin:3 * Cin] = zcol_in

    # ------------------------------------------------------------------
    # conv1 (3x3, pad=1) on TH+2 rows (1-row halo for conv2): 3 matmuls with
    # K = 3*Cin.  BN1 scale already folded into w1; add bias + ReLU here.
    # ------------------------------------------------------------------
    acc1 = jnp.zeros((TH + 2, W, C), jnp.float32)
    for kh in range(3):
        acc1 = acc1 + lax.dot_general(
            xcat_ref[kh:kh + TH + 2, :, :], w1_ref[kh],
            (((2,), (0,)), ((), ())),
            preferred_element_type=jnp.float32)
    a1 = jnp.maximum(acc1 + b1_ref[...], 0.0).astype(in_dt)

    # Stage conv1 activations in the same kw-stacked layout for conv2.
    mcat_ref[:, 1:W, 0:C] = a1[:, 0:W - 1, :]
    mcat_ref[:, :, C:2 * C] = a1
    mcat_ref[:, 0:W - 1, 2 * C:3 * C] = a1[:, 1:W, :]
    zcol_mid = jnp.zeros((TH + 2, 1, C), in_dt)
    mcat_ref[:, 0:1, 0:C] = zcol_mid
    mcat_ref[:, W - 1:W, 2 * C:3 * C] = zcol_mid

    # Halo rows that fall outside the image are conv2's zero padding, not real
    # conv1 output: overwrite them with zeros.
    @pl.when(h == 0)
    def _zero_top():
        mcat_ref[0:1, :, :] = jnp.zeros((1, W, 3 * C), in_dt)

    @pl.when(h == nh - 1)
    def _zero_bottom():
        mcat_ref[TH + 1:TH + 2, :, :] = jnp.zeros((1, W, 3 * C), in_dt)

    # ------------------------------------------------------------------
    # conv2 (3x3, pad=1): 3 matmuls with K = 3*C.  BN2 scale folded into w2.
    # ------------------------------------------------------------------
    acc2 = jnp.zeros((TH, W, C), jnp.float32)
    for kh in range(3):
        acc2 = acc2 + lax.dot_general(
            mcat_ref[kh:kh + TH, :, :], w2_ref[kh],
            (((2,), (0,)), ((), ())),
            preferred_element_type=jnp.float32)

    # BN2 bias + residual add + ReLU.
    out = jnp.maximum(acc2 + b2_ref[...] + body.astype(jnp.float32), 0.0)
    out_ref[0] = out.astype(out_ref.dtype)


@functools.partial(jax.jit, static_argnames=("tile_h",))
def basic_block_pallas(x, w1, w2, scale1, bias1, scale2, bias2, *, tile_h=16):
    N, H, W, Cin = x.shape
    C = w1.shape[-1]
    assert w1.shape == (3, 3, Cin, C)
    assert w2.shape == (3, 3, C, C)
    assert Cin == C, "identity path requires inplanes == planes (no downsample)"
    tile_h = min(tile_h, H)
    assert H % tile_h == 0, "tile_h must divide H"
    assert tile_h >= 2, "tile_h must be >= 2"
    nh = H // tile_h

    # Fold BN scale into the conv weights (BN(conv(x)) = conv_{w*s}(x) + b) and
    # fold kw into the contraction dim: (3, 3, Ci, Co) -> (3, 3*Ci, Co).
    w1f = (w1 * scale1).reshape(3, 3 * Cin, C).astype(x.dtype)
    w2f = (w2 * scale2).reshape(3, 3 * C, C).astype(x.dtype)
    b1 = bias1.reshape(1, 1, C).astype(jnp.float32)
    b2 = bias2.reshape(1, 1, C).astype(jnp.float32)

    itemsize = jnp.dtype(x.dtype).itemsize
    flops = 2 * 9 * N * H * W * C * (Cin + C)
    bytes_accessed = (x.size * itemsize + N * H * W * C * itemsize
                      + w1f.size * itemsize + w2f.size * itemsize + 2 * C * 4)

    # Generation-aware VMEM limit (v5e/v6e: 128 MiB physical, v7x: 64 MiB).
    try:
        vmem_cap = int(pltpu.get_tpu_info().vmem_capacity_bytes)
    except Exception:
        vmem_cap = 64 * 1024 * 1024
    vmem_limit = int(min(vmem_cap * 3 // 4, 96 * 1024 * 1024))

    return pl.pallas_call(
        _basic_block_kernel,
        out_shape=jax.ShapeDtypeStruct((N, H, W, C), x.dtype),
        grid=(N, nh),
        in_specs=[
            pl.BlockSpec((1, H, W, Cin), lambda n, h: (n, 0, 0, 0)),
            pl.BlockSpec((3, 3 * Cin, C), lambda n, h: (0, 0, 0)),
            pl.BlockSpec((3, 3 * C, C), lambda n, h: (0, 0, 0)),
            pl.BlockSpec((1, 1, C), lambda n, h: (0, 0, 0)),
            pl.BlockSpec((1, 1, C), lambda n, h: (0, 0, 0)),
        ],
        out_specs=pl.BlockSpec((1, tile_h, W, C), lambda n, h: (n, h, 0, 0)),
        scratch_shapes=[
            pltpu.VMEM((tile_h + 4, W, 3 * Cin), x.dtype),   # kw-stacked input
            pltpu.VMEM((tile_h + 2, W, 3 * C), x.dtype),     # kw-stacked conv1 act
        ],
        compiler_params=pltpu.CompilerParams(
            dimension_semantics=("parallel", "parallel"),
            vmem_limit_bytes=vmem_limit),
        cost_estimate=pl.CostEstimate(flops=flops, transcendentals=0,
                                      bytes_accessed=bytes_accessed),
    )(x, w1f, w2f, b1, b2)


def basic_block_reference(x_nhwc, w1_hwio, w2_hwio, scale1, bias1, scale2, bias2):
    """Pure-JAX reference (same NHWC layout) for the correctness check."""
    dn = lax.conv_dimension_numbers(x_nhwc.shape, w1_hwio.shape,
                                    ("NHWC", "HWIO", "NHWC"))
    out = lax.conv_general_dilated(x_nhwc, w1_hwio, (1, 1), "SAME",
                                   dimension_numbers=dn)
    out = out * scale1 + bias1
    out = jnp.maximum(out, 0.0)
    out = lax.conv_general_dilated(out, w2_hwio, (1, 1), "SAME",
                                   dimension_numbers=dn)
    out = out * scale2 + bias2
    out = out + x_nhwc
    return jnp.maximum(out, 0.0)


if __name__ == "__main__":
    # Small shapes consistent with BasicBlock(inplanes=planes, stride=1).
    N, H, W = 2, 16, 16
    inplanes = planes = 32
    eps = 1e-5

    key = jax.random.PRNGKey(0)
    k_x, k_w1, k_w2, k_g1, k_b1, k_g2, k_b2, k_m1, k_v1, k_m2, k_v2 = (
        jax.random.split(key, 11))

    # Input: kernel uses NHWC (the PyTorch module would see its NCHW transpose).
    x = jax.random.normal(k_x, (N, H, W, inplanes), jnp.float32)

    # Conv weights stored as HWIO (= PyTorch OIHW transposed).
    w1 = 0.1 * jax.random.normal(k_w1, (3, 3, inplanes, planes), jnp.float32)
    w2 = 0.1 * jax.random.normal(k_w2, (3, 3, planes, planes), jnp.float32)

    # BatchNorm parameters (eval mode), folded into per-channel scale/bias.
    gamma1 = 1.0 + 0.1 * jax.random.normal(k_g1, (planes,), jnp.float32)
    beta1 = 0.1 * jax.random.normal(k_b1, (planes,), jnp.float32)
    mean1 = 0.1 * jax.random.normal(k_m1, (planes,), jnp.float32)
    var1 = 0.5 + jnp.abs(jax.random.normal(k_v1, (planes,), jnp.float32))
    gamma2 = 1.0 + 0.1 * jax.random.normal(k_g2, (planes,), jnp.float32)
    beta2 = 0.1 * jax.random.normal(k_b2, (planes,), jnp.float32)
    mean2 = 0.1 * jax.random.normal(k_m2, (planes,), jnp.float32)
    var2 = 0.5 + jnp.abs(jax.random.normal(k_v2, (planes,), jnp.float32))

    scale1 = gamma1 / jnp.sqrt(var1 + eps)
    bias1 = beta1 - mean1 * scale1
    scale2 = gamma2 / jnp.sqrt(var2 + eps)
    bias2 = beta2 - mean2 * scale2

    ref = basic_block_reference(x, w1, w2, scale1, bias1, scale2, bias2)

    # Three H tilings: single-tile (nh=1), boundary tiles, and interior tiles.
    for th in (16, 8, 4):
        out = basic_block_pallas(x, w1, w2, scale1, bias1, scale2, bias2,
                                 tile_h=th)
        out = jax.block_until_ready(out)
        assert out.shape == (N, H, W, planes)
        assert jnp.allclose(out, ref, atol=5e-4, rtol=5e-4), \
            f"mismatch (tile_h={th})"

    print("KERNEL_OK")
</pallas_src>

<mosaic_0001>
module attributes {stable_mosaic.version = 11 : i64} {
  func.func @_basic_block_kernel(%arg0: i32, %arg1: i32, %arg2: memref<1x16x16x32xf32, #tpu.memory_space<vmem>>, %arg3: memref<3x96x32xf32, #tpu.memory_space<vmem>>, %arg4: memref<3x96x32xf32, #tpu.memory_space<vmem>>, %arg5: memref<1x1x32xf32, #tpu.memory_space<vmem>>, %arg6: memref<1x1x32xf32, #tpu.memory_space<vmem>>, %arg7: memref<1x16x16x32xf32, #tpu.memory_space<vmem>>, %arg8: memref<20x16x96xf32, #tpu.memory_space<vmem>>, %arg9: memref<18x16x96xf32, #tpu.memory_space<vmem>>) attributes {dimension_semantics = [#tpu.dimension_semantics<parallel>, #tpu.dimension_semantics<parallel>], iteration_bounds = array<i64: 2, 1>, scalar_prefetch = 0 : i64, scratch_operands = 2 : i64, tpu.core_type = #tpu.core_type<tc>, window_params = [{transform_indices = @transform_0, window_bounds = array<i64: 1, 16, 16, 32>}, {pipeline_mode = #tpu.pipeline_mode<synchronous>, transform_indices = @transform_1, window_bounds = array<i64: 3, 96, 32>}, {pipeline_mode = #tpu.pipeline_mode<synchronous>, transform_indices = @transform_2, window_bounds = array<i64: 3, 96, 32>}, {pipeline_mode = #tpu.pipeline_mode<synchronous>, transform_indices = @transform_3, window_bounds = array<i64: 1, 1, 32>}, {pipeline_mode = #tpu.pipeline_mode<synchronous>, transform_indices = @transform_4, window_bounds = array<i64: 1, 1, 32>}, {transform_indices = @transform_5, window_bounds = array<i64: 1, 16, 16, 32>}]} {
    %c16_i32 = arith.constant 16 : i32
    %0 = arith.muli %arg1, %c16_i32 : i32
    %1 = tpu.assume_multiple %0, 16 : i32
    %c0 = arith.constant 0 : index
    %2 = arith.index_cast %1 : i32 to index
    %c0_0 = arith.constant 0 : index
    %c0_1 = arith.constant 0 : index
    %3 = vector.load %arg2[%c0, %2, %c0_0, %c0_1] : memref<1x16x16x32xf32, #tpu.memory_space<vmem>>, vector<1x16x16x32xf32>
    %4 = vector.shape_cast %3 : vector<1x16x16x32xf32> to vector<16x16x32xf32>
    %c2_i32 = arith.constant 2 : i32
    %5 = arith.subi %1, %c2_i32 : i32
    %c0_i32 = arith.constant 0 : i32
    %6 = arith.maxsi %5, %c0_i32 : i32
    %c0_2 = arith.constant 0 : index
    %7 = arith.index_cast %6 : i32 to index
    %c0_3 = arith.constant 0 : index
    %c0_4 = arith.constant 0 : index
    %8 = vector.load %arg2[%c0_2, %7, %c0_3, %c0_4] : memref<1x16x16x32xf32, #tpu.memory_space<vmem>>, vector<1x2x16x32xf32>
    %9 = vector.shape_cast %8 : vector<1x2x16x32xf32> to vector<2x16x32xf32>
    %c0_i32_5 = arith.constant 0 : i32
    %10 = arith.cmpi sgt, %arg1, %c0_i32_5 : i32
    %cst = arith.constant 0.000000e+00 : f32
    %11 = vector.broadcast %cst : f32 to vector<2x16x32xf32>
    %12 = arith.select %10, %9, %11 : vector<2x16x32xf32>
    %c16_i32_6 = arith.constant 16 : i32
    %13 = arith.addi %1, %c16_i32_6 : i32
    %c14_i32 = arith.constant 14 : i32
    %14 = arith.minsi %13, %c14_i32 : i32
    %c0_7 = arith.constant 0 : index
    %15 = arith.index_cast %14 : i32 to index
    %c0_8 = arith.constant 0 : index
    %c0_9 = arith.constant 0 : index
    %16 = vector.load %arg2[%c0_7, %15, %c0_8, %c0_9] : memref<1x16x16x32xf32, #tpu.memory_space<vmem>>, vector<1x2x16x32xf32>
    %17 = vector.shape_cast %16 : vector<1x2x16x32xf32> to vector<2x16x32xf32>
    %c0_i32_10 = arith.constant 0 : i32
    %18 = arith.cmpi slt, %arg1, %c0_i32_10 : i32
    %cst_11 = arith.constant 0.000000e+00 : f32
    %19 = vector.broadcast %cst_11 : f32 to vector<2x16x32xf32>
    %20 = arith.select %18, %17, %19 : vector<2x16x32xf32>
    %21 = vector.extract_strided_slice %12 {offsets = [0, 0, 0], sizes = [2, 15, 32], strides = [1, 1, 1]} : vector<2x16x32xf32> to vector<2x15x32xf32>
    %c0_12 = arith.constant 0 : index
    %c1 = arith.constant 1 : index
    %c0_13 = arith.constant 0 : index
    %22 = vector.load %arg8[%c0_12, %c1, %c0_13] : memref<20x16x96xf32, #tpu.memory_space<vmem>>, vector<2x15x32xf32>
    tpu.vector_store %arg8[%c0_12, %c1, %c0_13], %21 {strides = array<i32>} : memref<20x16x96xf32, #tpu.memory_space<vmem>>, vector<2x15x32xf32>,
    %c0_14 = arith.constant 0 : index
    %c0_15 = arith.constant 0 : index
    %c32 = arith.constant 32 : index
    %23 = vector.load %arg8[%c0_14, %c0_15, %c32] : memref<20x16x96xf32, #tpu.memory_space<vmem>>, vector<2x16x32xf32>
    tpu.vector_store %arg8[%c0_14, %c0_15, %c32], %12 {strides = array<i32>} : memref<20x16x96xf32, #tpu.memory_space<vmem>>, vector<2x16x32xf32>,
    %24 = vector.extract_strided_slice %12 {offsets = [0, 1, 0], sizes = [2, 15, 32], strides = [1, 1, 1]} : vector<2x16x32xf32> to vector<2x15x32xf32>
    %c0_16 = arith.constant 0 : index
    %c0_17 = arith.constant 0 : index
    %c64 = arith.constant 64 : index
    %25 = vector.load %arg8[%c0_16, %c0_17, %c64] : memref<20x16x96xf32, #tpu.memory_space<vmem>>, vector<2x15x32xf32>
    tpu.vector_store %arg8[%c0_16, %c0_17, %c64], %24 {strides = array<i32>} : memref<20x16x96xf32, #tpu.memory_space<vmem>>, vector<2x15x32xf32>,
    %26 = vector.extract_strided_slice %4 {offsets = [0, 0, 0], sizes = [16, 15, 32], strides = [1, 1, 1]} : vector<16x16x32xf32> to vector<16x15x32xf32>
    %c2 = arith.constant 2 : index
    %c1_18 = arith.constant 1 : index
    %c0_19 = arith.constant 0 : index
    %27 = vector.load %arg8[%c2, %c1_18, %c0_19] : memref<20x16x96xf32, #tpu.memory_space<vmem>>, vector<16x15x32xf32>
    tpu.vector_store %arg8[%c2, %c1_18, %c0_19], %26 {strides = array<i32>} : memref<20x16x96xf32, #tpu.memory_space<vmem>>, vector<16x15x32xf32>,
    %c2_20 = arith.constant 2 : index
    %c0_21 = arith.constant 0 : index
    %c32_22 = arith.constant 32 : index
    %28 = vector.load %arg8[%c2_20, %c0_21, %c32_22] : memref<20x16x96xf32, #tpu.memory_space<vmem>>, vector<16x16x32xf32>
    tpu.vector_store %arg8[%c2_20, %c0_21, %c32_22], %4 {strides = array<i32>} : memref<20x16x96xf32, #tpu.memory_space<vmem>>, vector<16x16x32xf32>,
    %29 = vector.extract_strided_slice %4 {offsets = [0, 1, 0], sizes = [16, 15, 32], strides = [1, 1, 1]} : vector<16x16x32xf32> to vector<16x15x32xf32>
    %c2_23 = arith.constant 2 : index
    %c0_24 = arith.constant 0 : index
    %c64_25 = arith.constant 64 : index
    %30 = vector.load %arg8[%c2_23, %c0_24, %c64_25] : memref<20x16x96xf32, #tpu.memory_space<vmem>>, vector<16x15x32xf32>
    tpu.vector_store %arg8[%c2_23, %c0_24, %c64_25], %29 {strides = array<i32>} : memref<20x16x96xf32, #tpu.memory_space<vmem>>, vector<16x15x32xf32>,
    %31 = vector.extract_strided_slice %20 {offsets = [0, 0, 0], sizes = [2, 15, 32], strides = [1, 1, 1]} : vector<2x16x32xf32> to vector<2x15x32xf32>
    %c18 = arith.constant 18 : index
    %c1_26 = arith.constant 1 : index
    %c0_27 = arith.constant 0 : index
    %32 = vector.load %arg8[%c18, %c1_26, %c0_27] : memref<20x16x96xf32, #tpu.memory_space<vmem>>, vector<2x15x32xf32>
    tpu.vector_store %arg8[%c18, %c1_26, %c0_27], %31 {strides = array<i32>} : memref<20x16x96xf32, #tpu.memory_space<vmem>>, vector<2x15x32xf32>,
    %c18_28 = arith.constant 18 : index
    %c0_29 = arith.constant 0 : index
    %c32_30 = arith.constant 32 : index
    %33 = vector.load %arg8[%c18_28, %c0_29, %c32_30] : memref<20x16x96xf32, #tpu.memory_space<vmem>>, vector<2x16x32xf32>
    tpu.vector_store %arg8[%c18_28, %c0_29, %c32_30], %20 {strides = array<i32>} : memref<20x16x96xf32, #tpu.memory_space<vmem>>, vector<2x16x32xf32>,
    %34 = vector.extract_strided_slice %20 {offsets = [0, 1, 0], sizes = [2, 15, 32], strides = [1, 1, 1]} : vector<2x16x32xf32> to vector<2x15x32xf32>
    %c18_31 = arith.constant 18 : index
    %c0_32 = arith.constant 0 : index
    %c64_33 = arith.constant 64 : index
    %35 = vector.load %arg8[%c18_31, %c0_32, %c64_33] : memref<20x16x96xf32, #tpu.memory_space<vmem>>, vector<2x15x32xf32>
    tpu.vector_store %arg8[%c18_31, %c0_32, %c64_33], %34 {strides = array<i32>} : memref<20x16x96xf32, #tpu.memory_space<vmem>>, vector<2x15x32xf32>,
    %cst_34 = arith.constant 0.000000e+00 : f32
    %36 = vector.broadcast %cst_34 : f32 to vector<20x1x32xf32>
    %c0_35 = arith.constant 0 : index
    %c0_36 = arith.constant 0 : index
    %c0_37 = arith.constant 0 : index
    %37 = vector.load %arg8[%c0_35, %c0_36, %c0_37] : memref<20x16x96xf32, #tpu.memory_space<vmem>>, vector<20x1x32xf32>
    tpu.vector_store %arg8[%c0_35, %c0_36, %c0_37], %36 {strides = array<i32>} : memref<20x16x96xf32, #tpu.memory_space<vmem>>, vector<20x1x32xf32>,
    %c0_38 = arith.constant 0 : index
    %c15 = arith.constant 15 : index
    %c64_39 = arith.constant 64 : index
    %38 = vector.load %arg8[%c0_38, %c15, %c64_39] : memref<20x16x96xf32, #tpu.memory_space<vmem>>, vector<20x1x32xf32>
    tpu.vector_store %arg8[%c0_38, %c15, %c64_39], %36 {strides = array<i32>} : memref<20x16x96xf32, #tpu.memory_space<vmem>>, vector<20x1x32xf32>,
    %cst_40 = arith.constant 0.000000e+00 : f32
    %39 = vector.broadcast %cst_40 : f32 to vector<18x16x32xf32>
    %c0_41 = arith.constant 0 : index
    %c0_42 = arith.constant 0 : index
    %c0_43 = arith.constant 0 : index
    %40 = vector.load %arg8[%c0_41, %c0_42, %c0_43] : memref<20x16x96xf32, #tpu.memory_space<vmem>>, vector<18x16x96xf32>
    %c0_44 = arith.constant 0 : index
    %c0_45 = arith.constant 0 : index
    %c0_46 = arith.constant 0 : index
    %41 = vector.load %arg3[%c0_44, %c0_45, %c0_46] : memref<3x96x32xf32, #tpu.memory_space<vmem>>, vector<1x96x32xf32>
    %42 = vector.shape_cast %41 : vector<1x96x32xf32> to vector<96x32xf32>
    %cst_47 = arith.constant dense<0.000000e+00> : vector<18x16x32xf32>
    %43 = tpu.matmul %40, %42, %cst_47 {dimension_numbers = #tpu.dot_dimension_numbers<[2], [0], [0, 1], [1], [0, 0, 0, 1, 1, 1], [], []>} : vector<18x16x96xf32>, vector<96x32xf32>, vector<18x16x32xf32> -> vector<18x16x32xf32>
    %44 = arith.addf %39, %43 : vector<18x16x32xf32>
    %c1_48 = arith.constant 1 : index
    %c0_49 = arith.constant 0 : index
    %c0_50 = arith.constant 0 : index
    %45 = vector.load %arg8[%c1_48, %c0_49, %c0_50] : memref<20x16x96xf32, #tpu.memory_space<vmem>>, vector<18x16x96xf32>
    %c1_51 = arith.constant 1 : index
    %c0_52 = arith.constant 0 : index
    %c0_53 = arith.constant 0 : index
    %46 = vector.load %arg3[%c1_51, %c0_52, %c0_53] : memref<3x96x32xf32, #tpu.memory_space<vmem>>, vector<1x96x32xf32>
    %47 = vector.shape_cast %46 : vector<1x96x32xf32> to vector<96x32xf32>
    %cst_54 = arith.constant dense<0.000000e+00> : vector<18x16x32xf32>
    %48 = tpu.matmul %45, %47, %cst_54 {dimension_numbers = #tpu.dot_dimension_numbers<[2], [0], [0, 1], [1], [0, 0, 0, 1, 1, 1], [], []>} : vector<18x16x96xf32>, vector<96x32xf32>, vector<18x16x32xf32> -> vector<18x16x32xf32>
    %49 = arith.addf %44, %48 : vector<18x16x32xf32>
    %c2_55 = arith.constant 2 : index
    %c0_56 = arith.constant 0 : index
    %c0_57 = arith.constant 0 : index
    %50 = vector.load %arg8[%c2_55, %c0_56, %c0_57] : memref<20x16x96xf32, #tpu.memory_space<vmem>>, vector<18x16x96xf32>
    %c2_58 = arith.constant 2 : index
    %c0_59 = arith.constant 0 : index
    %c0_60 = arith.constant 0 : index
    %51 = vector.load %arg3[%c2_58, %c0_59, %c0_60] : memref<3x96x32xf32, #tpu.memory_space<vmem>>, vector<1x96x32xf32>
    %52 = vector.shape_cast %51 : vector<1x96x32xf32> to vector<96x32xf32>
    %cst_61 = arith.constant dense<0.000000e+00> : vector<18x16x32xf32>
    %53 = tpu.matmul %50, %52, %cst_61 {dimension_numbers = #tpu.dot_dimension_numbers<[2], [0], [0, 1], [1], [0, 0, 0, 1, 1, 1], [], []>} : vector<18x16x96xf32>, vector<96x32xf32>, vector<18x16x32xf32> -> vector<18x16x32xf32>
    %54 = arith.addf %49, %53 : vector<18x16x32xf32>
    %c0_62 = arith.constant 0 : index
    %c0_63 = arith.constant 0 : index
    %c0_64 = arith.constant 0 : index
    %55 = vector.load %arg5[%c0_62, %c0_63, %c0_64] : memref<1x1x32xf32, #tpu.memory_space<vmem>>, vector<1x1x32xf32>
    %56 = vector.broadcast %55 : vector<1x1x32xf32> to vector<18x16x32xf32>
    %57 = arith.addf %54, %56 : vector<18x16x32xf32>
    %cst_65 = arith.constant 0.000000e+00 : f32
    %58 = vector.broadcast %cst_65 : f32 to vector<18x16x32xf32>
    %59 = arith.maximumf %57, %58 : vector<18x16x32xf32>
    %60 = vector.extract_strided_slice %59 {offsets = [0, 0, 0], sizes = [18, 15, 32], strides = [1, 1, 1]} : vector<18x16x32xf32> to vector<18x15x32xf32>
    %c0_66 = arith.constant 0 : index
    %c1_67 = arith.constant 1 : index
    %c0_68 = arith.constant 0 : index
    %61 = vector.load %arg9[%c0_66, %c1_67, %c0_68] : memref<18x16x96xf32, #tpu.memory_space<vmem>>, vector<18x15x32xf32>
    tpu.vector_store %arg9[%c0_66, %c1_67, %c0_68], %60 {strides = array<i32>} : memref<18x16x96xf32, #tpu.memory_space<vmem>>, vector<18x15x32xf32>,
    %c0_69 = arith.constant 0 : index
    %c0_70 = arith.constant 0 : index
    %c32_71 = arith.constant 32 : index
    %62 = vector.load %arg9[%c0_69, %c0_70, %c32_71] : memref<18x16x96xf32, #tpu.memory_space<vmem>>, vector<18x16x32xf32>
    tpu.vector_store %arg9[%c0_69, %c0_70, %c32_71], %59 {strides = array<i32>} : memref<18x16x96xf32, #tpu.memory_space<vmem>>, vector<18x16x32xf32>,
    %63 = vector.extract_strided_slice %59 {offsets = [0, 1, 0], sizes = [18, 15, 32], strides = [1, 1, 1]} : vector<18x16x32xf32> to vector<18x15x32xf32>
    %c0_72 = arith.constant 0 : index
    %c0_73 = arith.constant 0 : index
    %c64_74 = arith.constant 64 : index
    %64 = vector.load %arg9[%c0_72, %c0_73, %c64_74] : memref<18x16x96xf32, #tpu.memory_space<vmem>>, vector<18x15x32xf32>
    tpu.vector_store %arg9[%c0_72, %c0_73, %c64_74], %63 {strides = array<i32>} : memref<18x16x96xf32, #tpu.memory_space<vmem>>, vector<18x15x32xf32>,
    %cst_75 = arith.constant 0.000000e+00 : f32
    %65 = vector.broadcast %cst_75 : f32 to vector<18x1x32xf32>
    %c0_76 = arith.constant 0 : index
    %c0_77 = arith.constant 0 : index
    %c0_78 = arith.constant 0 : index
    %66 = vector.load %arg9[%c0_76, %c0_77, %c0_78] : memref<18x16x96xf32, #tpu.memory_space<vmem>>, vector<18x1x32xf32>
    tpu.vector_store %arg9[%c0_76, %c0_77, %c0_78], %65 {strides = array<i32>} : memref<18x16x96xf32, #tpu.memory_space<vmem>>, vector<18x1x32xf32>,
    %c0_79 = arith.constant 0 : index
    %c15_80 = arith.constant 15 : index
    %c64_81 = arith.constant 64 : index
    %67 = vector.load %arg9[%c0_79, %c15_80, %c64_81] : memref<18x16x96xf32, #tpu.memory_space<vmem>>, vector<18x1x32xf32>
    tpu.vector_store %arg9[%c0_79, %c15_80, %c64_81], %65 {strides = array<i32>} : memref<18x16x96xf32, #tpu.memory_space<vmem>>, vector<18x1x32xf32>,
    %c0_i32_82 = arith.constant 0 : i32
    %68 = arith.cmpi eq, %arg1, %c0_i32_82 : i32
    %69 = arith.extui %68 : i1 to i32
    %c0_i32_83 = arith.constant 0 : i32
    %70 = arith.cmpi ne, %69, %c0_i32_83 : i32
    scf.if %70 {
      %cst_116 = arith.constant 0.000000e+00 : f32
      %99 = vector.broadcast %cst_116 : f32 to vector<1x16x96xf32>
      %c0_117 = arith.constant 0 : index
      %c0_118 = arith.constant 0 : index
      %c0_119 = arith.constant 0 : index
      %100 = vector.load %arg9[%c0_117, %c0_118, %c0_119] : memref<18x16x96xf32, #tpu.memory_space<vmem>>, vector<1x16x96xf32>
      tpu.vector_store %arg9[%c0_117, %c0_118, %c0_119], %99 {strides = array<i32>} : memref<18x16x96xf32, #tpu.memory_space<vmem>>, vector<1x16x96xf32>,
    } else {
    }
    %c0_i32_84 = arith.constant 0 : i32
    %71 = arith.cmpi eq, %arg1, %c0_i32_84 : i32
    %72 = arith.extui %71 : i1 to i32
    %c0_i32_85 = arith.constant 0 : i32
    %73 = arith.cmpi ne, %72, %c0_i32_85 : i32
    scf.if %73 {
      %cst_116 = arith.constant 0.000000e+00 : f32
      %99 = vector.broadcast %cst_116 : f32 to vector<1x16x96xf32>
      %c17 = arith.constant 17 : index
      %c0_117 = arith.constant 0 : index
      %c0_118 = arith.constant 0 : index
      %100 = vector.load %arg9[%c17, %c0_117, %c0_118] : memref<18x16x96xf32, #tpu.memory_space<vmem>>, vector<1x16x96xf32>
      tpu.vector_store %arg9[%c17, %c0_117, %c0_118], %99 {strides = array<i32>} : memref<18x16x96xf32, #tpu.memory_space<vmem>>, vector<1x16x96xf32>,
    } else {
    }
    %cst_86 = arith.constant 0.000000e+00 : f32
    %74 = vector.broadcast %cst_86 : f32 to vector<16x16x32xf32>
    %c0_87 = arith.constant 0 : index
    %c0_88 = arith.constant 0 : index
    %c0_89 = arith.constant 0 : index
    %75 = vector.load %arg9[%c0_87, %c0_88, %c0_89] : memref<18x16x96xf32, #tpu.memory_space<vmem>>, vector<16x16x96xf32>
    %c0_90 = arith.constant 0 : index
    %c0_91 = arith.constant 0 : index
    %c0_92 = arith.constant 0 : index
    %76 = vector.load %arg4[%c0_90, %c0_91, %c0_92] : memref<3x96x32xf32, #tpu.memory_space<vmem>>, vector<1x96x32xf32>
    %77 = vector.shape_cast %76 : vector<1x96x32xf32> to vector<96x32xf32>
    %cst_93 = arith.constant dense<0.000000e+00> : vector<16x16x32xf32>
    %78 = tpu.matmul %75, %77, %cst_93 {dimension_numbers = #tpu.dot_dimension_numbers<[2], [0], [0, 1], [1], [0, 0, 0, 1, 1, 1], [], []>} : vector<16x16x96xf32>, vector<96x32xf32>, vector<16x16x32xf32> -> vector<16x16x32xf32>
    %79 = arith.addf %74, %78 : vector<16x16x32xf32>
    %c1_94 = arith.constant 1 : index
    %c0_95 = arith.constant 0 : index
    %c0_96 = arith.constant 0 : index
    %80 = vector.load %arg9[%c1_94, %c0_95, %c0_96] : memref<18x16x96xf32, #tpu.memory_space<vmem>>, vector<16x16x96xf32>
    %c1_97 = arith.constant 1 : index
    %c0_98 = arith.constant 0 : index
    %c0_99 = arith.constant 0 : index
    %81 = vector.load %arg4[%c1_97, %c0_98, %c0_99] : memref<3x96x32xf32, #tpu.memory_space<vmem>>, vector<1x96x32xf32>
    %82 = vector.shape_cast %81 : vector<1x96x32xf32> to vector<96x32xf32>
    %cst_100 = arith.constant dense<0.000000e+00> : vector<16x16x32xf32>
    %83 = tpu.matmul %80, %82, %cst_100 {dimension_numbers = #tpu.dot_dimension_numbers<[2], [0], [0, 1], [1], [0, 0, 0, 1, 1, 1], [], []>} : vector<16x16x96xf32>, vector<96x32xf32>, vector<16x16x32xf32> -> vector<16x16x32xf32>
    %84 = arith.addf %79, %83 : vector<16x16x32xf32>
    %c2_101 = arith.constant 2 : index
    %c0_102 = arith.constant 0 : index
    %c0_103 = arith.constant 0 : index
    %85 = vector.load %arg9[%c2_101, %c0_102, %c0_103] : memref<18x16x96xf32, #tpu.memory_space<vmem>>, vector<16x16x96xf32>
    %c2_104 = arith.constant 2 : index
    %c0_105 = arith.constant 0 : index
    %c0_106 = arith.constant 0 : index
    %86 = vector.load %arg4[%c2_104, %c0_105, %c0_106] : memref<3x96x32xf32, #tpu.memory_space<vmem>>, vector<1x96x32xf32>
    %87 = vector.shape_cast %86 : vector<1x96x32xf32> to vector<96x32xf32>
    %cst_107 = arith.constant dense<0.000000e+00> : vector<16x16x32xf32>
    %88 = tpu.matmul %85, %87, %cst_107 {dimension_numbers = #tpu.dot_dimension_numbers<[2], [0], [0, 1], [1], [0, 0, 0, 1, 1, 1], [], []>} : vector<16x16x96xf32>, vector<96x32xf32>, vector<16x16x32xf32> -> vector<16x16x32xf32>
    %89 = arith.addf %84, %88 : vector<16x16x32xf32>
    %c0_108 = arith.constant 0 : index
    %c0_109 = arith.constant 0 : index
    %c0_110 = arith.constant 0 : index
    %90 = vector.load %arg6[%c0_108, %c0_109, %c0_110] : memref<1x1x32xf32, #tpu.memory_space<vmem>>, vector<1x1x32xf32>
    %91 = vector.broadcast %90 : vector<1x1x32xf32> to vector<16x16x32xf32>
    %92 = arith.addf %89, %91 : vector<16x16x32xf32>
    %93 = arith.addf %92, %4 : vector<16x16x32xf32>
    %cst_111 = arith.constant 0.000000e+00 : f32
    %94 = vector.broadcast %cst_111 : f32 to vector<16x16x32xf32>
    %95 = arith.maximumf %93, %94 : vector<16x16x32xf32>
    %c0_112 = arith.constant 0 : index
    %c0_113 = arith.constant 0 : index
    %c0_114 = arith.constant 0 : index
    %c0_115 = arith.constant 0 : index
    %96 = vector.load %arg7[%c0_112, %c0_113, %c0_114, %c0_115] : memref<1x16x16x32xf32, #tpu.memory_space<vmem>>, vector<1x16x16x32xf32>
    %97 = vector.shape_cast %96 : vector<1x16x16x32xf32> to vector<16x16x32xf32>
    %98 = vector.shape_cast %95 : vector<16x16x32xf32> to vector<1x16x16x32xf32>
    tpu.vector_store %arg7[%c0_112, %c0_113, %c0_114, %c0_115], %98 {strides = array<i32>} : memref<1x16x16x32xf32, #tpu.memory_space<vmem>>, vector<1x16x16x32xf32>,
    return
  }
  func.func @transform_0(%arg0: i32, %arg1: i32) -> (i32, i32, i32, i32) {
    %c0_i32 = arith.constant 0 : i32
    %c0_i32_0 = arith.constant 0 : i32
    %c0_i32_1 = arith.constant 0 : i32
    %c0_i32_2 = arith.constant 0 : i32
    return %arg0, %c0_i32, %c0_i32_0, %c0_i32_1 : i32, i32, i32, i32
  }
  func.func @transform_1(%arg0: i32, %arg1: i32) -> (i32, i32, i32) {
    %c0_i32 = arith.constant 0 : i32
    %c0_i32_0 = arith.constant 0 : i32
    %c0_i32_1 = arith.constant 0 : i32
    %c0_i32_2 = arith.constant 0 : i32
    return %c0_i32, %c0_i32_0, %c0_i32_1 : i32, i32, i32
  }
  func.func @transform_2(%arg0: i32, %arg1: i32) -> (i32, i32, i32) {
    %c0_i32 = arith.constant 0 : i32
    %c0_i32_0 = arith.constant 0 : i32
    %c0_i32_1 = arith.constant 0 : i32
    %c0_i32_2 = arith.constant 0 : i32
    return %c0_i32, %c0_i32_0, %c0_i32_1 : i32, i32, i32
  }
  func.func @transform_3(%arg0: i32, %arg1: i32) -> (i32, i32, i32) {
    %c0_i32 = arith.constant 0 : i32
    %c0_i32_0 = arith.constant 0 : i32
    %c0_i32_1 = arith.constant 0 : i32
    %c0_i32_2 = arith.constant 0 : i32
    return %c0_i32, %c0_i32_0, %c0_i32_1 : i32, i32, i32
  }
  func.func @transform_4(%arg0: i32, %arg1: i32) -> (i32, i32, i32) {
    %c0_i32 = arith.constant 0 : i32
    %c0_i32_0 = arith.constant 0 : i32
    %c0_i32_1 = arith.constant 0 : i32
    %c0_i32_2 = arith.constant 0 : i32
    return %c0_i32, %c0_i32_0, %c0_i32_1 : i32, i32, i32
  }
  func.func @transform_5(%arg0: i32, %arg1: i32) -> (i32, i32, i32, i32) {
    %c0_i32 = arith.constant 0 : i32
    %c0_i32_0 = arith.constant 0 : i32
    %c0_i32_1 = arith.constant 0 : i32
    return %arg0, %arg1, %c0_i32, %c0_i32_0 : i32, i32, i32, i32
  }
}

</mosaic_0001>

<bundles_post_ra>
// kernel: basic_block_pallas.1
= control target key start
LH: loop header
LB: loop body
LE: loop exit
PB: predicated region body
PF: predicated region fallthrough
CT: control target
= control target key end

     0   :  { %10 = vsyncpa [#allocation5], 0  ;;  %s7294_s0 = inlined_call_operand.vmem [shape: f32[2,16,16,32], index: 0, kind: input, shape index: {}]   ;;  %s7295_s1 = inlined_call_operand.vmem [shape: f32[3,96,32], index: 1, kind: input, shape index: {}]   ;;  %s7296_s2 = inlined_call_operand.vmem [shape: f32[3,96,32], index: 2, kind: input, shape index: {}]   ;;  %s7297_s3 = inlined_call_operand.vmem [shape: f32[1,1,32], index: 3, kind: input, shape index: {}]   ;;  %s7298_s4 = inlined_call_operand.vmem [shape: f32[1,1,32], index: 4, kind: input, shape index: {}]   ;;  %s7299_s5 = inlined_call_operand.hbm [shape: f32[2,16,16,32], index: 5, kind: output, shape index: {}]  }
   0x1   :  { %12 = vsyncpa [#allocation5 + $0x1], 0  ;;  %s5094_s18 = smov 0   ;;  %s5096_s19 = smov 0  }
   0x2   :  { %s5098_s20 = smov 0   ;;  %s5100_s21 = smov 0  }
   0x3   :  { %s5102_s22 = smov 0   ;;  %s5104_s23 = smov 0  }
   0x4 LB: > { %s3845_s24 = sadd.s32 4294967295, %s5056_s23   ;;  %s3846_s25 = sadd.s32 4294967294, %s5056_s23   ;;  %s5056_s23 = sphi %s5104_s23, %s18_s23   ;;  %s5052_s22 = sphi %s5102_s22, %s7383_s22   ;;  %s5048_s21 = sphi %s5100_s21, %s7382_s21   ;;  %s5044_s20 = sphi %s5098_s20, %s7381_s20   ;;  %s5040_s19 = sphi %s5096_s19, %s7380_s19   ;;  %s5036_s18 = sphi %s5094_s18, %s7379_s18  }
   0x5   : > { %s30_s26 = sadd.s32 1, %s5052_s22  ;;  %s149_s27 = sadd.s32 1, %s5044_s20 }
   0x6   : > { %p32_p0 = scmp.ge.s32.totalorder %s30_s26, 2  ;;  %p159_p1 = scmp.ne.s32.totalorder %s5044_s20, %s5040_s19 }
   0x7   : > { %p160_p2 = scmp.eq.s32.totalorder %s3845_s24, 1  ;;  %p165_p3 = scmp.ne.s32.totalorder %s5040_s19, %s5036_s18 }
   0x8   : > { %s7385_s26 = smov (%p32_p0, %s30_s26), 0  ;;  %p166_p5 = scmp.eq.s32.totalorder %s3846_s25, 1 }
   0x9   : > { %p5134_p4 = por %p160_p2, %p159_p1  ;;  %s144_s29 = ssub.s32 %s5052_s22, %s7385_s26 }
   0xa   : > { %p3849_p6 = scmp.ge.s32.totalorder %s5056_s23, 1  ;;  %p147_p7 = scmp.eq.s32.totalorder %s144_s29, 0 }
   0xb   : > { %p5141_p8 = por %p166_p5, %p165_p3  ;;  %p204_p9 = scmp.lt.s32.totalorder %s5056_s23, 3 }
   0xc   : > { %s5147_s6 = scalar_select %p147_p7, %s5044_s20, %s149_s27  }
   0xd   : > { %p205_p10 = pnand %p3849_p6, %p204_p9 }
   0xf   : > { %208 = sbr.rel (%p205_p10) target bundleno = 1036 (0x40c), region = 40 }
  0x14   : > { %v3868_v0 = vld [vmem:[%s7295_s1 + $0xb8] sm:$0xff]  ;;  %v3867_v1 = vld [vmem:[%s7295_s1 + $0xb0] sm:$0xff]  ;;  %p232_p11 = scmp.lt.s32.totalorder %s5048_s21, 1  ;;  %vm309_vm0 = vcmask 260096   ;;  %v3866_v2 = vld [vmem:[%s7295_s1 + $0xa8] sm:$0xff]  ;;  %vm307_vm1 = vcmask 261120  }
  0x15   : > { %4394 = vmatprep.subr.mxu0 %v3868_v0  ;;  %v7311_v3 = vmov 0.0   ;;  %s5059_s13 = smov 32   ;;  %v3865_v4 = vld [vmem:[%s7295_s1 + $0xa0] sm:$0xff]  ;;  %v3864_v5 = vld [vmem:[%s7295_s1 + $0x98] sm:$0xff]  ;;  %v3863_v6 = vld [vmem:[%s7295_s1 + $0x90] sm:$0xff]  ;;  %s5060_s10 = smov 64  }
  0x16   : > { %4395 = vmatpush3.msra.mxu0 %v3868_v0  ;;  %312 = vst.msk [vmem:[#allocation2 + $0x19] sm:$0x7f] %vm309_vm0, %v7311_v3  ;;  %310 = vst.msk [vmem:[#allocation2 + $0x9] sm:$0x7f] %vm309_vm0, %v7311_v3  ;;  %4929 = vrot.lane.b32.xlu0 %v7311_v3, %s5059_s13  ;;  %s233_s14 = scalar_select %p232_p11, %s5048_s21, 1  ;;  %v3862_v13 = vld [vmem:[%s7295_s1 + $0x88] sm:$0xff] }
  0x17   : > { %675 = vst.msk [vmem:[#allocation2 + $0x129] sm:$0x7f] %vm309_vm0, %v7311_v3  ;;  %677 = vst.msk [vmem:[#allocation2 + $0x139] sm:$0x7f] %vm309_vm0, %v7311_v3  ;;  %4396 = vmatprep.subr.mxu0 %v3867_v1  ;;  %v3861_v20 = vld [vmem:[%s7295_s1 + $0x80] sm:$0xff]  ;;  %v3860_v27 = vld [vmem:[%s7295_s1 + $0x78] sm:$0xff] }
  0x18   : > { %311 = vst.msk [vmem:[#allocation2 + $0x11] sm:$0xff] %vm307_vm1, %v7311_v3  ;;  %308 = vst.msk [vmem:[#allocation2 + $0x1] sm:$0xff] %vm307_vm1, %v7311_v3  ;;  %4397 = vmatpush3.msra.mxu0 %v3867_v1  ;;  %s4116_s17 = sshll.u32 %s233_s14, 8  ;;  %v3859_v34 = vld [vmem:[%s7295_s1 + $0x70] sm:$0xff]  ;;  %v3858_v43 = vld [vmem:[%s7295_s1 + $0x68] sm:$0xff]  ;;  %vm329_vm2 = vcmask 523520  }
  0x19   : > { %674 = vst.msk [vmem:[#allocation2 + $0x121] sm:$0xff] %vm307_vm1, %v7311_v3  ;;  %676 = vst.msk [vmem:[#allocation2 + $0x131] sm:$0xff] %vm307_vm1, %v7311_v3  ;;  %4398 = vmatprep.subr.mxu0 %v3866_v2  ;;  %s5184_s27 = scalar_lea.vmem %s7294_s0, %s4116_s17  ;;  %v3857_v44 = vld [vmem:[%s7295_s1 + $0x60] sm:$0xff]  ;;  %v5441_v45 = vld [vmem:[%s7295_s1 + $0x118] sm:$0xff]  ;;  %vm735_vm3 = vcmask 778752   ;;  %vm346_vm4 = vcmask 785921  }
  0x1a   : > { %4399 = vmatpush3.msra.mxu0 %v3866_v2  ;;  %4934 = vrot.lane.b32.xlu0 %v7311_v3, %s5060_s10  ;;  %v5195_v7 = vld [vmem:[%s5184_s27] sm:$0xff]  ;;  %v5198_v8 = vld [vmem:[%s5184_s27 + $0x8] sm:$0xff]  ;;  %v5201_v9 = vld [vmem:[%s5184_s27 + $0x10] sm:$0xff]  ;;  %vm348_vm5 = vcmask 785920   ;;  %vm714_vm6 = vcmask 253952   ;;  %vm854_vm7 = vcmask 785408  }
  0x1b   : > { %4400 = vmatprep.subr.mxu0 %v3865_v4  ;;  %417 = vrot.lane.b32.xlu1 %v5195_v7, %s5059_s13  ;;  %v5206_v10 = vld [vmem:[%s5184_s27 + $0x18] sm:$0xff]  ;;  %v5209_v11 = vld [vmem:[%s5184_s27 + $0x20] sm:$0xff]  ;;  %v5212_v12 = vld [vmem:[%s5184_s27 + $0x28] sm:$0xff]  ;;  %353 = vst.msk [vmem:[#allocation2 + $0x21] sm:$0xff] %vm307_vm1, %v5195_v7  ;;  %s229_s7 = sand.u32 1, %s5040_s19   ;;  %s5061_s17 = smov [#allocation4]  }
  0x1c   : > { %4401 = vmatpush3.msra.mxu0 %v3865_v4  ;;  %354 = vst.msk [vmem:[#allocation2 + $0x29] sm:$0x7f] %vm309_vm0, %v5198_v8  ;;  %v5224_v14 = vld [vmem:[%s5184_s27 + $0x30] sm:$0xff]  ;;  %v5227_v15 = vld [vmem:[%s5184_s27 + $0x38] sm:$0xff]  ;;  %v5230_v16 = vld [vmem:[%s5184_s27 + $0x40] sm:$0xff]  ;;  %s3850_s9 = sshll.u32 %s229_s7, 8 }
  0x1d   : > { %355 = vst.msk [vmem:[#allocation2 + $0x31] sm:$0xff] %vm307_vm1, %v5201_v9  ;;  %357 = vst.msk [vmem:[#allocation2 + $0x41] sm:$0xff] %vm307_vm1, %v5209_v11  ;;  %4402 = vmatprep.subr.mxu0 %v3864_v5  ;;  %v5239_v17 = vld [vmem:[%s5184_s27 + $0x48] sm:$0xff]  ;;  %v5242_v18 = vld [vmem:[%s5184_s27 + $0x50] sm:$0xff]  ;;  %s7075_s11 = scalar_lea.vmem [#allocation4], %s3850_s9  ;;  %s4984_s24 = sshll.u32 %s5061_s17, 4  ;;  %s4985_s24 = int_to_ptr.vmem [resolvable:$false] %s4984_s24 }
  0x1e   : > { %356 = vst.msk [vmem:[#allocation2 + $0x39] sm:$0x7f] %vm309_vm0, %v5206_v10  ;;  %358 = vst.msk [vmem:[#allocation2 + $0x49] sm:$0x7f] %vm309_vm0, %v5212_v12  ;;  %v5245_v19 = vld [vmem:[%s5184_s27 + $0x58] sm:$0xff]  ;;  %4403 = vmatpush3.msra.mxu0 %v3864_v5  ;;  %545 = vrot.lane.b32.xlu0 %v5195_v7, %s5060_s10  ;;  %v5259_v21 = vld [vmem:[%s5184_s27 + $0x60] sm:$0xff] }
  0x1f   : > { %359 = vst.msk [vmem:[#allocation2 + $0x51] sm:$0xff] %vm307_vm1, %v5224_v14  ;;  %361 = vst.msk [vmem:[#allocation2 + $0x61] sm:$0xff] %vm307_vm1, %v5230_v16  ;;  %v5262_v22 = vld [vmem:[%s5184_s27 + $0x68] sm:$0xff]  ;;  %v5265_v23 = vld [vmem:[%s5184_s27 + $0x70] sm:$0xff]  ;;  %4404 = vmatprep.subr.mxu0 %v3863_v6  ;;  %419 = vrot.lane.b32.xlu1 %v5198_v8, %s5059_s13  ;;  %s3766_s12 = sshll.u32 %s7075_s11, 4  ;;  %s4986_s25 = scalar_lea.vmem %s4985_s24, 8192  ;;  %s7241_s12 = int_to_ptr.vmem [resolvable:$true] %s3766_s12 }
  0x20   : > { %360 = vst.msk [vmem:[#allocation2 + $0x59] sm:$0x7f] %vm309_vm0, %v5227_v15  ;;  %7324 = vst [vmem:[#allocation7_spill] sm:$0xff] %v5259_v21  ;;  %v5276_v24 = vld [vmem:[%s5184_s27 + $0x78] sm:$0xff]  ;;  %v5279_v25 = vld [vmem:[%s5184_s27 + $0x80] sm:$0xff]  ;;  %4405 = vmatpush3.msra.mxu0 %v3863_v6  ;;  %s4980_s16 = scalar_lea.vmem %s7241_s12, 4096  ;;  %p4987_p1 = scmp.lt.s32.totalorder %s7241_s12, %s4985_s24 }
  0x21   : > { %7325 = vst [vmem:[#allocation8_spill] sm:$0xff] %v5262_v22  ;;  %7326 = vst [vmem:[#allocation9_spill] sm:$0xff] %v5265_v23  ;;  %v5282_v26 = vld [vmem:[%s5184_s27 + $0x88] sm:$0xff]  ;;  %v5294_v28 = vld [vmem:[%s5184_s27 + $0x90] sm:$0xff]  ;;  %4406 = vmatprep.subr.mxu0 %v3862_v13  ;;  %p4981_p12 = scmp.ne.s32.totalorder %s7241_s12, %s4980_s16  ;;  %p4988_p2 = scmp.lt.s32.totalorder %s4986_s25, %s4980_s16 }
  0x22   : > { %362 = vst.msk [vmem:[#allocation2 + $0x69] sm:$0x7f] %vm309_vm0, %v5239_v17  ;;  %364 = vst.msk [vmem:[#allocation2 + $0x79] sm:$0x7f] %vm309_vm0, %v5245_v19  ;;  %v5297_v29 = vld [vmem:[%s5184_s27 + $0x98] sm:$0xff]  ;;  %v5300_v30 = vld [vmem:[%s5184_s27 + $0xa0] sm:$0xff]  ;;  %4407 = vmatpush3.msra.mxu0 %v3862_v13  ;;  %421 = vrot.lane.b32.xlu0 %v5201_v9, %s5059_s13 }
  0x23   : > { %363 = vst.msk [vmem:[#allocation2 + $0x71] sm:$0xff] %vm307_vm1, %v5242_v18  ;;  %7327 = vst [vmem:[#allocation10_spill] sm:$0xff] %v5276_v24  ;;  %v5309_v31 = vld [vmem:[%s5184_s27 + $0xa8] sm:$0xff]  ;;  %v5312_v32 = vld [vmem:[%s5184_s27 + $0xb0] sm:$0xff]  ;;  %4408 = vmatprep.subr.mxu0 %v3861_v20  ;;  %547 = vrot.lane.b32.xlu1 %v5198_v8, %s5060_s10  ;;  %p4982_p13 = pnand %p4981_p12, %p5134_p4  ;;  %p4989_p3 = por %p4988_p2, %p4987_p1 }
  0x24   : > { %7328 = vst [vmem:[#allocation11_spill] sm:$0xff] %v5279_v25  ;;  %7329 = vst [vmem:[#allocation12_spill] sm:$0xff] %v5282_v26  ;;  %v5315_v33 = vld [vmem:[%s5184_s27 + $0xb8] sm:$0xff]  ;;  %v5329_v35 = vld [vmem:[%s5184_s27 + $0xc0] sm:$0xff]  ;;  %4409 = vmatpush3.msra.mxu0 %v3861_v20 }
  0x25   : > { %365 = vst.msk [vmem:[#allocation2 + $0x81] sm:$0xff] %vm307_vm1, %v5259_v21  ;;  %367 = vst.msk [vmem:[#allocation2 + $0x91] sm:$0xff] %vm307_vm1, %v5265_v23  ;;  %v5332_v36 = vld [vmem:[%s5184_s27 + $0xc8] sm:$0xff]  ;;  %v5335_v37 = vld [vmem:[%s5184_s27 + $0xd0] sm:$0xff]  ;;  %4410 = vmatprep.subr.mxu0 %v3860_v27  ;;  %p4983_p0 = pneg %p4982_p13 }
  0x26   : > { %366 = vst.msk [vmem:[#allocation2 + $0x89] sm:$0x7f] %vm309_vm0, %v5262_v22  ;;  %7330 = vst [vmem:[#allocation13_spill] sm:$0xff] %v5294_v28  ;;  %v5346_v38 = vld [vmem:[%s5184_s27 + $0xd8] sm:$0xff]  ;;  %v5355_v39 = vld [vmem:[%s5184_s27 + $0xe0] sm:$0xff]  ;;  %4411 = vmatpush3.msra.mxu0 %v3860_v27  ;;  %549 = vrot.lane.b32.xlu0 %v5201_v9, %s5060_s10 }
  0x27   : > { %7331 = vst [vmem:[#allocation14_spill] sm:$0xff] %v5297_v29  ;;  %7332 = vst [vmem:[#allocation15_spill] sm:$0xff] %v5300_v30  ;;  %v5358_v40 = vld [vmem:[%s5184_s27 + $0xe8] sm:$0xff]  ;;  %v5367_v41 = vld [vmem:[%s5184_s27 + $0xf0] sm:$0xff]  ;;  %4412 = vmatprep.subr.mxu0 %v3859_v34  ;;  %423 = vrot.lane.b32.xlu1 %v5206_v10, %s5059_s13  ;;  %p4990_p5 = pnand %p4989_p3, %p4983_p0 }
  0x28   : > { %368 = vst.msk [vmem:[#allocation2 + $0x99] sm:$0x7f] %vm309_vm0, %v5276_v24  ;;  %370 = vst.msk [vmem:[#allocation2 + $0xa9] sm:$0x7f] %vm309_vm0, %v5282_v26  ;;  %v5370_v42 = vld [vmem:[%s5184_s27 + $0xf8] sm:$0xff]  ;;  %4413 = vmatpush3.msra.mxu0 %v3859_v34  ;;  %v802_v50 = vld [vmem:[%s7295_s1 + $0x50] sm:$0xff] }
  0x29   : > { %369 = vst.msk [vmem:[#allocation2 + $0xa1] sm:$0xff] %vm307_vm1, %v5279_v25  ;;  %7333 = vst [vmem:[#allocation16_spill] sm:$0xff] %v5309_v31  ;;  %4414 = vmatprep.subr.mxu0 %v3858_v43  ;;  %v803_v49 = vld [vmem:[%s7295_s1 + $0x58] sm:$0xff]  ;;  %v801_v55 = vld [vmem:[%s7295_s1 + $0x48] sm:$0xff] }
  0x2a   : > { %7334 = vst [vmem:[#allocation17_spill] sm:$0xff] %v5312_v32  ;;  %7335 = vst [vmem:[#allocation18_spill] sm:$0xff] %v5315_v33  ;;  %4415 = vmatpush3.msra.mxu0 %v3858_v43  ;;  %425 = vrot.lane.b32.xlu0 %v5209_v11, %s5059_s13  ;;  %v800_v56 = vld [vmem:[%s7295_s1 + $0x40] sm:$0xff]  ;;  %v799_v59 = vld [vmem:[%s7295_s1 + $0x38] sm:$0xff] }
  0x2b   : > { %371 = vst.msk [vmem:[#allocation2 + $0xb1] sm:$0xff] %vm307_vm1, %v5294_v28  ;;  %373 = vst.msk [vmem:[#allocation2 + $0xc1] sm:$0xff] %vm307_vm1, %v5300_v30  ;;  %4416 = vmatprep.subr.mxu0 %v3857_v44  ;;  %551 = vrot.lane.b32.xlu1 %v5206_v10, %s5060_s10  ;;  %v798_v60 = vld [vmem:[%s7295_s1 + $0x30] sm:$0xff]  ;;  %v797_v63 = vld [vmem:[%s7295_s1 + $0x28] sm:$0xff] }
  0x2c   : > { %372 = vst.msk [vmem:[#allocation2 + $0xb9] sm:$0x7f] %vm309_vm0, %v5297_v29  ;;  %7336 = vst [vmem:[#allocation19_spill] sm:$0xff] %v5329_v35  ;;  %4417 = vmatpush3.msra.mxu0 %v3857_v44  ;;  %4472 = vmatprep.subr.mxu1 %v803_v49  ;;  %v796_v2 = vld [vmem:[%s7295_s1 + $0x20] sm:$0xff]  ;;  %v3951_v5 = vld [vmem:[%s7295_s1 + $0x110] sm:$0xff] }
  0x2d   : > { %7337 = vst [vmem:[#allocation20_spill] sm:$0xff] %v5332_v36  ;;  %7338 = vst [vmem:[#allocation21_spill] sm:$0xff] %v5335_v37  ;;  %4550 = vmatprep.subr.mxu0 %v5441_v45  ;;  %4473 = vmatpush3.msra.mxu1 %v803_v49  ;;  %v795_v13 = vld [vmem:[%s7295_s1 + $0x18] sm:$0xff]  ;;  %v3950_v20 = vld [vmem:[%s7295_s1 + $0x108] sm:$0xff] }
  0x2e   : > { %374 = vst.msk [vmem:[#allocation2 + $0xc9] sm:$0x7f] %vm309_vm0, %v5309_v31  ;;  %376 = vst.msk [vmem:[#allocation2 + $0xd9] sm:$0x7f] %vm309_vm0, %v5315_v33  ;;  %553 = vrot.lane.b32.xlu0 %v5209_v11, %s5060_s10  ;;  %4474 = vmatprep.subr.mxu1 %v802_v50 }
  0x2f   : > { %375 = vst.msk [vmem:[#allocation2 + $0xd1] sm:$0xff] %vm307_vm1, %v5312_v32  ;;  %7339 = vst [vmem:[#allocation22_spill] sm:$0xff] %v5346_v38  ;;  %427 = vrot.lane.b32.xlu1 %v5212_v12, %s5059_s13  ;;  %4475 = vmatpush3.msra.mxu1 %v802_v50  ;;  %v793_v50 = vld [vmem:[%s7295_s1 + $0x8] sm:$0xff] }
  0x30   : > { %377 = vst.msk [vmem:[#allocation2 + $0xe1] sm:$0xff] %vm307_vm1, %v5329_v35  ;;  %379 = vst.msk [vmem:[#allocation2 + $0xf1] sm:$0xff] %vm307_vm1, %v5335_v37  ;;  %4476 = vmatprep.subr.mxu1 %v801_v55 }
  0x31   : > { %378 = vst.msk [vmem:[#allocation2 + $0xe9] sm:$0x7f] %vm309_vm0, %v5332_v36  ;;  %7340 = vst [vmem:[#allocation23_spill] sm:$0xff] %v5355_v39  ;;  %4477 = vmatpush3.msra.mxu1 %v801_v55 }
  0x32   : > { %7341 = vst [vmem:[#allocation24_spill] sm:$0xff] %v5358_v40  ;;  %380 = vst.msk [vmem:[#allocation2 + $0xf9] sm:$0x7f] %vm309_vm0, %v5346_v38  ;;  %429 = vrot.lane.b32.xlu0 %v5224_v14, %s5059_s13  ;;  %4478 = vmatprep.subr.mxu1 %v800_v56 }
  0x33   : > { %381 = vst.msk [vmem:[#allocation2 + $0x101] sm:$0xff] %vm307_vm1, %v5355_v39  ;;  %7342 = vst [vmem:[#allocation25_spill] sm:$0xff] %v5367_v41  ;;  %555 = vrot.lane.b32.xlu1 %v5212_v12, %s5060_s10  ;;  %4479 = vmatpush3.msra.mxu1 %v800_v56 }
  0x34   : > { %382 = vst.msk [vmem:[#allocation2 + $0x109] sm:$0x7f] %vm309_vm0, %v5358_v40  ;;  %7343 = vst [vmem:[#allocation26_spill] sm:$0xff] %v5370_v42  ;;  %4480 = vmatprep.subr.mxu1 %v799_v59 }
  0x35   : > { %383 = vst.msk [vmem:[#allocation2 + $0x111] sm:$0xff] %vm307_vm1, %v5367_v41  ;;  %4481 = vmatpush3.msra.mxu1 %v799_v59 }
  0x36   : > { %384 = vst.msk [vmem:[#allocation2 + $0x119] sm:$0x7f] %vm309_vm0, %v5370_v42  ;;  %557 = vrot.lane.b32.xlu0 %v5224_v14, %s5060_s10  ;;  %4482 = vmatprep.subr.mxu1 %v798_v60 }
  0x37   : > { %431 = vrot.lane.b32.xlu1 %v5227_v15, %s5059_s13  ;;  %4483 = vmatpush3.msra.mxu1 %v798_v60 }
  0x38   : > { %4484 = vmatprep.subr.mxu1 %v797_v63 }
  0x39   : > { %4485 = vmatpush3.msra.mxu1 %v797_v63 }
  0x3a   : > { %433 = vrot.lane.b32.xlu0 %v5230_v16, %s5059_s13  ;;  %4486 = vmatprep.subr.mxu1 %v796_v2 }
  0x3b   : > { %559 = vrot.lane.b32.xlu1 %v5227_v15, %s5060_s10  ;;  %4487 = vmatpush3.msra.mxu1 %v796_v2 }
  0x3c   : > { %4488 = vmatprep.subr.mxu1 %v795_v13 }
  0x3d   : > { %4489 = vmatpush3.msra.mxu1 %v795_v13 }
  0x3e   : > { %561 = vrot.lane.b32.xlu0 %v5230_v16, %s5060_s10 }
  0x3f   : > { %435 = vrot.lane.b32.xlu1 %v5239_v17, %s5059_s13 }
  0x42   : > { %437 = vrot.lane.b32.xlu0 %v5242_v18, %s5059_s13 }
  0x43   : > { %563 = vrot.lane.b32.xlu1 %v5239_v17, %s5060_s10 }
  0x46   : > { %565 = vrot.lane.b32.xlu0 %v5242_v18, %s5060_s10 }
  0x47   : > { %439 = vrot.lane.b32.xlu1 %v5245_v19, %s5059_s13 }
  0x4a   : > { %441 = vrot.lane.b32.xlu0 %v5259_v21, %s5059_s13 }
  0x4b   : > { %567 = vrot.lane.b32.xlu1 %v5245_v19, %s5060_s10 }
  0x4e   : > { %569 = vrot.lane.b32.xlu0 %v5259_v21, %s5060_s10 }
  0x4f   : > { %443 = vrot.lane.b32.xlu1 %v5262_v22, %s5059_s13 }
  0x52   : > { %445 = vrot.lane.b32.xlu0 %v5265_v23, %s5059_s13 }
  0x53   : > { %571 = vrot.lane.b32.xlu1 %v5262_v22, %s5060_s10  ;;  %v4069_v22 = vld [vmem:[%s7296_s2 + $0xd8] sm:$0xff] }
  0x56   : > { %573 = vrot.lane.b32.xlu0 %v5265_v23, %s5060_s10 }
  0x57   : > { %447 = vrot.lane.b32.xlu1 %v5276_v24, %s5059_s13 }
  0x5a   : > { %449 = vrot.lane.b32.xlu0 %v5279_v25, %s5059_s13 }
  0x5b   : > { %575 = vrot.lane.b32.xlu1 %v5276_v24, %s5060_s10 }
  0x5e   : > { %577 = vrot.lane.b32.xlu0 %v5279_v25, %s5060_s10  ;;  %v4075_v25 = vld [vmem:[%s7296_s2 + $0x108] sm:$0xff] }
  0x5f   : > { %451 = vrot.lane.b32.xlu1 %v5282_v26, %s5059_s13 }
  0x62   : > { %453 = vrot.lane.b32.xlu0 %v5294_v28, %s5059_s13 }
  0x63   : > { %579 = vrot.lane.b32.xlu1 %v5282_v26, %s5060_s10 }
  0x66   : > { %581 = vrot.lane.b32.xlu0 %v5294_v28, %s5060_s10 }
  0x67   : > { %455 = vrot.lane.b32.xlu1 %v5297_v29, %s5059_s13 }
  0x6a   : > { %457 = vrot.lane.b32.xlu0 %v5300_v30, %s5059_s13 }
  0x6b   : > { %583 = vrot.lane.b32.xlu1 %v5297_v29, %s5060_s10 }
  0x6e   : > { %585 = vrot.lane.b32.xlu0 %v5300_v30, %s5060_s10 }
  0x6f   : > { %459 = vrot.lane.b32.xlu1 %v5309_v31, %s5059_s13 }
  0x72   : > { %461 = vrot.lane.b32.xlu0 %v5312_v32, %s5059_s13 }
  0x73   : > { %587 = vrot.lane.b32.xlu1 %v5309_v31, %s5060_s10  ;;  %v6133_v31 = vld [vmem:[%s7297_s3] ss:$0 sm:$0xff] }
  0x76   : > { %589 = vrot.lane.b32.xlu0 %v5312_v32, %s5060_s10 }
  0x77   : > { %463 = vrot.lane.b32.xlu1 %v5315_v33, %s5059_s13 }
  0x7a   : > { %465 = vrot.lane.b32.xlu0 %v5329_v35, %s5059_s13 }
  0x7b   : > { %591 = vrot.lane.b32.xlu1 %v5315_v33, %s5060_s10 }
  0x7e   : > { %593 = vrot.lane.b32.xlu0 %v5329_v35, %s5060_s10 }
  0x7f   : > { %467 = vrot.lane.b32.xlu1 %v5332_v36, %s5059_s13 }
  0x82   : > { %469 = vrot.lane.b32.xlu0 %v5335_v37, %s5059_s13 }
  0x83   : > { %595 = vrot.lane.b32.xlu1 %v5332_v36, %s5060_s10 }
  0x86   : > { %597 = vrot.lane.b32.xlu0 %v5335_v37, %s5060_s10 }
  0x87   : > { %471 = vrot.lane.b32.xlu1 %v5346_v38, %s5059_s13 }
  0x88   : > { %v4930_v46 = vpop.permute.xlu0 %4929 }
  0x89   : > { %v4932_v47 = vunpack.i.h.bf16 %v4930_v46  ;;  %v4931_v48 = vunpack.i.l.bf16 %v4930_v46  ;;  %v3949_v46 = vld [vmem:[%s7295_s1 + $0x100] sm:$0xff] }
  0x8a   : > { %473 = vrot.lane.b32.xlu0 %v5355_v39, %s5059_s13 }
  0x8b   : > { %332 = vst.msk [vmem:[#allocation2 + $0x10] sm:$0xff] %vm329_vm2, %v4931_v48  ;;  %333 = vst.msk [vmem:[#allocation2 + $0x18] sm:$0xff] %vm329_vm2, %v4932_v47  ;;  %599 = vrot.lane.b32.xlu1 %v5346_v38, %s5060_s10  ;;  %v3948_v48 = vld [vmem:[%s7295_s1 + $0xf8] sm:$0xff] }
  0x8c   : > { %737 = vst.msk [vmem:[#allocation2 + $0x1f] sm:$0x1] %vm735_vm3, %v7311_v3  ;;  %v4935_v51 = vpop.permute.xlu0 %4934 }
  0x8d   : > { %v4937_v52 = vunpack.i.h.bf16 %v4935_v51  ;;  %v4936_v53 = vunpack.i.l.bf16 %v4935_v51  ;;  %v418_v54 = vpop.permute.xlu1 %417  ;;  %v3947_v51 = vld [vmem:[%s7295_s1 + $0xf0] sm:$0xff] }
  0x8e   : > { %513 = vst.msk [vmem:[#allocation2 + $0x20] sm:$0xff] %vm329_vm2, %v418_v54  ;;  %601 = vrot.lane.b32.xlu0 %v5355_v39, %s5060_s10 }
  0x8f   : > { %350 = vst.msk [vmem:[#allocation2 + $0xf] sm:$0xfe] %vm346_vm4, %v4936_v53  ;;  %475 = vrot.lane.b32.xlu1 %v5358_v40, %s5059_s13  ;;  %v3946_v53 = vld [vmem:[%s7295_s1 + $0xe8] sm:$0xff] }
  0x90   : > { %351 = vst.msk [vmem:[#allocation2 + $0x17] sm:$0xff] %vm348_vm5, %v4937_v52  ;;  %v546_v57 = vpop.permute.xlu0 %545 }
  0x91   : > { %716 = vst.msk [vmem:[#allocation2 + $0x10] sm:$0x1] %vm714_vm6, %v7311_v3  ;;  %v420_v58 = vpop.permute.xlu1 %419 }
  0x92   : > { %641 = vst.msk [vmem:[#allocation2 + $0x1f] sm:$0xfe] %vm346_vm4, %v546_v57  ;;  %477 = vrot.lane.b32.xlu0 %v5367_v41, %s5059_s13  ;;  %v792_v57 = vld [vmem:[%s7295_s1] sm:$0xff] }
  0x93   : > { %514 = vst.msk [vmem:[#allocation2 + $0x28] sm:$0xff] %vm329_vm2, %v420_v58  ;;  %603 = vrot.lane.b32.xlu1 %v5358_v40, %s5060_s10  ;;  %v3945_v58 = vld [vmem:[%s7295_s1 + $0xe0] sm:$0xff] }
  0x94   : > { %717 = vst.msk [vmem:[#allocation2 + $0x20] sm:$0x1] %vm714_vm6, %v7311_v3  ;;  %v422_v61 = vpop.permute.xlu0 %421 }
  0x95   : > { %738 = vst.msk [vmem:[#allocation2 + $0x2f] sm:$0x1] %vm735_vm3, %v7311_v3  ;;  %v548_v62 = vpop.permute.xlu1 %547 }
  0x96   : > { %515 = vst.msk [vmem:[#allocation2 + $0x30] sm:$0xff] %vm329_vm2, %v422_v61  ;;  %605 = vrot.lane.b32.xlu0 %v5367_v41, %s5060_s10  ;;  %v3944_v61 = vld [vmem:[%s7295_s1 + $0xd8] sm:$0xff] }
  0x97   : > { %642 = vst.msk [vmem:[#allocation2 + $0x27] sm:$0xff] %vm348_vm5, %v548_v62  ;;  %v5538_v0 = vld [vmem:[#allocation2 + $0x18] sm:$0xff]  ;;  %479 = vrot.lane.b32.xlu1 %v5370_v42, %s5059_s13  ;;  %v3943_v62 = vld [vmem:[%s7295_s1 + $0xd0] sm:$0xff] }
  0x98   : > { %v5544_v1 = vld [vmem:[#allocation2 + $0x10] sm:$0xff]  ;;  %v550_v4 = vpop.permute.xlu0 %549 }
  0x99   : > { %4418 = vmatprep.mubr.msk.f32.mxu0 %vm854_vm7, %v5544_v1  ;;  %v424_v6 = vpop.permute.xlu1 %423  ;;  %643 = vst.msk [vmem:[#allocation2 + $0x2f] sm:$0xfe] %vm346_vm4, %v550_v4 }
  0x9a   : > { %4419 = vmatmul.mubr.msk.f32.vlgmr.msra.gmra.mxu0 %vm854_vm7, %v5538_v0  ;;  %516 = vst.msk [vmem:[#allocation2 + $0x38] sm:$0xff] %vm329_vm2, %v424_v6  ;;  %4939 = vrot.lane.b32.xlu0 %v7311_v3, %s5059_s13  ;;  %v3942_v6 = vld [vmem:[%s7295_s1 + $0xc8] sm:$0xff] }
  0x9b   : > { %718 = vst.msk [vmem:[#allocation2 + $0x30] sm:$0x1] %vm714_vm6, %v7311_v3  ;;  %4551 = vmatpush3.msra.mxu0 %v5441_v45  ;;  %607 = vrot.lane.b32.xlu1 %v5370_v42, %s5060_s10  ;;  %v794_v45 = vld [vmem:[%s7295_s1 + $0x10] sm:$0xff] }
  0x9c   : > { %739 = vst.msk [vmem:[#allocation2 + $0x3f] sm:$0x1] %vm735_vm3, %v7311_v3  ;;  %4552 = vmatprep.subr.mxu0 %v3951_v5  ;;  %v426_v27 = vpop.permute.xlu0 %425  ;;  %4490 = vmatprep.subr.mxu1 %v794_v45 }
  0x9d   : > { %4553 = vmatpush3.msra.mxu0 %v3951_v5  ;;  %v552_v34 = vpop.permute.xlu1 %551  ;;  %517 = vst.msk [vmem:[#allocation2 + $0x40] sm:$0xff] %vm329_vm2, %v426_v27  ;;  %4491 = vmatpush3.msra.mxu1 %v794_v45 }
  0x9e   : > { %v5573_v43 = vld [vmem:[#allocation2 + $0x20] sm:$0xff]  ;;  %v5575_v44 = vld [vmem:[#allocation2 + $0x28] sm:$0xff]  ;;  %4554 = vmatprep.subr.mxu0 %v3950_v20  ;;  %644 = vst.msk [vmem:[#allocation2 + $0x37] sm:$0xff] %vm348_vm5, %v552_v34  ;;  %4949 = vrot.lane.b32.xlu0 %v7311_v3, %s5059_s13 }
  0x9f   : > { %4421 = vmatprep.mubr.msk.f32.mxu0 %vm854_vm7, %v5573_v43  ;;  %4944 = vrot.lane.b32.xlu1 %v7311_v3, %s5060_s10 }
  0xa0   : > { %4422 = vmatmul.mubr.msk.f32.gmra.mxu0 %vm854_vm7, %v5575_v44  ;;  %v554_v47 = vpop.permute.xlu0 %553  ;;  %4492 = vmatprep.subr.mxu1 %v793_v50 }
  0xa1   : > { %4555 = vmatpush3.msra.mxu0 %v3950_v20  ;;  %v428_v49 = vpop.permute.xlu1 %427  ;;  %645 = vst.msk [vmem:[#allocation2 + $0x3f] sm:$0xfe] %vm346_vm4, %v554_v47  ;;  %4493 = vmatpush3.msra.mxu1 %v793_v50  ;;  %v3941_v20 = vld [vmem:[%s7295_s1 + $0xc0] sm:$0xff] }
  0xa2   : > { %4556 = vmatprep.subr.mxu0 %v3949_v46  ;;  %518 = vst.msk [vmem:[#allocation2 + $0x48] sm:$0xff] %vm329_vm2, %v428_v49  ;;  %4959 = vrot.lane.b32.xlu0 %v7311_v3, %s5059_s13 }
  0xa3   : > { %719 = vst.msk [vmem:[#allocation2 + $0x40] sm:$0x1] %vm714_vm6, %v7311_v3  ;;  %4557 = vmatpush3.msra.mxu0 %v3949_v46  ;;  %4954 = vrot.lane.b32.xlu1 %v7311_v3, %s5060_s10 }
  0xa4   : > { %740 = vst.msk [vmem:[#allocation2 + $0x4f] sm:$0x1] %vm735_vm3, %v7311_v3  ;;  %4558 = vmatprep.subr.mxu0 %v3948_v48  ;;  %v430_v52 = vpop.permute.xlu0 %429  ;;  %4494 = vmatprep.subr.mxu1 %v792_v57 }
  0xa5   : > { %4559 = vmatpush3.msra.mxu0 %v3948_v48  ;;  %v556_v54 = vpop.permute.xlu1 %555  ;;  %v5615_v55 = vld [vmem:[#allocation2 + $0x30] sm:$0xff]  ;;  %v5617_v56 = vld [vmem:[#allocation2 + $0x38] sm:$0xff]  ;;  %519 = vst.msk [vmem:[#allocation2 + $0x50] sm:$0xff] %vm329_vm2, %v430_v52  ;;  %4495 = vmatpush3.msra.mxu1 %v792_v57 }
  0xa6   : > { %4560 = vmatprep.subr.mxu0 %v3947_v51  ;;  %646 = vst.msk [vmem:[#allocation2 + $0x47] sm:$0xff] %vm348_vm5, %v556_v54  ;;  %4424 = vmatprep.mubr.msk.f32.mxu0 %vm854_vm7, %v5615_v55 }
  0xa7   : > { %4561 = vmatpush3.msra.mxu0 %v3947_v51  ;;  %4964 = vrot.lane.b32.xlu1 %v7311_v3, %s5060_s10 }
  0xa8   : > { %4425 = vmatmul.mubr.msk.f32.gmra.mxu0 %vm854_vm7, %v5617_v56  ;;  %v558_v59 = vpop.permute.xlu0 %557  ;;  %4562 = vmatprep.subr.mxu0 %v3946_v53 }
  0xa9   : > { %v432_v60 = vpop.permute.xlu1 %431  ;;  %647 = vst.msk [vmem:[#allocation2 + $0x4f] sm:$0xfe] %vm346_vm4, %v558_v59  ;;  %4563 = vmatpush3.msra.mxu0 %v3946_v53 }
  0xaa   : > { %520 = vst.msk [vmem:[#allocation2 + $0x58] sm:$0xff] %vm329_vm2, %v432_v60  ;;  %4564 = vmatprep.subr.mxu0 %v3945_v58 }
  0xab   : > { %720 = vst.msk [vmem:[#allocation2 + $0x50] sm:$0x1] %vm714_vm6, %v7311_v3  ;;  %4565 = vmatpush3.msra.mxu0 %v3945_v58 }
  0xac   : > { %741 = vst.msk [vmem:[#allocation2 + $0x5f] sm:$0x1] %vm735_vm3, %v7311_v3  ;;  %v434_v63 = vpop.permute.xlu0 %433  ;;  %4566 = vmatprep.subr.mxu0 %v3944_v61 }
  0xad   : > { %v560_v2 = vpop.permute.xlu1 %559  ;;  %v5645_v4 = vld [vmem:[#allocation2 + $0x40] sm:$0xff]  ;;  %v5647_v5 = vld [vmem:[#allocation2 + $0x48] sm:$0xff]  ;;  %521 = vst.msk [vmem:[#allocation2 + $0x60] sm:$0xff] %vm329_vm2, %v434_v63  ;;  %4567 = vmatpush3.msra.mxu0 %v3944_v61 }
  0xae   : > { %648 = vst.msk [vmem:[#allocation2 + $0x57] sm:$0xff] %vm348_vm5, %v560_v2  ;;  %4427 = vmatprep.mubr.msk.f32.mxu0 %vm854_vm7, %v5645_v4  ;;  %4568 = vmatprep.subr.mxu0 %v3943_v62 }
  0xaf   : > { %4428 = vmatmul.mubr.msk.f32.gmra.mxu0 %vm854_vm7, %v5647_v5 }
  0xb0   : > { %v562_v13 = vpop.permute.xlu0 %561  ;;  %4569 = vmatpush3.msra.mxu0 %v3943_v62 }
  0xb1   : > { %v436_v27 = vpop.permute.xlu1 %435  ;;  %649 = vst.msk [vmem:[#allocation2 + $0x5f] sm:$0xfe] %vm346_vm4, %v562_v13  ;;  %4570 = vmatprep.subr.mxu0 %v3942_v6 }
  0xb2   : > { %522 = vst.msk [vmem:[#allocation2 + $0x68] sm:$0xff] %vm329_vm2, %v436_v27  ;;  %4571 = vmatpush3.msra.mxu0 %v3942_v6 }
  0xb3   : > { %721 = vst.msk [vmem:[#allocation2 + $0x60] sm:$0x1] %vm714_vm6, %v7311_v3  ;;  %4572 = vmatprep.subr.mxu0 %v3941_v20 }
  0xb4   : > { %742 = vst.msk [vmem:[#allocation2 + $0x6f] sm:$0x1] %vm735_vm3, %v7311_v3  ;;  %v438_v34 = vpop.permute.xlu0 %437  ;;  %4573 = vmatpush3.msra.mxu0 %v3941_v20 }
  0xb5   : > { %v564_v45 = vpop.permute.xlu1 %563  ;;  %v5667_v46 = vld [vmem:[#allocation2 + $0x50] sm:$0xff]  ;;  %v5669_v47 = vld [vmem:[#allocation2 + $0x58] sm:$0xff]  ;;  %523 = vst.msk [vmem:[#allocation2 + $0x70] sm:$0xff] %vm329_vm2, %v438_v34 }
  0xb6   : > { %650 = vst.msk [vmem:[#allocation2 + $0x67] sm:$0xff] %vm348_vm5, %v564_v45  ;;  %4430 = vmatprep.mubr.msk.f32.mxu0 %vm854_vm7, %v5667_v46 }
  0xb7   : > { %4431 = vmatmul.mubr.msk.f32.gmra.mxu0 %vm854_vm7, %v5669_v47 }
  0xb8   : > { %v566_v48 = vpop.permute.xlu0 %565 }
  0xb9   : > { %v440_v49 = vpop.permute.xlu1 %439  ;;  %651 = vst.msk [vmem:[#allocation2 + $0x6f] sm:$0xfe] %vm346_vm4, %v566_v48 }
  0xba   : > { %524 = vst.msk [vmem:[#allocation2 + $0x78] sm:$0xff] %vm329_vm2, %v440_v49 }
  0xbb   : > { %722 = vst.msk [vmem:[#allocation2 + $0x70] sm:$0x1] %vm714_vm6, %v7311_v3 }
  0xbc   : > { %743 = vst.msk [vmem:[#allocation2 + $0x7f] sm:$0x1] %vm735_vm3, %v7311_v3  ;;  %v442_v50 = vpop.permute.xlu0 %441 }
  0xbd   : > { %v568_v51 = vpop.permute.xlu1 %567  ;;  %v5683_v52 = vld [vmem:[#allocation2 + $0x60] sm:$0xff]  ;;  %v5685_v53 = vld [vmem:[#allocation2 + $0x68] sm:$0xff]  ;;  %525 = vst.msk [vmem:[#allocation2 + $0x80] sm:$0xff] %vm329_vm2, %v442_v50 }
  0xbe   : > { %652 = vst.msk [vmem:[#allocation2 + $0x77] sm:$0xff] %vm348_vm5, %v568_v51  ;;  %4433 = vmatprep.mubr.msk.f32.mxu0 %vm854_vm7, %v5683_v52 }
  0xbf   : > { %4434 = vmatmul.mubr.msk.f32.gmra.mxu0 %vm854_vm7, %v5685_v53 }
  0xc0   : > { %v570_v54 = vpop.permute.xlu0 %569 }
  0xc1   : > { %v444_v57 = vpop.permute.xlu1 %443  ;;  %653 = vst.msk [vmem:[#allocation2 + $0x7f] sm:$0xfe] %vm346_vm4, %v570_v54 }
  0xc2   : > { %526 = vst.msk [vmem:[#allocation2 + $0x88] sm:$0xff] %vm329_vm2, %v444_v57 }
  0xc3   : > { %723 = vst.msk [vmem:[#allocation2 + $0x80] sm:$0x1] %vm714_vm6, %v7311_v3 }
  0xc4   : > { %744 = vst.msk [vmem:[#allocation2 + $0x8f] sm:$0x1] %vm735_vm3, %v7311_v3  ;;  %v446_v58 = vpop.permute.xlu0 %445 }
  0xc5   : > { %v572_v59 = vpop.permute.xlu1 %571  ;;  %v5699_v60 = vld [vmem:[#allocation2 + $0x70] sm:$0xff]  ;;  %v5701_v61 = vld [vmem:[#allocation2 + $0x78] sm:$0xff]  ;;  %527 = vst.msk [vmem:[#allocation2 + $0x90] sm:$0xff] %vm329_vm2, %v446_v58 }
  0xc6   : > { %654 = vst.msk [vmem:[#allocation2 + $0x87] sm:$0xff] %vm348_vm5, %v572_v59  ;;  %4436 = vmatprep.mubr.msk.f32.mxu0 %vm854_vm7, %v5699_v60 }
  0xc7   : > { %4437 = vmatmul.mubr.msk.f32.gmra.mxu0 %vm854_vm7, %v5701_v61 }
  0xc8   : > { %v574_v62 = vpop.permute.xlu0 %573 }
  0xc9   : > { %v448_v63 = vpop.permute.xlu1 %447  ;;  %655 = vst.msk [vmem:[#allocation2 + $0x8f] sm:$0xfe] %vm346_vm4, %v574_v62 }
  0xca   : > { %528 = vst.msk [vmem:[#allocation2 + $0x98] sm:$0xff] %vm329_vm2, %v448_v63 }
  0xcb   : > { %724 = vst.msk [vmem:[#allocation2 + $0x90] sm:$0x1] %vm714_vm6, %v7311_v3 }
  0xcc   : > { %745 = vst.msk [vmem:[#allocation2 + $0x9f] sm:$0x1] %vm735_vm3, %v7311_v3  ;;  %v450_v2 = vpop.permute.xlu0 %449 }
  0xcd   : > { %v576_v6 = vpop.permute.xlu1 %575  ;;  %v5715_v13 = vld [vmem:[#allocation2 + $0x80] sm:$0xff]  ;;  %v5717_v20 = vld [vmem:[#allocation2 + $0x88] sm:$0xff]  ;;  %529 = vst.msk [vmem:[#allocation2 + $0xa0] sm:$0xff] %vm329_vm2, %v450_v2 }
  0xce   : > { %656 = vst.msk [vmem:[#allocation2 + $0x97] sm:$0xff] %vm348_vm5, %v576_v6  ;;  %4439 = vmatprep.mubr.msk.f32.mxu0 %vm854_vm7, %v5715_v13 }
  0xcf   : > { %4440 = vmatmul.mubr.msk.f32.gmra.mxu0 %vm854_vm7, %v5717_v20 }
  0xd0   : > { %v578_v27 = vpop.permute.xlu0 %577 }
  0xd1   : > { %v452_v34 = vpop.permute.xlu1 %451  ;;  %657 = vst.msk [vmem:[#allocation2 + $0x9f] sm:$0xfe] %vm346_vm4, %v578_v27 }
  0xd2   : > { %530 = vst.msk [vmem:[#allocation2 + $0xa8] sm:$0xff] %vm329_vm2, %v452_v34 }
  0xd3   : > { %725 = vst.msk [vmem:[#allocation2 + $0xa0] sm:$0x1] %vm714_vm6, %v7311_v3 }
  0xd4   : > { %746 = vst.msk [vmem:[#allocation2 + $0xaf] sm:$0x1] %vm735_vm3, %v7311_v3  ;;  %v454_v45 = vpop.permute.xlu0 %453 }
  0xd5   : > { %v580_v48 = vpop.permute.xlu1 %579  ;;  %v5731_v49 = vld [vmem:[#allocation2 + $0x90] sm:$0xff]  ;;  %v5733_v50 = vld [vmem:[#allocation2 + $0x98] sm:$0xff]  ;;  %531 = vst.msk [vmem:[#allocation2 + $0xb0] sm:$0xff] %vm329_vm2, %v454_v45 }
  0xd6   : > { %658 = vst.msk [vmem:[#allocation2 + $0xa7] sm:$0xff] %vm348_vm5, %v580_v48  ;;  %4442 = vmatprep.mubr.msk.f32.mxu0 %vm854_vm7, %v5731_v49 }
  0xd7   : > { %4443 = vmatmul.mubr.msk.f32.gmra.mxu0 %vm854_vm7, %v5733_v50 }
  0xd8   : > { %v582_v51 = vpop.permute.xlu0 %581 }
  0xd9   : > { %v456_v54 = vpop.permute.xlu1 %455  ;;  %659 = vst.msk [vmem:[#allocation2 + $0xaf] sm:$0xfe] %vm346_vm4, %v582_v51 }
  0xda   : > { %532 = vst.msk [vmem:[#allocation2 + $0xb8] sm:$0xff] %vm329_vm2, %v456_v54 }
  0xdb   : > { %726 = vst.msk [vmem:[#allocation2 + $0xb0] sm:$0x1] %vm714_vm6, %v7311_v3 }
  0xdc   : > { %747 = vst.msk [vmem:[#allocation2 + $0xbf] sm:$0x1] %vm735_vm3, %v7311_v3  ;;  %v458_v57 = vpop.permute.xlu0 %457 }
  0xdd   : > { %v584_v58 = vpop.permute.xlu1 %583  ;;  %v5747_v59 = vld [vmem:[#allocation2 + $0xa0] sm:$0xff]  ;;  %v5749_v62 = vld [vmem:[#allocation2 + $0xa8] sm:$0xff]  ;;  %533 = vst.msk [vmem:[#allocation2 + $0xc0] sm:$0xff] %vm329_vm2, %v458_v57 }
  0xde   : > { %660 = vst.msk [vmem:[#allocation2 + $0xb7] sm:$0xff] %vm348_vm5, %v584_v58  ;;  %4445 = vmatprep.mubr.msk.f32.mxu0 %vm854_vm7, %v5747_v59 }
  0xdf   : > { %4446 = vmatmul.mubr.msk.f32.gmra.mxu0 %vm854_vm7, %v5749_v62 }
  0xe0   : > { %v586_v63 = vpop.permute.xlu0 %585 }
  0xe1   : > { %v460_v2 = vpop.permute.xlu1 %459  ;;  %661 = vst.msk [vmem:[#allocation2 + $0xbf] sm:$0xfe] %vm346_vm4, %v586_v63 }
  0xe2   : > { %534 = vst.msk [vmem:[#allocation2 + $0xc8] sm:$0xff] %vm329_vm2, %v460_v2 }
  0xe3   : > { %727 = vst.msk [vmem:[#allocation2 + $0xc0] sm:$0x1] %vm714_vm6, %v7311_v3 }
  0xe4   : > { %748 = vst.msk [vmem:[#allocation2 + $0xcf] sm:$0x1] %vm735_vm3, %v7311_v3  ;;  %v462_v6 = vpop.permute.xlu0 %461 }
  0xe5   : > { %v588_v27 = vpop.permute.xlu1 %587  ;;  %v5763_v34 = vld [vmem:[#allocation2 + $0xb0] sm:$0xff]  ;;  %v5765_v45 = vld [vmem:[#allocation2 + $0xb8] sm:$0xff]  ;;  %535 = vst.msk [vmem:[#allocation2 + $0xd0] sm:$0xff] %vm329_vm2, %v462_v6 }
  0xe6   : > { %662 = vst.msk [vmem:[#allocation2 + $0xc7] sm:$0xff] %vm348_vm5, %v588_v27  ;;  %4448 = vmatprep.mubr.msk.f32.mxu0 %vm854_vm7, %v5763_v34 }
  0xe7   : > { %4449 = vmatmul.mubr.msk.f32.gmra.mxu0 %vm854_vm7, %v5765_v45 }
  0xe8   : > { %v590_v48 = vpop.permute.xlu0 %589 }
  0xe9   : > { %v464_v51 = vpop.permute.xlu1 %463  ;;  %663 = vst.msk [vmem:[#allocation2 + $0xcf] sm:$0xfe] %vm346_vm4, %v590_v48 }
  0xea   : > { %536 = vst.msk [vmem:[#allocation2 + $0xd8] sm:$0xff] %vm329_vm2, %v464_v51 }
  0xeb   : > { %728 = vst.msk [vmem:[#allocation2 + $0xd0] sm:$0x1] %vm714_vm6, %v7311_v3 }
  0xec   : > { %749 = vst.msk [vmem:[#allocation2 + $0xdf] sm:$0x1] %vm735_vm3, %v7311_v3  ;;  %v466_v54 = vpop.permute.xlu0 %465 }
  0xed   : > { %v592_v57 = vpop.permute.xlu1 %591  ;;  %v5779_v58 = vld [vmem:[#allocation2 + $0xc0] sm:$0xff]  ;;  %v5781_v63 = vld [vmem:[#allocation2 + $0xc8] sm:$0xff]  ;;  %537 = vst.msk [vmem:[#allocation2 + $0xe0] sm:$0xff] %vm329_vm2, %v466_v54 }
  0xee   : > { %664 = vst.msk [vmem:[#allocation2 + $0xd7] sm:$0xff] %vm348_vm5, %v592_v57  ;;  %4451 = vmatprep.mubr.msk.f32.mxu0 %vm854_vm7, %v5779_v58 }
  0xef   : > { %4452 = vmatmul.mubr.msk.f32.gmra.mxu0 %vm854_vm7, %v5781_v63 }
  0xf0   : > { %v594_v2 = vpop.permute.xlu0 %593 }
  0xf1   : > { %v468_v6 = vpop.permute.xlu1 %467  ;;  %665 = vst.msk [vmem:[#allocation2 + $0xdf] sm:$0xfe] %vm346_vm4, %v594_v2 }
  0xf2   : > { %538 = vst.msk [vmem:[#allocation2 + $0xe8] sm:$0xff] %vm329_vm2, %v468_v6 }
  0xf3   : > { %729 = vst.msk [vmem:[#allocation2 + $0xe0] sm:$0x1] %vm714_vm6, %v7311_v3 }
  0xf4   : > { %750 = vst.msk [vmem:[#allocation2 + $0xef] sm:$0x1] %vm735_vm3, %v7311_v3  ;;  %v470_v27 = vpop.permute.xlu0 %469 }
  0xf5   : > { %v596_v48 = vpop.permute.xlu1 %595  ;;  %v5795_v51 = vld [vmem:[#allocation2 + $0xd0] sm:$0xff]  ;;  %v5797_v54 = vld [vmem:[#allocation2 + $0xd8] sm:$0xff]  ;;  %539 = vst.msk [vmem:[#allocation2 + $0xf0] sm:$0xff] %vm329_vm2, %v470_v27 }
  0xf6   : > { %666 = vst.msk [vmem:[#allocation2 + $0xe7] sm:$0xff] %vm348_vm5, %v596_v48  ;;  %4454 = vmatprep.mubr.msk.f32.mxu0 %vm854_vm7, %v5795_v51 }
  0xf7   : > { %4455 = vmatmul.mubr.msk.f32.gmra.mxu0 %vm854_vm7, %v5797_v54 }
  0xf8   : > { %v598_v57 = vpop.permute.xlu0 %597 }
  0xf9   : > { %v472_v2 = vpop.permute.xlu1 %471  ;;  %667 = vst.msk [vmem:[#allocation2 + $0xef] sm:$0xfe] %vm346_vm4, %v598_v57 }
  0xfa   : > { %540 = vst.msk [vmem:[#allocation2 + $0xf8] sm:$0xff] %vm329_vm2, %v472_v2 }
  0xfb   : > { %730 = vst.msk [vmem:[#allocation2 + $0xf0] sm:$0x1] %vm714_vm6, %v7311_v3 }
  0xfc   : > { %751 = vst.msk [vmem:[#allocation2 + $0xff] sm:$0x1] %vm735_vm3, %v7311_v3  ;;  %v474_v6 = vpop.permute.xlu0 %473 }
  0xfd   : > { %v600_v27 = vpop.permute.xlu1 %599  ;;  %v5811_v48 = vld [vmem:[#allocation2 + $0xe0] sm:$0xff]  ;;  %v5813_v41 = vld [vmem:[#allocation2 + $0xe8] sm:$0xff]  ;;  %541 = vst.msk [vmem:[#allocation2 + $0x100] sm:$0xff] %vm329_vm2, %v474_v6 }
  0xfe   : > { %668 = vst.msk [vmem:[#allocation2 + $0xf7] sm:$0xff] %vm348_vm5, %v600_v27  ;;  %4457 = vmatprep.mubr.msk.f32.mxu0 %vm854_vm7, %v5811_v48 }
  0xff   : > { %4458 = vmatmul.mubr.msk.f32.gmra.mxu0 %vm854_vm7, %v5813_v41 }
 0x100   : > { %v602_v57 = vpop.permute.xlu0 %601 }
 0x101   : > { %v476_v2 = vpop.permute.xlu1 %475  ;;  %669 = vst.msk [vmem:[#allocation2 + $0xff] sm:$0xfe] %vm346_vm4, %v602_v57 }
 0x102   : > { %542 = vst.msk [vmem:[#allocation2 + $0x108] sm:$0xff] %vm329_vm2, %v476_v2 }
 0x103   : > { %731 = vst.msk [vmem:[#allocation2 + $0x100] sm:$0x1] %vm714_vm6, %v7311_v3 }
 0x104   : > { %752 = vst.msk [vmem:[#allocation2 + $0x10f] sm:$0x1] %vm735_vm3, %v7311_v3  ;;  %v478_v6 = vpop.permute.xlu0 %477 }
 0x105   : > { %v604_v27 = vpop.permute.xlu1 %603  ;;  %v5827_v42 = vld [vmem:[#allocation2 + $0xf0] sm:$0xff]  ;;  %v5829_v39 = vld [vmem:[#allocation2 + $0xf8] sm:$0xff]  ;;  %543 = vst.msk [vmem:[#allocation2 + $0x110] sm:$0xff] %vm329_vm2, %v478_v6 }
 0x106   : > { %670 = vst.msk [vmem:[#allocation2 + $0x107] sm:$0xff] %vm348_vm5, %v604_v27  ;;  %4460 = vmatprep.mubr.msk.f32.mxu0 %vm854_vm7, %v5827_v42 }
 0x107   : > { %4461 = vmatmul.mubr.msk.f32.gmra.mxu0 %vm854_vm7, %v5829_v39 }
 0x108   : > { %v606_v57 = vpop.permute.xlu0 %605 }
 0x109   : > { %v480_v2 = vpop.permute.xlu1 %479  ;;  %671 = vst.msk [vmem:[#allocation2 + $0x10f] sm:$0xfe] %vm346_vm4, %v606_v57 }
 0x10a   : > { %544 = vst.msk [vmem:[#allocation2 + $0x118] sm:$0xff] %vm329_vm2, %v480_v2 }
 0x10b   : > { %732 = vst.msk [vmem:[#allocation2 + $0x110] sm:$0x1] %vm714_vm6, %v7311_v3 }
 0x10c   : > { %753 = vst.msk [vmem:[#allocation2 + $0x11f] sm:$0x1] %vm735_vm3, %v7311_v3  ;;  %v4940_v6 = vpop.permute.xlu0 %4939 }
 0x10d   : > { %v608_v27 = vpop.permute.xlu1 %607  ;;  %v5843_v40 = vld [vmem:[#allocation2 + $0x100] sm:$0xff]  ;;  %v5845_v37 = vld [vmem:[#allocation2 + $0x108] sm:$0xff]  ;;  %v4942_v38 = vunpack.i.h.bf16 %v4940_v6  ;;  %v4941_v35 = vunpack.i.l.bf16 %v4940_v6 }
 0x10e   : > { %672 = vst.msk [vmem:[#allocation2 + $0x117] sm:$0xff] %vm348_vm5, %v608_v27  ;;  %4463 = vmatprep.mubr.msk.f32.mxu0 %vm854_vm7, %v5843_v40 }
 0x10f   : > { %4464 = vmatmul.mubr.msk.f32.gmra.mxu0 %vm854_vm7, %v5845_v37  ;;  %695 = vst.msk [vmem:[#allocation2 + $0x128] sm:$0xff] %vm329_vm2, %v4942_v38  ;;  %694 = vst.msk [vmem:[#allocation2 + $0x120] sm:$0xff] %vm329_vm2, %v4941_v35 }
 0x110   : > { %754 = vst.msk [vmem:[#allocation2 + $0x12f] sm:$0x1] %vm735_vm3, %v7311_v3  ;;  %v4950_v57 = vpop.permute.xlu0 %4949 }
 0x111   : > { %v4945_v2 = vpop.permute.xlu1 %4944  ;;  %v4952_v36 = vunpack.i.h.bf16 %v4950_v57  ;;  %v4951_v32 = vunpack.i.l.bf16 %v4950_v57 }
 0x112   : > { %v4947_v6 = vunpack.i.h.bf16 %v4945_v2  ;;  %v4946_v33 = vunpack.i.l.bf16 %v4945_v2 }
 0x113   : > { %331 = vst.msk [vmem:[#allocation2 + $0x8] sm:$0xff] %vm329_vm2, %v4952_v36  ;;  %330 = vst.msk [vmem:[#allocation2] sm:$0xff] %vm329_vm2, %v4951_v32 }
 0x114   : > { %711 = vst.msk [vmem:[#allocation2 + $0x127] sm:$0xff] %vm348_vm5, %v4947_v6  ;;  %v4960_v35 = vpop.permute.xlu0 %4959 }
 0x115   : > { %710 = vst.msk [vmem:[#allocation2 + $0x11f] sm:$0xfe] %vm346_vm4, %v4946_v33  ;;  %v4955_v38 = vpop.permute.xlu1 %4954  ;;  %v5864_v27 = vld [vmem:[#allocation2 + $0x110] sm:$0xff]  ;;  %v5866_v57 = vld [vmem:[#allocation2 + $0x118] sm:$0xff]  ;;  %v4962_v2 = vunpack.i.h.bf16 %v4960_v35  ;;  %v4961_v36 = vunpack.i.l.bf16 %v4960_v35 }
 0x116   : > { %736 = vst.msk [vmem:[#allocation2 + $0xf] sm:$0x1] %vm735_vm3, %v7311_v3  ;;  %v4957_v30 = vunpack.i.h.bf16 %v4955_v38  ;;  %v4956_v32 = vunpack.i.l.bf16 %v4955_v38  ;;  %4466 = vmatprep.mubr.msk.f32.mxu0 %vm854_vm7, %v5864_v27 }
 0x117   : > { %733 = vst.msk [vmem:[#allocation2 + $0x120] sm:$0x1] %vm714_vm6, %v7311_v3  ;;  %4467 = vmatmul.mubr.msk.f32.gmra.mxu0 %vm854_vm7, %v5866_v57 }
 0x118   : > { %697 = vst.msk [vmem:[#allocation2 + $0x138] sm:$0xff] %vm329_vm2, %v4962_v2  ;;  %696 = vst.msk [vmem:[#allocation2 + $0x130] sm:$0xff] %vm329_vm2, %v4961_v36 }
 0x119   : > { %349 = vst.msk [vmem:[#allocation2 + $0x7] sm:$0xff] %vm348_vm5, %v4957_v30  ;;  %v4965_v33 = vpop.permute.xlu1 %4964 }
 0x11a   : > { %347 = vst.msk [vmem:[#allocation2 - $0x1] sm:$0xfe] %vm346_vm4, %v4956_v32  ;;  %v4967_v6 = vunpack.i.h.bf16 %v4965_v33  ;;  %v4966_v35 = vunpack.i.l.bf16 %v4965_v33  ;;  %v4001_v33 = vld [vmem:[%s7296_s2 + $0xb8] sm:$0xff] }
 0x11b   : > { %755 = vst.msk [vmem:[#allocation2 + $0x13f] sm:$0x1] %vm735_vm3, %v7311_v3  ;;  %v5886_v30 = vld [vmem:[#allocation2 + $0x128] sm:$0xff]  ;;  %4628 = vmatprep.subr.mxu1 %v4001_v33 }
 0x11c   : > { %715 = vst.msk [vmem:[#allocation2] sm:$0x1] %vm714_vm6, %v7311_v3 }
 0x11d   : > { %713 = vst.msk [vmem:[#allocation2 + $0x137] sm:$0xff] %vm348_vm5, %v4967_v6  ;;  %v4000_v6 = vld [vmem:[%s7296_s2 + $0xb0] sm:$0xff] }
 0x11e   : > { %v5880_v38 = vld [vmem:[#allocation2 + $0x120] sm:$0xff]  ;;  %712 = vst.msk [vmem:[#allocation2 + $0x12f] sm:$0xfe] %vm346_vm4, %v4966_v35 }
 0x11f   : > { %4469 = vmatprep.mubr.msk.f32.mxu0 %vm854_vm7, %v5880_v38  ;;  %734 = vst.msk [vmem:[#allocation2 + $0x130] sm:$0x1] %vm714_vm6, %v7311_v3  ;;  %v4076_v3 = vld [vmem:[%s7296_s2 + $0x110] sm:$0xff] }
 0x120   : > { %4470 = vmatmul.mubr.msk.f32.gmra.mxu0 %vm854_vm7, %v5886_v30  ;;  %v757_v36 = vld [vmem:[#allocation2 + $0x8] sm:$0xff] }
 0x121   : > { %4574 = vmatprep.mubr.msk.f32.mxu0 %vm854_vm7, %v5573_v43 }
 0x123   : > { %v756_v2 = vld [vmem:[#allocation2] sm:$0xff] }
 0x124   : > { %4496 = vmatprep.mubr.msk.f32.mxu1 %vm854_vm7, %v756_v2  ;;  %4575 = vmatmul.mubr.msk.f32.vlgmr.msra.gmra.mxu0 %vm854_vm7, %v5575_v44  ;;  %v3998_v2 = vld [vmem:[%s7296_s2 + $0xa0] sm:$0xff] }
 0x125   : > { %4497 = vmatmul.mubr.msk.f32.vlgmr.msra.gmra.mxu1 %vm854_vm7, %v757_v36  ;;  %4577 = vmatprep.mubr.msk.f32.mxu0 %vm854_vm7, %v5615_v55 }
 0x126   : > { %4499 = vmatprep.mubr.msk.f32.mxu1 %vm854_vm7, %v5544_v1  ;;  %4629 = vmatpush3.msra.mxu1 %v4001_v33 }
 0x127   : > { %4630 = vmatprep.subr.mxu1 %v4000_v6 }
 0x128   : > { %4578 = vmatmul.mubr.msk.f32.gmra.mxu0 %vm854_vm7, %v5617_v56  ;;  %4631 = vmatpush3.msra.mxu1 %v4000_v6 }
 0x129   : > { %4500 = vmatmul.mubr.msk.f32.gmra.mxu1 %vm854_vm7, %v5538_v0  ;;  %4580 = vmatprep.mubr.msk.f32.mxu0 %vm854_vm7, %v5645_v4 }
 0x12a   : > { %4502 = vmatprep.mubr.msk.f32.mxu1 %vm854_vm7, %v5573_v43 }
 0x12c   : > { %4581 = vmatmul.mubr.msk.f32.gmra.mxu0 %vm854_vm7, %v5647_v5 }
 0x12d   : > { %4503 = vmatmul.mubr.msk.f32.gmra.mxu1 %vm854_vm7, %v5575_v44  ;;  %4583 = vmatprep.mubr.msk.f32.mxu0 %vm854_vm7, %v5667_v46 }
 0x12e   : > { %4505 = vmatprep.mubr.msk.f32.mxu1 %vm854_vm7, %v5615_v55 }
 0x130   : > { %4584 = vmatmul.mubr.msk.f32.gmra.mxu0 %vm854_vm7, %v5669_v47 }
 0x131   : > { %4506 = vmatmul.mubr.msk.f32.gmra.mxu1 %vm854_vm7, %v5617_v56  ;;  %4586 = vmatprep.mubr.msk.f32.mxu0 %vm854_vm7, %v5683_v52 }
 0x132   : > { %4508 = vmatprep.mubr.msk.f32.mxu1 %vm854_vm7, %v5645_v4 }
 0x134   : > { %4587 = vmatmul.mubr.msk.f32.gmra.mxu0 %vm854_vm7, %v5685_v53 }
 0x135   : > { %4509 = vmatmul.mubr.msk.f32.gmra.mxu1 %vm854_vm7, %v5647_v5  ;;  %4589 = vmatprep.mubr.msk.f32.mxu0 %vm854_vm7, %v5699_v60 }
 0x136   : > { %4511 = vmatprep.mubr.msk.f32.mxu1 %vm854_vm7, %v5667_v46 }
 0x138   : > { %4590 = vmatmul.mubr.msk.f32.gmra.mxu0 %vm854_vm7, %v5701_v61 }
 0x139   : > { %4512 = vmatmul.mubr.msk.f32.gmra.mxu1 %vm854_vm7, %v5669_v47  ;;  %4592 = vmatprep.mubr.msk.f32.mxu0 %vm854_vm7, %v5715_v13 }
 0x13a   : > { %4514 = vmatprep.mubr.msk.f32.mxu1 %vm854_vm7, %v5683_v52 }
 0x13c   : > { %4593 = vmatmul.mubr.msk.f32.gmra.mxu0 %vm854_vm7, %v5717_v20 }
 0x13d   : > { %4515 = vmatmul.mubr.msk.f32.gmra.mxu1 %vm854_vm7, %v5685_v53  ;;  %4595 = vmatprep.mubr.msk.f32.mxu0 %vm854_vm7, %v5731_v49 }
 0x13e   : > { %4517 = vmatprep.mubr.msk.f32.mxu1 %vm854_vm7, %v5699_v60 }
 0x140   : > { %4596 = vmatmul.mubr.msk.f32.gmra.mxu0 %vm854_vm7, %v5733_v50 }
 0x141   : > { %4518 = vmatmul.mubr.msk.f32.gmra.mxu1 %vm854_vm7, %v5701_v61  ;;  %4598 = vmatprep.mubr.msk.f32.mxu0 %vm854_vm7, %v5747_v59 }
 0x142   : > { %4520 = vmatprep.mubr.msk.f32.mxu1 %vm854_vm7, %v5715_v13 }
 0x144   : > { %4599 = vmatmul.mubr.msk.f32.gmra.mxu0 %vm854_vm7, %v5749_v62 }
 0x145   : > { %4521 = vmatmul.mubr.msk.f32.gmra.mxu1 %vm854_vm7, %v5717_v20  ;;  %4601 = vmatprep.mubr.msk.f32.mxu0 %vm854_vm7, %v5763_v34 }
 0x146   : > { %4523 = vmatprep.mubr.msk.f32.mxu1 %vm854_vm7, %v5731_v49 }
 0x148   : > { %4602 = vmatmul.mubr.msk.f32.gmra.mxu0 %vm854_vm7, %v5765_v45 }
 0x149   : > { %4524 = vmatmul.mubr.msk.f32.gmra.mxu1 %vm854_vm7, %v5733_v50  ;;  %4604 = vmatprep.mubr.msk.f32.mxu0 %vm854_vm7, %v5779_v58 }
 0x14a   : > { %4526 = vmatprep.mubr.msk.f32.mxu1 %vm854_vm7, %v5747_v59 }
 0x14c   : > { %4605 = vmatmul.mubr.msk.f32.gmra.mxu0 %vm854_vm7, %v5781_v63 }
 0x14d   : > { %4527 = vmatmul.mubr.msk.f32.gmra.mxu1 %vm854_vm7, %v5749_v62  ;;  %4607 = vmatprep.mubr.msk.f32.mxu0 %vm854_vm7, %v5795_v51 }
 0x14e   : > { %4529 = vmatprep.mubr.msk.f32.mxu1 %vm854_vm7, %v5763_v34 }
 0x150   : > { %4608 = vmatmul.mubr.msk.f32.gmra.mxu0 %vm854_vm7, %v5797_v54 }
 0x151   : > { %4530 = vmatmul.mubr.msk.f32.gmra.mxu1 %vm854_vm7, %v5765_v45  ;;  %4610 = vmatprep.mubr.msk.f32.mxu0 %vm854_vm7, %v5811_v48 }
 0x152   : > { %4532 = vmatprep.mubr.msk.f32.mxu1 %vm854_vm7, %v5779_v58 }
 0x154   : > { %4611 = vmatmul.mubr.msk.f32.gmra.mxu0 %vm854_vm7, %v5813_v41 }
 0x155   : > { %4533 = vmatmul.mubr.msk.f32.gmra.mxu1 %vm854_vm7, %v5781_v63  ;;  %4613 = vmatprep.mubr.msk.f32.mxu0 %vm854_vm7, %v5827_v42 }
 0x156   : > { %4535 = vmatprep.mubr.msk.f32.mxu1 %vm854_vm7, %v5795_v51 }
 0x158   : > { %4614 = vmatmul.mubr.msk.f32.gmra.mxu0 %vm854_vm7, %v5829_v39 }
 0x159   : > { %4536 = vmatmul.mubr.msk.f32.gmra.mxu1 %vm854_vm7, %v5797_v54  ;;  %4616 = vmatprep.mubr.msk.f32.mxu0 %vm854_vm7, %v5843_v40 }
 0x15a   : > { %4538 = vmatprep.mubr.msk.f32.mxu1 %vm854_vm7, %v5811_v48 }
 0x15c   : > { %4617 = vmatmul.mubr.msk.f32.gmra.mxu0 %vm854_vm7, %v5845_v37 }
 0x15d   : > { %4539 = vmatmul.mubr.msk.f32.gmra.mxu1 %vm854_vm7, %v5813_v41  ;;  %4619 = vmatprep.mubr.msk.f32.mxu0 %vm854_vm7, %v5864_v27  ;;  %v1595_v41 = vld [vmem:[#allocation2 + $0x130] sm:$0xff] }
 0x15e   : > { %4541 = vmatprep.mubr.msk.f32.mxu1 %vm854_vm7, %v5827_v42 }
 0x160   : > { %4620 = vmatmul.mubr.msk.f32.gmra.mxu0 %vm854_vm7, %v5866_v57 }
 0x161   : > { %4542 = vmatmul.mubr.msk.f32.gmra.mxu1 %vm854_vm7, %v5829_v39  ;;  %4622 = vmatprep.mubr.msk.f32.mxu0 %vm854_vm7, %v5880_v38  ;;  %v1596_v39 = vld [vmem:[#allocation2 + $0x138] sm:$0xff]  ;;  %v3999_v38 = vld [vmem:[%s7296_s2 + $0xa8] sm:$0xff] }
 0x162   : > { %4544 = vmatprep.mubr.msk.f32.mxu1 %vm854_vm7, %v5843_v40  ;;  %v4420_v40 = vpop.f32.mrf.mxu0  ;;  %4632 = vmatprep.subr.mxu1 %v3999_v38 }
 0x163   : > { %4633 = vmatpush3.msra.mxu1 %v3999_v38 }
 0x164   : > { %4623 = vmatmul.mubr.msk.f32.gmra.mxu0 %vm854_vm7, %v5886_v30  ;;  %v6032_v42 = vpop.f32.mrf.mxu0  ;;  %4634 = vmatprep.subr.mxu1 %v3998_v2 }
 0x165   : > { %4545 = vmatmul.mubr.msk.f32.gmra.mxu1 %vm854_vm7, %v5845_v37  ;;  %4625 = vmatprep.mubr.msk.f32.mxu0 %vm854_vm7, %v1595_v41  ;;  %v3997_v41 = vld [vmem:[%s7296_s2 + $0x98] sm:$0xff] }
 0x166   : > { %4547 = vmatprep.mubr.msk.f32.mxu1 %vm854_vm7, %v5864_v27  ;;  %v6034_v0 = vpop.f32.mrf.mxu0  ;;  %4635 = vmatpush3.msra.mxu1 %v3998_v2  ;;  %v3996_v2 = vld [vmem:[%s7296_s2 + $0x90] sm:$0xff] }
 0x167   : > { %4636 = vmatprep.subr.mxu1 %v3997_v41 }
 0x168   : > { %4626 = vmatmul.mubr.msk.f32.gmra.mxu0 %vm854_vm7, %v1596_v39  ;;  %v6036_v37 = vpop.f32.mrf.mxu0  ;;  %v6120_v39 = vld [vmem:[%s7296_s2 + $0x118] sm:$0xff]  ;;  %4637 = vmatpush3.msra.mxu1 %v3997_v41 }
 0x169   : > { %4548 = vmatmul.mubr.msk.f32.gmra.mxu1 %vm854_vm7, %v5866_v57  ;;  %4772 = vmatprep.subr.mxu0 %v6120_v39 }
 0x16a   : > { %v6038_v1 = vpop.f32.mrf.mxu0  ;;  %4773 = vmatpush3.msra.mxu0 %v6120_v39  ;;  %4638 = vmatprep.subr.mxu1 %v3996_v2 }
 0x16b   : > { %4774 = vmatprep.subr.mxu0 %v4076_v3  ;;  %4639 = vmatpush3.msra.mxu1 %v3996_v2 }
 0x16c   : > { %v6040_v43 = vpop.f32.mrf.mxu0  ;;  %4775 = vmatpush3.msra.mxu0 %v4076_v3  ;;  %v3994_v3 = vld [vmem:[%s7296_s2 + $0x80] sm:$0xff] }
 0x16d   : > { %4776 = vmatprep.subr.mxu0 %v4075_v25 }
 0x16e   : > { %4777 = vmatpush3.msra.mxu0 %v4075_v25  ;;  %v3993_v25 = vld [vmem:[%s7296_s2 + $0x78] sm:$0xff] }
 0x16f   : > { %v6042_v44 = vpop.f32.mrf.mxu0 }
 0x171   : > { %v6044_v55 = vpop.f32.mrf.mxu0 }
 0x177   : > { %v6046_v56 = vpop.f32.mrf.mxu0 }
 0x179   : > { %v6048_v4 = vpop.f32.mrf.mxu0 }
 0x17f   : > { %v6050_v5 = vpop.f32.mrf.mxu0 }
 0x181   : > { %v6052_v46 = vpop.f32.mrf.mxu0 }
 0x187   : > { %v6054_v47 = vpop.f32.mrf.mxu0 }
 0x189   : > { %v6056_v52 = vpop.f32.mrf.mxu0 }
 0x18f   : > { %v6058_v53 = vpop.f32.mrf.mxu0 }
 0x191   : > { %v6060_v60 = vpop.f32.mrf.mxu0 }
 0x197   : > { %v6062_v61 = vpop.f32.mrf.mxu0 }
 0x199   : > { %v6064_v13 = vpop.f32.mrf.mxu0 }
 0x19f   : > { %v6066_v20 = vpop.f32.mrf.mxu0 }
 0x1a1   : > { %v6068_v49 = vpop.f32.mrf.mxu0 }
 0x1a7   : > { %v6070_v50 = vpop.f32.mrf.mxu0 }
 0x1a9   : > { %v6072_v59 = vpop.f32.mrf.mxu0 }
 0x1af   : > { %v6074_v62 = vpop.f32.mrf.mxu0 }
 0x1b1   : > { %v6076_v34 = vpop.f32.mrf.mxu0 }
 0x1b7   : > { %v6078_v45 = vpop.f32.mrf.mxu0 }
 0x1b9   : > { %v6080_v58 = vpop.f32.mrf.mxu0 }
 0x1bf   : > { %v6082_v63 = vpop.f32.mrf.mxu0 }
 0x1c1   : > { %v6084_v51 = vpop.f32.mrf.mxu0 }
 0x1c7   : > { %v6086_v54 = vpop.f32.mrf.mxu0 }
 0x1c9   : > { %v6088_v48 = vpop.f32.mrf.mxu0 }
 0x1cf   : > { %v6090_v27 = vpop.f32.mrf.mxu0 }
 0x1d1   : > { %v6092_v57 = vpop.f32.mrf.mxu0 }
 0x1d7   : > { %v6094_v32 = vpop.f32.mrf.mxu0 }
 0x1d9   : > { %v6102_v35 = vpop.f32.mrf.mxu0 }
 0x1e0   : > { %v6107_v30 = vpop.f32.mrf.mxu0 }
 0x1e2   : > { %v6112_v36 = vpop.f32.mrf.mxu0 }
 0x1e4   : > { %v4576_v6 = vpop.f32.mrf.mxu0 }
 0x1e5   : > { %v4498_v33 = vpop.f32.mrf.mxu1 }
 0x1e6   : > { %v1388_v38 = vadd.f32 %v4498_v33, %v4420_v40  ;;  %v1784_v29 = vpop.f32.mrf.mxu0  ;;  %v3995_v33 = vld [vmem:[%s7296_s2 + $0x88] sm:$0xff] }
 0x1e7   : > { %v1382_v28 = vpop.f32.mrf.mxu1  ;;  %4640 = vmatprep.subr.mxu1 %v3995_v33 }
 0x1e8   : > { %v1964_v40 = vadd.f32 %v4576_v6, %v1388_v38  ;;  %v1383_v41 = vadd.f32 %v1382_v28, %v6032_v42  ;;  %v4579_v23 = vpop.f32.mrf.mxu0  ;;  %4641 = vmatpush3.msra.mxu1 %v3995_v33  ;;  %v4074_v28 = vld [vmem:[%s7296_s2 + $0x100] sm:$0xff] }
 0x1e9   : > { %v4501_v26 = vpop.f32.mrf.mxu1  ;;  %4642 = vmatprep.subr.mxu1 %v3994_v3  ;;  %4778 = vmatprep.subr.mxu0 %v4074_v28 }
 0x1ea   : > { %v2007_v24 = vadd.f32 %v6133_v31, %v1964_v40  ;;  %v1963_v21 = vadd.f32 %v1784_v29, %v1383_v41  ;;  %v1398_v6 = vadd.f32 %v4501_v26, %v6034_v0  ;;  %v1794_v38 = vpop.f32.mrf.mxu0  ;;  %4643 = vmatpush3.msra.mxu1 %v3994_v3  ;;  %4779 = vmatpush3.msra.mxu0 %v4074_v28  ;;  %v4073_v0 = vld [vmem:[%s7296_s2 + $0xf8] sm:$0xff]  ;;  %v4072_v3 = vld [vmem:[%s7296_s2 + $0xf0] sm:$0xff] }
 0x1eb   : > { %v1392_v42 = vpop.f32.mrf.mxu1  ;;  %4644 = vmatprep.subr.mxu1 %v3993_v25  ;;  %4780 = vmatprep.subr.mxu0 %v4073_v0 }
 0x1ec   : > { %v6150_v2 = vmax.f32 %v2007_v24, 0.0  ;;  %v2006_v29 = vadd.f32 %v6133_v31, %v1963_v21  ;;  %v1966_v40 = vadd.f32 %v4579_v23, %v1398_v6  ;;  %v1393_v26 = vadd.f32 %v1392_v42, %v6036_v37  ;;  %v4582_v33 = vpop.f32.mrf.mxu0  ;;  %4645 = vmatpush3.msra.mxu1 %v3993_v25  ;;  %v3992_v6 = vld [vmem:[%s7296_s2 + $0x70] sm:$0xff]  ;;  %4781 = vmatpush3.msra.mxu0 %v4073_v0  ;;  %v4071_v25 = vld [vmem:[%s7296_s2 + $0xe8] sm:$0xff] }
 0x1ed   : > { %v4504_v41 = vpop.f32.mrf.mxu1  ;;  %4646 = vmatprep.subr.mxu1 %v3992_v6  ;;  %4782 = vmatprep.subr.mxu0 %v4072_v3 }
 0x1ee   : > { %2079 = vst.msk [vmem:[#allocation3 + $0x9] sm:$0x7f] %vm309_vm0, %v6150_v2  ;;  %v6162_v21 = vmax.f32 %v2006_v29, 0.0  ;;  %v2009_v23 = vadd.f32 %v6133_v31, %v1966_v40  ;;  %v1965_v24 = vadd.f32 %v1794_v38, %v1393_v26  ;;  %v1408_v37 = vadd.f32 %v4504_v41, %v6038_v1  ;;  %2152 = vrot.lane.b32.xlu1 %v6150_v2, %s5059_s13  ;;  %v1804_v42 = vpop.f32.mrf.mxu0  ;;  %v3991_v26 = vld [vmem:[%s7296_s2 + $0x68] sm:$0xff] }
 0x1ef   : > { %v1402_v28 = vpop.f32.mrf.mxu1  ;;  %4647 = vmatpush3.msra.mxu1 %v3992_v6  ;;  %4783 = vmatpush3.msra.mxu0 %v4072_v3  ;;  %v4070_v6 = vld [vmem:[%s7296_s2 + $0xe0] sm:$0xff] }
 0x1f0   : > { %2078 = vst.msk [vmem:[#allocation3 + $0x1] sm:$0xff] %vm307_vm1, %v6162_v21  ;;  %v2045_v1 = vmax.f32 %v2009_v23, 0.0  ;;  %v2008_v38 = vadd.f32 %v6133_v31, %v1965_v24  ;;  %v1968_v29 = vadd.f32 %v4582_v33, %v1408_v37  ;;  %v1403_v40 = vadd.f32 %v1402_v28, %v6040_v43  ;;  %2150 = vrot.lane.b32.xlu0 %v6162_v21, %s5059_s13  ;;  %v4585_v41 = vpop.f32.mrf.mxu0  ;;  %v3990_v37 = vld [vmem:[%s7296_s2 + $0x60] sm:$0xff] }
 0x1f1   : > { %v4507_v0 = vpop.f32.mrf.mxu1  ;;  %4648 = vmatprep.subr.mxu1 %v3991_v26  ;;  %4784 = vmatprep.subr.mxu0 %v4071_v25 }
 0x1f2   : > { %2081 = vst.msk [vmem:[#allocation3 + $0x19] sm:$0x7f] %vm309_vm0, %v2045_v1  ;;  %v2044_v33 = vmax.f32 %v2008_v38, 0.0  ;;  %v2011_v43 = vadd.f32 %v6133_v31, %v1968_v29  ;;  %v1967_v23 = vadd.f32 %v1804_v42, %v1403_v40  ;;  %v1418_v24 = vadd.f32 %v4507_v0, %v6042_v44  ;;  %2156 = vrot.lane.b32.xlu1 %v2045_v1, %s5059_s13  ;;  %v1814_v28 = vpop.f32.mrf.mxu0 }
 0x1f3   : > { %v1412_v3 = vpop.f32.mrf.mxu1  ;;  %4649 = vmatpush3.msra.mxu1 %v3991_v26  ;;  %4785 = vmatpush3.msra.mxu0 %v4071_v25 }
 0x1f4   : > { %2080 = vst.msk [vmem:[#allocation3 + $0x11] sm:$0xff] %vm307_vm1, %v2044_v33  ;;  %v2047_v42 = vmax.f32 %v2011_v43, 0.0  ;;  %v2010_v44 = vadd.f32 %v6133_v31, %v1967_v23  ;;  %v1970_v38 = vadd.f32 %v4585_v41, %v1418_v24  ;;  %v1413_v29 = vadd.f32 %v1412_v3, %v6044_v55  ;;  %2154 = vrot.lane.b32.xlu0 %v2044_v33, %s5059_s13  ;;  %v4588_v0 = vpop.f32.mrf.mxu0  ;;  %v4068_v24 = vld [vmem:[%s7296_s2 + $0xd0] sm:$0xff] }
 0x1f5   : > { %v4510_v40 = vpop.f32.mrf.mxu1  ;;  %4650 = vmatprep.subr.mxu1 %v3990_v37  ;;  %4786 = vmatprep.subr.mxu0 %v4070_v6 }
 0x1f6   : > { %2083 = vst.msk [vmem:[#allocation3 + $0x29] sm:$0x7f] %vm309_vm0, %v2047_v42  ;;  %v2046_v26 = vmax.f32 %v2010_v44, 0.0  ;;  %v2013_v43 = vadd.f32 %v6133_v31, %v1970_v38  ;;  %v1969_v23 = vadd.f32 %v1814_v28, %v1413_v29  ;;  %v1428_v41 = vadd.f32 %v4510_v40, %v6046_v56  ;;  %2300 = vrot.lane.b32.xlu1 %v2045_v1, %s5060_s10  ;;  %v1824_v25 = vpop.f32.mrf.mxu0 }
 0x1f7   : > { %4651 = vmatpush3.msra.mxu1 %v3990_v37  ;;  %v1422_v55 = vpop.f32.mrf.mxu1  ;;  %4787 = vmatpush3.msra.mxu0 %v4070_v6  ;;  %v4067_v37 = vld [vmem:[%s7296_s2 + $0xc8] sm:$0xff] }
 0x1f8   : > { %2082 = vst.msk [vmem:[#allocation3 + $0x21] sm:$0xff] %vm307_vm1, %v2046_v26  ;;  %v6211_v3 = vmax.f32 %v2013_v43, 0.0  ;;  %v2012_v44 = vadd.f32 %v6133_v31, %v1969_v23  ;;  %v1972_v38 = vadd.f32 %v4588_v0, %v1428_v41  ;;  %v1423_v28 = vadd.f32 %v1422_v55, %v6048_v4  ;;  %2298 = vrot.lane.b32.xlu0 %v2044_v33, %s5060_s10  ;;  %v4591_v1 = vpop.f32.mrf.mxu0 }
 0x1f9   : > { %4788 = vmatprep.subr.mxu0 %v4069_v22  ;;  %v4513_v56 = vpop.f32.mrf.mxu1 }
 0x1fa   : > { %4789 = vmatpush3.msra.mxu0 %v4069_v22  ;;  %2085 = vst.msk [vmem:[#allocation3 + $0x39] sm:$0x7f] %vm309_vm0, %v6211_v3  ;;  %v6221_v6 = vmax.f32 %v2012_v44, 0.0  ;;  %v2015_v29 = vadd.f32 %v6133_v31, %v1972_v38  ;;  %v1971_v40 = vadd.f32 %v1824_v25, %v1423_v28  ;;  %v1438_v4 = vadd.f32 %v4513_v56, %v6050_v5  ;;  %v1834_v0 = vpop.f32.mrf.mxu0  ;;  %v4066_v22 = vld [vmem:[%s7296_s2 + $0xc0] sm:$0xff] }
 0x1fb   : > { %2160 = vrot.lane.b32.xlu1 %v2047_v42, %s5059_s13  ;;  %4790 = vmatprep.subr.mxu0 %v4068_v24  ;;  %v1432_v33 = vpop.f32.mrf.mxu1 }
 0x1fc   : > { %4791 = vmatpush3.msra.mxu0 %v4068_v24  ;;  %2084 = vst.msk [vmem:[#allocation3 + $0x31] sm:$0xff] %vm307_vm1, %v6221_v6  ;;  %v6231_v43 = vmax.f32 %v2015_v29, 0.0  ;;  %v2014_v23 = vadd.f32 %v6133_v31, %v1971_v40  ;;  %v1974_v41 = vadd.f32 %v4591_v1, %v1438_v4  ;;  %v1433_v5 = vadd.f32 %v1432_v33, %v6052_v46  ;;  %v4594_v25 = vpop.f32.mrf.mxu0 }
 0x1fd   : > { %2158 = vrot.lane.b32.xlu0 %v2046_v26, %s5059_s13  ;;  %4792 = vmatprep.subr.mxu0 %v4067_v37  ;;  %v4516_v55 = vpop.f32.mrf.mxu1 }
 0x1fe   : > { %4793 = vmatpush3.msra.mxu0 %v4067_v37  ;;  %2087 = vst.msk [vmem:[#allocation3 + $0x49] sm:$0x7f] %vm309_vm0, %v6231_v43  ;;  %v6238_v24 = vmax.f32 %v2014_v23, 0.0  ;;  %v2017_v44 = vadd.f32 %v6133_v31, %v1974_v41  ;;  %v1973_v38 = vadd.f32 %v1834_v0, %v1433_v5  ;;  %v1448_v28 = vadd.f32 %v4516_v55, %v6054_v47  ;;  %v1844_v56 = vpop.f32.mrf.mxu0 }
 0x1ff   : > { %2304 = vrot.lane.b32.xlu1 %v2047_v42, %s5060_s10  ;;  %4794 = vmatprep.subr.mxu0 %v4066_v22  ;;  %v1442_v46 = vpop.f32.mrf.mxu1 }
 0x200   : > { %4795 = vmatpush3.msra.mxu0 %v4066_v22  ;;  %2086 = vst.msk [vmem:[#allocation3 + $0x41] sm:$0xff] %vm307_vm1, %v6238_v24  ;;  %v6245_v1 = vmax.f32 %v2017_v44, 0.0  ;;  %v2016_v37 = vadd.f32 %v6133_v31, %v1973_v38  ;;  %v1976_v29 = vadd.f32 %v4594_v25, %v1448_v28  ;;  %v1443_v40 = vadd.f32 %v1442_v46, %v6056_v52  ;;  %v4597_v47 = vpop.f32.mrf.mxu0 }
 0x201   : > { %2302 = vrot.lane.b32.xlu0 %v2046_v26, %s5060_s10  ;;  %v4519_v4 = vpop.f32.mrf.mxu1 }
 0x202   : > { %2089 = vst.msk [vmem:[#allocation3 + $0x59] sm:$0x7f] %vm309_vm0, %v6245_v1  ;;  %v6252_v42 = vmax.f32 %v2016_v37, 0.0  ;;  %v2019_v33 = vadd.f32 %v6133_v31, %v1976_v29  ;;  %v1975_v0 = vadd.f32 %v1844_v56, %v1443_v40  ;;  %v1458_v22 = vadd.f32 %v4519_v4, %v6058_v53  ;;  %v1854_v41 = vpop.f32.mrf.mxu0 }
 0x203   : > { %2164 = vrot.lane.b32.xlu1 %v6211_v3, %s5059_s13  ;;  %v1452_v23 = vpop.f32.mrf.mxu1 }
 0x204   : > { %2088 = vst.msk [vmem:[#allocation3 + $0x51] sm:$0xff] %vm307_vm1, %v6252_v42  ;;  %v6260_v52 = vmax.f32 %v2019_v33, 0.0  ;;  %v2018_v26 = vadd.f32 %v6133_v31, %v1975_v0  ;;  %v1978_v5 = vadd.f32 %v4597_v47, %v1458_v22  ;;  %v1453_v55 = vadd.f32 %v1452_v23, %v6060_v60  ;;  %v4600_v53 = vpop.f32.mrf.mxu0 }
 0x205   : > { %2162 = vrot.lane.b32.xlu0 %v6221_v6, %s5059_s13  ;;  %v4522_v25 = vpop.f32.mrf.mxu1 }
 0x206   : > { %2091 = vst.msk [vmem:[#allocation3 + $0x69] sm:$0x7f] %vm309_vm0, %v6260_v52  ;;  %v6268_v44 = vmax.f32 %v2018_v26, 0.0  ;;  %v2021_v38 = vadd.f32 %v6133_v31, %v1978_v5  ;;  %v1977_v28 = vadd.f32 %v1854_v41, %v1453_v55  ;;  %v1468_v46 = vadd.f32 %v4522_v25, %v6062_v61  ;;  %v1864_v60 = vpop.f32.mrf.mxu0 }
 0x207   : > { %2308 = vrot.lane.b32.xlu1 %v6211_v3, %s5060_s10  ;;  %v1462_v56 = vpop.f32.mrf.mxu1 }
 0x208   : > { %2090 = vst.msk [vmem:[#allocation3 + $0x61] sm:$0xff] %vm307_vm1, %v6268_v44  ;;  %v6276_v37 = vmax.f32 %v2021_v38, 0.0  ;;  %v2020_v29 = vadd.f32 %v6133_v31, %v1977_v28  ;;  %v1980_v40 = vadd.f32 %v4600_v53, %v1468_v46  ;;  %v1463_v4 = vadd.f32 %v1462_v56, %v6064_v13  ;;  %v4603_v61 = vpop.f32.mrf.mxu0 }
 0x209   : > { %2306 = vrot.lane.b32.xlu0 %v6221_v6, %s5060_s10  ;;  %v4525_v47 = vpop.f32.mrf.mxu1 }
 0x20a   : > { %2093 = vst.msk [vmem:[#allocation3 + $0x79] sm:$0x7f] %vm309_vm0, %v6276_v37  ;;  %v6284_v3 = vmax.f32 %v2020_v29, 0.0  ;;  %v2023_v33 = vadd.f32 %v6133_v31, %v1980_v40  ;;  %v1979_v0 = vadd.f32 %v1864_v60, %v1463_v4  ;;  %v1478_v22 = vadd.f32 %v4525_v47, %v6066_v20  ;;  %v1874_v13 = vpop.f32.mrf.mxu0 }
 0x20b   : > { %2168 = vrot.lane.b32.xlu1 %v6231_v43, %s5059_s13  ;;  %v1472_v23 = vpop.f32.mrf.mxu1 }
 0x20c   : > { %2092 = vst.msk [vmem:[#allocation3 + $0x71] sm:$0xff] %vm307_vm1, %v6284_v3  ;;  %v6292_v6 = vmax.f32 %v2023_v33, 0.0  ;;  %v2022_v41 = vadd.f32 %v6133_v31, %v1979_v0  ;;  %v1982_v26 = vadd.f32 %v4603_v61, %v1478_v22  ;;  %v1473_v5 = vadd.f32 %v1472_v23, %v6068_v49  ;;  %v4606_v20 = vpop.f32.mrf.mxu0 }
 0x20d   : > { %2166 = vrot.lane.b32.xlu0 %v6238_v24, %s5059_s13  ;;  %v4528_v55 = vpop.f32.mrf.mxu1 }
 0x20e   : > { %2095 = vst.msk [vmem:[#allocation3 + $0x89] sm:$0x7f] %vm309_vm0, %v6292_v6  ;;  %v6300_v25 = vmax.f32 %v2022_v41, 0.0  ;;  %v2025_v53 = vadd.f32 %v6133_v31, %v1982_v26  ;;  %v1981_v38 = vadd.f32 %v1874_v13, %v1473_v5  ;;  %v1488_v28 = vadd.f32 %v4528_v55, %v6070_v50  ;;  %v1884_v49 = vpop.f32.mrf.mxu0 }
 0x20f   : > { %2312 = vrot.lane.b32.xlu1 %v6231_v43, %s5060_s10  ;;  %v1482_v46 = vpop.f32.mrf.mxu1 }
 0x210   : > { %2094 = vst.msk [vmem:[#allocation3 + $0x81] sm:$0xff] %vm307_vm1, %v6300_v25  ;;  %v6308_v56 = vmax.f32 %v2025_v53, 0.0  ;;  %v2024_v60 = vadd.f32 %v6133_v31, %v1981_v38  ;;  %v1984_v29 = vadd.f32 %v4606_v20, %v1488_v28  ;;  %v1483_v40 = vadd.f32 %v1482_v46, %v6072_v59  ;;  %v4609_v50 = vpop.f32.mrf.mxu0 }
 0x211   : > { %2310 = vrot.lane.b32.xlu0 %v6238_v24, %s5060_s10  ;;  %v4531_v4 = vpop.f32.mrf.mxu1 }
 0x212   : > { %2097 = vst.msk [vmem:[#allocation3 + $0x99] sm:$0x7f] %vm309_vm0, %v6308_v56  ;;  %v6316_v43 = vmax.f32 %v2024_v60, 0.0  ;;  %v2027_v47 = vadd.f32 %v6133_v31, %v1984_v29  ;;  %v1983_v61 = vadd.f32 %v1884_v49, %v1483_v40  ;;  %v1498_v33 = vadd.f32 %v4531_v4, %v6074_v62  ;;  %v1894_v59 = vpop.f32.mrf.mxu0 }
 0x213   : > { %2172 = vrot.lane.b32.xlu1 %v6245_v1, %s5059_s13  ;;  %v1492_v0 = vpop.f32.mrf.mxu1 }
 0x214   : > { %2096 = vst.msk [vmem:[#allocation3 + $0x91] sm:$0xff] %vm307_vm1, %v6316_v43  ;;  %v6324_v24 = vmax.f32 %v2027_v47, 0.0  ;;  %v2026_v22 = vadd.f32 %v6133_v31, %v1983_v61  ;;  %v1986_v23 = vadd.f32 %v4609_v50, %v1498_v33  ;;  %v1493_v13 = vadd.f32 %v1492_v0, %v6076_v34  ;;  %v4612_v62 = vpop.f32.mrf.mxu0 }
 0x215   : > { %2170 = vrot.lane.b32.xlu0 %v6252_v42, %s5059_s13  ;;  %v4534_v41 = vpop.f32.mrf.mxu1 }
 0x216   : > { %2099 = vst.msk [vmem:[#allocation3 + $0xa9] sm:$0x7f] %vm309_vm0, %v6324_v24  ;;  %v6332_v26 = vmax.f32 %v2026_v22, 0.0  ;;  %v2029_v5 = vadd.f32 %v6133_v31, %v1986_v23  ;;  %v1985_v55 = vadd.f32 %v1894_v59, %v1493_v13  ;;  %v1508_v20 = vadd.f32 %v4534_v41, %v6078_v45  ;;  %v1904_v34 = vpop.f32.mrf.mxu0 }
 0x217   : > { %2316 = vrot.lane.b32.xlu1 %v6245_v1, %s5060_s10  ;;  %v1502_v53 = vpop.f32.mrf.mxu1 }
 0x218   : > { %2098 = vst.msk [vmem:[#allocation3 + $0xa1] sm:$0xff] %vm307_vm1, %v6332_v26  ;;  %v6340_v38 = vmax.f32 %v2029_v5, 0.0  ;;  %v2028_v28 = vadd.f32 %v6133_v31, %v1985_v55  ;;  %v1988_v46 = vadd.f32 %v4612_v62, %v1508_v20  ;;  %v1503_v49 = vadd.f32 %v1502_v53, %v6080_v58  ;;  %v4615_v45 = vpop.f32.mrf.mxu0 }
 0x219   : > { %2314 = vrot.lane.b32.xlu0 %v6252_v42, %s5060_s10  ;;  %v4537_v60 = vpop.f32.mrf.mxu1 }
 0x21a   : > { %2101 = vst.msk [vmem:[#allocation3 + $0xb9] sm:$0x7f] %vm309_vm0, %v6340_v38  ;;  %v6348_v1 = vmax.f32 %v2028_v28, 0.0  ;;  %v2031_v29 = vadd.f32 %v6133_v31, %v1988_v46  ;;  %v1987_v40 = vadd.f32 %v1904_v34, %v1503_v49  ;;  %v1518_v4 = vadd.f32 %v4537_v60, %v6082_v63  ;;  %v1914_v58 = vpop.f32.mrf.mxu0 }
 0x21b   : > { %2176 = vrot.lane.b32.xlu1 %v6260_v52, %s5059_s13  ;;  %v1512_v50 = vpop.f32.mrf.mxu1 }
 0x21c   : > { %2100 = vst.msk [vmem:[#allocation3 + $0xb1] sm:$0xff] %vm307_vm1, %v6348_v1  ;;  %v6356_v42 = vmax.f32 %v2031_v29, 0.0  ;;  %v2030_v47 = vadd.f32 %v6133_v31, %v1987_v40  ;;  %v1990_v61 = vadd.f32 %v4615_v45, %v1518_v4  ;;  %v1513_v33 = vadd.f32 %v1512_v50, %v6084_v51  ;;  %v4618_v63 = vpop.f32.mrf.mxu0 }
 0x21d   : > { %2174 = vrot.lane.b32.xlu0 %v6268_v44, %s5059_s13  ;;  %v4540_v0 = vpop.f32.mrf.mxu1 }
 0x21e   : > { %2103 = vst.msk [vmem:[#allocation3 + $0xc9] sm:$0x7f] %vm309_vm0, %v6356_v42  ;;  %v6364_v59 = vmax.f32 %v2030_v47, 0.0  ;;  %v2033_v22 = vadd.f32 %v6133_v31, %v1990_v61  ;;  %v1989_v23 = vadd.f32 %v1914_v58, %v1513_v33  ;;  %v1528_v13 = vadd.f32 %v4540_v0, %v6086_v54  ;;  %v1924_v51 = vpop.f32.mrf.mxu0 }
 0x21f   : > { %2320 = vrot.lane.b32.xlu1 %v6260_v52, %s5060_s10  ;;  %v1522_v41 = vpop.f32.mrf.mxu1 }
 0x220   : > { %2102 = vst.msk [vmem:[#allocation3 + $0xc1] sm:$0xff] %vm307_vm1, %v6364_v59  ;;  %v6372_v62 = vmax.f32 %v2033_v22, 0.0  ;;  %v2032_v5 = vadd.f32 %v6133_v31, %v1989_v23  ;;  %v1992_v55 = vadd.f32 %v4618_v63, %v1528_v13  ;;  %v1523_v20 = vadd.f32 %v1522_v41, %v6088_v48  ;;  %v4621_v54 = vpop.f32.mrf.mxu0 }
 0x221   : > { %2318 = vrot.lane.b32.xlu0 %v6268_v44, %s5060_s10  ;;  %v4543_v53 = vpop.f32.mrf.mxu1 }
 0x222   : > { %2105 = vst.msk [vmem:[#allocation3 + $0xd9] sm:$0x7f] %vm309_vm0, %v6372_v62  ;;  %v6380_v52 = vmax.f32 %v2032_v5, 0.0  ;;  %v2035_v34 = vadd.f32 %v6133_v31, %v1992_v55  ;;  %v1991_v28 = vadd.f32 %v1924_v51, %v1523_v20  ;;  %v1538_v46 = vadd.f32 %v4543_v53, %v6090_v27  ;;  %v1934_v48 = vpop.f32.mrf.mxu0 }
 0x223   : > { %2180 = vrot.lane.b32.xlu1 %v6276_v37, %s5059_s13  ;;  %v1532_v49 = vpop.f32.mrf.mxu1 }
 0x224   : > { %2104 = vst.msk [vmem:[#allocation3 + $0xd1] sm:$0xff] %vm307_vm1, %v6380_v52  ;;  %v6388_v44 = vmax.f32 %v2035_v34, 0.0  ;;  %v2034_v60 = vadd.f32 %v6133_v31, %v1991_v28  ;;  %v1994_v45 = vadd.f32 %v4621_v54, %v1538_v46  ;;  %v1533_v29 = vadd.f32 %v1532_v49, %v6092_v57  ;;  %v4624_v27 = vpop.f32.mrf.mxu0  ;;  %v6443_v46 = vld [vmem:[%s7296_s2 + $0x58] sm:$0xff] }
 0x225   : > { %2178 = vrot.lane.b32.xlu0 %v6284_v3, %s5059_s13  ;;  %v4546_v40 = vpop.f32.mrf.mxu1  ;;  %4700 = vmatprep.subr.mxu1 %v6443_v46 }
 0x226   : > { %2107 = vst.msk [vmem:[#allocation3 + $0xe9] sm:$0x7f] %vm309_vm0, %v6388_v44  ;;  %v6396_v4 = vmax.f32 %v2034_v60, 0.0  ;;  %v2037_v50 = vadd.f32 %v6133_v31, %v1994_v45  ;;  %v1993_v58 = vadd.f32 %v1934_v48, %v1533_v29  ;;  %v1548_v47 = vadd.f32 %v4546_v40, %v6094_v32  ;;  %v1944_v57 = vpop.f32.mrf.mxu0  ;;  %v2523_v45 = vld [vmem:[%s7296_s2 + $0x40] sm:$0xff] }
 0x227   : > { %2324 = vrot.lane.b32.xlu1 %v6276_v37, %s5060_s10  ;;  %v1542_v61 = vpop.f32.mrf.mxu1 }
 0x228   : > { %2106 = vst.msk [vmem:[#allocation3 + $0xe1] sm:$0xff] %vm307_vm1, %v6396_v4  ;;  %v6404_v33 = vmax.f32 %v2037_v50, 0.0  ;;  %v2036_v0 = vadd.f32 %v6133_v31, %v1993_v58  ;;  %v1996_v63 = vadd.f32 %v4624_v27, %v1548_v47  ;;  %v1543_v22 = vadd.f32 %v1542_v61, %v6102_v35  ;;  %v4627_v32 = vpop.f32.mrf.mxu0  ;;  %v2522_v50 = vld [vmem:[%s7296_s2 + $0x38] sm:$0xff]  ;;  %v2521_v47 = vld [vmem:[%s7296_s2 + $0x30] sm:$0xff] }
 0x229   : > { %2322 = vrot.lane.b32.xlu0 %v6284_v3, %s5060_s10  ;;  %v4549_v23 = vpop.f32.mrf.mxu1 }
 0x22a   : > { %2109 = vst.msk [vmem:[#allocation3 + $0xf9] sm:$0x7f] %vm309_vm0, %v6404_v33  ;;  %v6412_v37 = vmax.f32 %v2036_v0, 0.0  ;;  %v2039_v13 = vadd.f32 %v6133_v31, %v1996_v63  ;;  %v1995_v41 = vadd.f32 %v1944_v57, %v1543_v22  ;;  %v1558_v51 = vadd.f32 %v4549_v23, %v6107_v30  ;;  %v1954_v35 = vpop.f32.mrf.mxu0  ;;  %v2520_v57 = vld [vmem:[%s7296_s2 + $0x28] sm:$0xff]  ;;  %v2519_v23 = vld [vmem:[%s7296_s2 + $0x20] sm:$0xff] }
 0x22b   : > { %2184 = vrot.lane.b32.xlu1 %v6292_v6, %s5059_s13  ;;  %v1552_v5 = vpop.f32.mrf.mxu1 }
 0x22c   : > { %2108 = vst.msk [vmem:[#allocation3 + $0xf1] sm:$0xff] %vm307_vm1, %v6412_v37  ;;  %v6420_v3 = vmax.f32 %v2039_v13, 0.0  ;;  %v2038_v55 = vadd.f32 %v6133_v31, %v1995_v41  ;;  %v1553_v20 = vadd.f32 %v1552_v5, %v6112_v36  ;;  %v1998_v53 = vadd.f32 %v4627_v32, %v1558_v51  ;;  %v2517_v41 = vld [vmem:[%s7296_s2 + $0x10] sm:$0xff] }
 0x22d   : > { %2182 = vrot.lane.b32.xlu0 %v6300_v25, %s5059_s13 }
 0x22e   : > { %2111 = vst.msk [vmem:[#allocation3 + $0x109] sm:$0x7f] %vm309_vm0, %v6420_v3  ;;  %v6428_v30 = vmax.f32 %v2038_v55, 0.0  ;;  %v2041_v54 = vadd.f32 %v6133_v31, %v1998_v53  ;;  %v1997_v34 = vadd.f32 %v1954_v35, %v1553_v20  ;;  %v2516_v55 = vld [vmem:[%s7296_s2 + $0x8] sm:$0xff]  ;;  %v2515_v53 = vld [vmem:[%s7296_s2] sm:$0xff] }
 0x22f   : > { %2328 = vrot.lane.b32.xlu1 %v6292_v6, %s5060_s10  ;;  %v7344_v6 = vmov 0.0  }
 0x230   : > { %2110 = vst.msk [vmem:[#allocation3 + $0x101] sm:$0xff] %vm307_vm1, %v6428_v30  ;;  %v6435_v28 = vmax.f32 %v2041_v54, 0.0  ;;  %v2040_v36 = vadd.f32 %v6133_v31, %v1997_v34 }
 0x231   : > { %2326 = vrot.lane.b32.xlu0 %v6300_v25, %s5060_s10 }
 0x232   : > { %2113 = vst.msk [vmem:[#allocation3 + $0x119] sm:$0x7f] %vm309_vm0, %v6435_v28  ;;  %v6447_v49 = vmax.f32 %v2040_v36, 0.0 }
 0x233   : > { %2188 = vrot.lane.b32.xlu1 %v6308_v56, %s5059_s13 }
 0x234   : > { %2112 = vst.msk [vmem:[#allocation3 + $0x111] sm:$0xff] %vm307_vm1, %v6447_v49 }
 0x235   : > { %2186 = vrot.lane.b32.xlu0 %v6316_v43, %s5059_s13 }
 0x237   : > { %2332 = vrot.lane.b32.xlu1 %v6308_v56, %s5060_s10 }
 0x239   : > { %2330 = vrot.lane.b32.xlu0 %v6316_v43, %s5060_s10 }
 0x23b   : > { %2192 = vrot.lane.b32.xlu1 %v6324_v24, %s5059_s13 }
 0x23d   : > { %2190 = vrot.lane.b32.xlu0 %v6332_v26, %s5059_s13 }
 0x23f   : > { %2336 = vrot.lane.b32.xlu1 %v6324_v24, %s5060_s10 }
 0x241   : > { %2334 = vrot.lane.b32.xlu0 %v6332_v26, %s5060_s10 }
 0x243   : > { %2196 = vrot.lane.b32.xlu1 %v6340_v38, %s5059_s13 }
 0x245   : > { %2194 = vrot.lane.b32.xlu0 %v6348_v1, %s5059_s13 }
 0x247   : > { %2340 = vrot.lane.b32.xlu1 %v6340_v38, %s5060_s10 }
 0x249   : > { %2338 = vrot.lane.b32.xlu0 %v6348_v1, %s5060_s10 }
 0x24b   : > { %2200 = vrot.lane.b32.xlu1 %v6356_v42, %s5059_s13 }
 0x24d   : > { %2198 = vrot.lane.b32.xlu0 %v6364_v59, %s5059_s13 }
 0x24f   : > { %2344 = vrot.lane.b32.xlu1 %v6356_v42, %s5060_s10 }
 0x251   : > { %2342 = vrot.lane.b32.xlu0 %v6364_v59, %s5060_s10 }
 0x253   : > { %2204 = vrot.lane.b32.xlu1 %v6372_v62, %s5059_s13 }
 0x255   : > { %2202 = vrot.lane.b32.xlu0 %v6380_v52, %s5059_s13 }
 0x257   : > { %2348 = vrot.lane.b32.xlu1 %v6372_v62, %s5060_s10 }
 0x259   : > { %2346 = vrot.lane.b32.xlu0 %v6380_v52, %s5060_s10 }
 0x25b   : > { %2208 = vrot.lane.b32.xlu1 %v6388_v44, %s5059_s13 }
 0x25d   : > { %2206 = vrot.lane.b32.xlu0 %v6396_v4, %s5059_s13 }
 0x25f   : > { %2352 = vrot.lane.b32.xlu1 %v6388_v44, %s5060_s10 }
 0x260   : > { %v2153_v31 = vpop.permute.xlu1 %2152 }
 0x261   : > { %2350 = vrot.lane.b32.xlu0 %v6396_v4, %s5060_s10  ;;  %2259 = vst.msk [vmem:[#allocation3 + $0x8] sm:$0xff] %vm329_vm2, %v2153_v31 }
 0x262   : > { %2456 = vst.msk [vmem:[#allocation3 + $0xf] sm:$0x1] %vm735_vm3, %v7344_v6  ;;  %v2151_v25 = vpop.permute.xlu0 %2150 }
 0x263   : > { %2212 = vrot.lane.b32.xlu1 %v6404_v33, %s5059_s13  ;;  %2258 = vst.msk [vmem:[#allocation3] sm:$0xff] %vm329_vm2, %v2151_v25 }
 0x264   : > { %v2157_v56 = vpop.permute.xlu1 %2156 }
 0x265   : > { %2210 = vrot.lane.b32.xlu0 %v6412_v37, %s5059_s13  ;;  %2261 = vst.msk [vmem:[#allocation3 + $0x18] sm:$0xff] %vm329_vm2, %v2157_v56 }
 0x266   : > { %2457 = vst.msk [vmem:[#allocation3 + $0x1f] sm:$0x1] %vm735_vm3, %v7344_v6  ;;  %v2155_v43 = vpop.permute.xlu0 %2154 }
 0x267   : > { %2356 = vrot.lane.b32.xlu1 %v6404_v33, %s5060_s10  ;;  %2260 = vst.msk [vmem:[#allocation3 + $0x10] sm:$0xff] %vm329_vm2, %v2155_v43 }
 0x268   : > { %v2301_v24 = vpop.permute.xlu1 %2300 }
 0x269   : > { %2354 = vrot.lane.b32.xlu0 %v6412_v37, %s5060_s10  ;;  %2405 = vst.msk [vmem:[#allocation3 + $0x17] sm:$0xff] %vm348_vm5, %v2301_v24  ;;  %v2518_v37 = vld [vmem:[%s7296_s2 + $0x18] sm:$0xff] }
 0x26a   : > { %v2299_v26 = vpop.permute.xlu0 %2298 }
 0x26b   : > { %2216 = vrot.lane.b32.xlu1 %v6420_v3, %s5059_s13  ;;  %2404 = vst.msk [vmem:[#allocation3 + $0xf] sm:$0xfe] %vm346_vm4, %v2299_v26 }
 0x26c   : > { %2439 = vst.msk [vmem:[#allocation3 + $0x10] sm:$0x1] %vm714_vm6, %v7344_v6 }
 0x26d   : > { %v2161_v38 = vpop.permute.xlu1 %2160  ;;  %2214 = vrot.lane.b32.xlu0 %v6428_v30, %s5059_s13 }
 0x26e   : > { %2263 = vst.msk [vmem:[#allocation3 + $0x28] sm:$0xff] %vm329_vm2, %v2161_v38 }
 0x26f   : > { %2458 = vst.msk [vmem:[#allocation3 + $0x2f] sm:$0x1] %vm735_vm3, %v7344_v6  ;;  %2360 = vrot.lane.b32.xlu1 %v6420_v3, %s5060_s10  ;;  %v2159_v1 = vpop.permute.xlu0 %2158 }
 0x270   : > { %2262 = vst.msk [vmem:[#allocation3 + $0x20] sm:$0xff] %vm329_vm2, %v2159_v1  ;;  %v6544_v48 = vld [vmem:[#allocation3 + $0x18] sm:$0xff] }
 0x271   : > { %v2305_v42 = vpop.permute.xlu1 %2304  ;;  %2358 = vrot.lane.b32.xlu0 %v6428_v30, %s5060_s10 }
 0x272   : > { %2407 = vst.msk [vmem:[#allocation3 + $0x27] sm:$0xff] %vm348_vm5, %v2305_v42 }
 0x273   : > { %2296 = vrot.lane.b32.xlu1 %v6150_v2, %s5060_s10  ;;  %v2303_v59 = vpop.permute.xlu0 %2302  ;;  %v6536_v62 = vld [vmem:[#allocation3 + $0x10] sm:$0xff] }
 0x274   : > { %2406 = vst.msk [vmem:[#allocation3 + $0x1f] sm:$0xfe] %vm346_vm4, %v2303_v59  ;;  %4652 = vmatprep.mubr.msk.f32.mxu1 %vm854_vm7, %v6536_v62  ;;  %v2525_v2 = vld [vmem:[%s7296_s2 + $0x50] sm:$0xff] }
 0x275   : > { %2440 = vst.msk [vmem:[#allocation3 + $0x20] sm:$0x1] %vm714_vm6, %v7344_v6  ;;  %v2165_v52 = vpop.permute.xlu1 %2164  ;;  %2294 = vrot.lane.b32.xlu0 %v6162_v21, %s5060_s10  ;;  %4653 = vmatmul.mubr.msk.f32.vlgmr.msra.gmra.mxu1 %vm854_vm7, %v6544_v48  ;;  %v2524_v21 = vld [vmem:[%s7296_s2 + $0x48] sm:$0xff] }
 0x276   : > { %2265 = vst.msk [vmem:[#allocation3 + $0x38] sm:$0xff] %vm329_vm2, %v2165_v52  ;;  %4701 = vmatpush3.msra.mxu1 %v6443_v46 }
 0x277   : > { %2459 = vst.msk [vmem:[#allocation3 + $0x3f] sm:$0x1] %vm735_vm3, %v7344_v6  ;;  %2220 = vrot.lane.b32.xlu1 %v6435_v28, %s5059_s13  ;;  %v2163_v44 = vpop.permute.xlu0 %2162  ;;  %4702 = vmatprep.subr.mxu1 %v2525_v2 }
 0x278   : > { %2264 = vst.msk [vmem:[#allocation3 + $0x30] sm:$0xff] %vm329_vm2, %v2163_v44  ;;  %4703 = vmatpush3.msra.mxu1 %v2525_v2 }
 0x279   : > { %v2309_v60 = vpop.permute.xlu1 %2308  ;;  %2218 = vrot.lane.b32.xlu0 %v6447_v49, %s5059_s13  ;;  %4704 = vmatprep.subr.mxu1 %v2524_v21  ;;  %v6578_v4 = vld [vmem:[#allocation3 + $0x28] sm:$0xff]  ;;  %s4117_s13 = sshll.u32 %s5048_s21, 12  ;;  %s7249_s21 = scalar_lea.sflag [#allocation5], %s229_s7 }
 0x27a   : > { %2409 = vst.msk [vmem:[#allocation3 + $0x37] sm:$0xff] %vm348_vm5, %v2309_v60  ;;  %4705 = vmatpush3.msra.mxu1 %v2524_v21  ;;  %s7239_s15 = scalar_lea.hbm %s7299_s5, %s4117_s13 }
 0x27b   : > { %2364 = vrot.lane.b32.xlu1 %v6435_v28, %s5060_s10  ;;  %v2307_v29 = vpop.permute.xlu0 %2306  ;;  %4706 = vmatprep.subr.mxu1 %v2523_v45 }
 0x27c   : > { %2408 = vst.msk [vmem:[#allocation3 + $0x2f] sm:$0xfe] %vm346_vm4, %v2307_v29  ;;  %v6570_v40 = vld [vmem:[#allocation3 + $0x20] sm:$0xff]  ;;  %4707 = vmatpush3.msra.mxu1 %v2523_v45 }
 0x27d   : > { %2441 = vst.msk [vmem:[#allocation3 + $0x30] sm:$0x1] %vm714_vm6, %v7344_v6  ;;  %v2169_v27 = vpop.permute.xlu1 %2168  ;;  %2362 = vrot.lane.b32.xlu0 %v6447_v49, %s5060_s10  ;;  %4655 = vmatprep.mubr.msk.f32.mxu1 %vm854_vm7, %v6570_v40 }
 0x27e   : > { %2267 = vst.msk [vmem:[#allocation3 + $0x48] sm:$0xff] %vm329_vm2, %v2169_v27  ;;  %4796 = vmatprep.mubr.msk.f32.mxu0 %vm854_vm7, %v6570_v40  ;;  %4656 = vmatmul.mubr.msk.f32.gmra.mxu1 %vm854_vm7, %v6578_v4 }
 0x27f   : > { %2460 = vst.msk [vmem:[#allocation3 + $0x4f] sm:$0x1] %vm735_vm3, %v7344_v6  ;;  %4797 = vmatmul.mubr.msk.f32.vlgmr.msra.gmra.mxu0 %vm854_vm7, %v6578_v4  ;;  %v2167_v58 = vpop.permute.xlu0 %2166  ;;  %4708 = vmatprep.subr.mxu1 %v2522_v50 }
 0x280   : > { %2266 = vst.msk [vmem:[#allocation3 + $0x40] sm:$0xff] %vm329_vm2, %v2167_v58  ;;  %4709 = vmatpush3.msra.mxu1 %v2522_v50 }
 0x281   : > { %v2313_v61 = vpop.permute.xlu1 %2312  ;;  %4710 = vmatprep.subr.mxu1 %v2521_v47  ;;  %v6609_v22 = vld [vmem:[#allocation3 + $0x38] sm:$0xff] }
 0x282   : > { %2411 = vst.msk [vmem:[#allocation3 + $0x47] sm:$0xff] %vm348_vm5, %v2313_v61  ;;  %4711 = vmatpush3.msra.mxu1 %v2521_v47 }
 0x283   : > { %v2311_v33 = vpop.permute.xlu0 %2310  ;;  %4712 = vmatprep.subr.mxu1 %v2520_v57 }
 0x284   : > { %2410 = vst.msk [vmem:[#allocation3 + $0x3f] sm:$0xfe] %vm346_vm4, %v2311_v33  ;;  %v6601_v0 = vld [vmem:[#allocation3 + $0x30] sm:$0xff]  ;;  %4713 = vmatpush3.msra.mxu1 %v2520_v57 }
 0x285   : > { %2442 = vst.msk [vmem:[#allocation3 + $0x40] sm:$0x1] %vm714_vm6, %v7344_v6  ;;  %v2173_v63 = vpop.permute.xlu1 %2172  ;;  %4658 = vmatprep.mubr.msk.f32.mxu1 %vm854_vm7, %v6601_v0  ;;  %4799 = vmatprep.mubr.msk.f32.mxu0 %vm854_vm7, %v6601_v0 }
 0x286   : > { %2269 = vst.msk [vmem:[#allocation3 + $0x58] sm:$0xff] %vm329_vm2, %v2173_v63  ;;  %4659 = vmatmul.mubr.msk.f32.gmra.mxu1 %vm854_vm7, %v6609_v22  ;;  %4800 = vmatmul.mubr.msk.f32.gmra.mxu0 %vm854_vm7, %v6609_v22 }
 0x287   : > { %2461 = vst.msk [vmem:[#allocation3 + $0x5f] sm:$0x1] %vm735_vm3, %v7344_v6  ;;  %v2171_v32 = vpop.permute.xlu0 %2170  ;;  %4714 = vmatprep.subr.mxu1 %v2519_v23 }
 0x288   : > { %2268 = vst.msk [vmem:[#allocation3 + $0x50] sm:$0xff] %vm329_vm2, %v2171_v32  ;;  %4715 = vmatpush3.msra.mxu1 %v2519_v23 }
 0x289   : > { %v2317_v13 = vpop.permute.xlu1 %2316  ;;  %4716 = vmatprep.subr.mxu1 %v2518_v37  ;;  %v6638_v3 = vld [vmem:[#allocation3 + $0x48] sm:$0xff] }
 0x28a   : > { %2413 = vst.msk [vmem:[#allocation3 + $0x57] sm:$0xff] %vm348_vm5, %v2317_v13  ;;  %4717 = vmatpush3.msra.mxu1 %v2518_v37 }
 0x28b   : > { %v2315_v51 = vpop.permute.xlu0 %2314  ;;  %4718 = vmatprep.subr.mxu1 %v2517_v41 }
 0x28c   : > { %2412 = vst.msk [vmem:[#allocation3 + $0x4f] sm:$0xfe] %vm346_vm4, %v2315_v51  ;;  %v6630_v5 = vld [vmem:[#allocation3 + $0x40] sm:$0xff]  ;;  %4719 = vmatpush3.msra.mxu1 %v2517_v41 }
 0x28d   : > { %2443 = vst.msk [vmem:[#allocation3 + $0x50] sm:$0x1] %vm714_vm6, %v7344_v6  ;;  %v2177_v35 = vpop.permute.xlu1 %2176  ;;  %4661 = vmatprep.mubr.msk.f32.mxu1 %vm854_vm7, %v6630_v5  ;;  %4802 = vmatprep.mubr.msk.f32.mxu0 %vm854_vm7, %v6630_v5 }
 0x28e   : > { %2271 = vst.msk [vmem:[#allocation3 + $0x68] sm:$0xff] %vm329_vm2, %v2177_v35  ;;  %4662 = vmatmul.mubr.msk.f32.gmra.mxu1 %vm854_vm7, %v6638_v3  ;;  %4803 = vmatmul.mubr.msk.f32.gmra.mxu0 %vm854_vm7, %v6638_v3 }
 0x28f   : > { %2462 = vst.msk [vmem:[#allocation3 + $0x6f] sm:$0x1] %vm735_vm3, %v7344_v6  ;;  %v2175_v20 = vpop.permute.xlu0 %2174  ;;  %4720 = vmatprep.subr.mxu1 %v2516_v55 }
 0x290   : > { %2270 = vst.msk [vmem:[#allocation3 + $0x60] sm:$0xff] %vm329_vm2, %v2175_v20  ;;  %4721 = vmatpush3.msra.mxu1 %v2516_v55 }
 0x291   : > { %v2321_v30 = vpop.permute.xlu1 %2320  ;;  %4722 = vmatprep.subr.mxu1 %v2515_v53  ;;  %v6665_v36 = vld [vmem:[#allocation3 + $0x58] sm:$0xff] }
 0x292   : > { %2415 = vst.msk [vmem:[#allocation3 + $0x67] sm:$0xff] %vm348_vm5, %v2321_v30  ;;  %4723 = vmatpush3.msra.mxu1 %v2515_v53 }
 0x293   : > { %v2319_v54 = vpop.permute.xlu0 %2318  ;;  %4844 = vmatprep.subr.mxu1 %v6120_v39 }
 0x294   : > { %2414 = vst.msk [vmem:[#allocation3 + $0x5f] sm:$0xfe] %vm346_vm4, %v2319_v54  ;;  %v6656_v34 = vld [vmem:[#allocation3 + $0x50] sm:$0xff] }
 0x295   : > { %2444 = vst.msk [vmem:[#allocation3 + $0x60] sm:$0x1] %vm714_vm6, %v7344_v6  ;;  %v2181_v28 = vpop.permute.xlu1 %2180  ;;  %4664 = vmatprep.mubr.msk.f32.mxu1 %vm854_vm7, %v6656_v34  ;;  %4805 = vmatprep.mubr.msk.f32.mxu0 %vm854_vm7, %v6656_v34 }
 0x296   : > { %2273 = vst.msk [vmem:[#allocation3 + $0x78] sm:$0xff] %vm329_vm2, %v2181_v28  ;;  %4665 = vmatmul.mubr.msk.f32.gmra.mxu1 %vm854_vm7, %v6665_v36  ;;  %4806 = vmatmul.mubr.msk.f32.gmra.mxu0 %vm854_vm7, %v6665_v36 }
 0x297   : > { %2463 = vst.msk [vmem:[#allocation3 + $0x7f] sm:$0x1] %vm735_vm3, %v7344_v6  ;;  %v2179_v39 = vpop.permute.xlu0 %2178 }
 0x298   : > { %2272 = vst.msk [vmem:[#allocation3 + $0x70] sm:$0xff] %vm329_vm2, %v2179_v39 }
 0x299   : > { %v2325_v46 = vpop.permute.xlu1 %2324  ;;  %v6685_v56 = vld [vmem:[#allocation3 + $0x68] sm:$0xff] }
 0x29a   : > { %2417 = vst.msk [vmem:[#allocation3 + $0x77] sm:$0xff] %vm348_vm5, %v2325_v46 }
 0x29b   : > { %v2323_v49 = vpop.permute.xlu0 %2322 }
 0x29c   : > { %2416 = vst.msk [vmem:[#allocation3 + $0x6f] sm:$0xfe] %vm346_vm4, %v2323_v49  ;;  %v6677_v31 = vld [vmem:[#allocation3 + $0x60] sm:$0xff] }
 0x29d   : > { %2445 = vst.msk [vmem:[#allocation3 + $0x70] sm:$0x1] %vm714_vm6, %v7344_v6  ;;  %v2185_v25 = vpop.permute.xlu1 %2184  ;;  %4667 = vmatprep.mubr.msk.f32.mxu1 %vm854_vm7, %v6677_v31  ;;  %4808 = vmatprep.mubr.msk.f32.mxu0 %vm854_vm7, %v6677_v31 }
 0x29e   : > { %2275 = vst.msk [vmem:[#allocation3 + $0x88] sm:$0xff] %vm329_vm2, %v2185_v25  ;;  %4668 = vmatmul.mubr.msk.f32.gmra.mxu1 %vm854_vm7, %v6685_v56  ;;  %4809 = vmatmul.mubr.msk.f32.gmra.mxu0 %vm854_vm7, %v6685_v56 }
 0x29f   : > { %2464 = vst.msk [vmem:[#allocation3 + $0x8f] sm:$0x1] %vm735_vm3, %v7344_v6  ;;  %v2183_v43 = vpop.permute.xlu0 %2182 }
 0x2a0   : > { %2274 = vst.msk [vmem:[#allocation3 + $0x80] sm:$0xff] %vm329_vm2, %v2183_v43 }
 0x2a1   : > { %v2329_v24 = vpop.permute.xlu1 %2328  ;;  %v6705_v42 = vld [vmem:[#allocation3 + $0x78] sm:$0xff] }
 0x2a2   : > { %2419 = vst.msk [vmem:[#allocation3 + $0x87] sm:$0xff] %vm348_vm5, %v2329_v24 }
 0x2a3   : > { %v2327_v26 = vpop.permute.xlu0 %2326 }
 0x2a4   : > { %2418 = vst.msk [vmem:[#allocation3 + $0x7f] sm:$0xfe] %vm346_vm4, %v2327_v26  ;;  %v6697_v38 = vld [vmem:[#allocation3 + $0x70] sm:$0xff] }
 0x2a5   : > { %2446 = vst.msk [vmem:[#allocation3 + $0x80] sm:$0x1] %vm714_vm6, %v7344_v6  ;;  %v2189_v1 = vpop.permute.xlu1 %2188  ;;  %4670 = vmatprep.mubr.msk.f32.mxu1 %vm854_vm7, %v6697_v38  ;;  %4811 = vmatprep.mubr.msk.f32.mxu0 %vm854_vm7, %v6697_v38 }
 0x2a6   : > { %2277 = vst.msk [vmem:[#allocation3 + $0x98] sm:$0xff] %vm329_vm2, %v2189_v1  ;;  %4671 = vmatmul.mubr.msk.f32.gmra.mxu1 %vm854_vm7, %v6705_v42  ;;  %4812 = vmatmul.mubr.msk.f32.gmra.mxu0 %vm854_vm7, %v6705_v42 }
 0x2a7   : > { %2465 = vst.msk [vmem:[#allocation3 + $0x9f] sm:$0x1] %vm735_vm3, %v7344_v6  ;;  %v2187_v59 = vpop.permute.xlu0 %2186 }
 0x2a8   : > { %2276 = vst.msk [vmem:[#allocation3 + $0x90] sm:$0xff] %vm329_vm2, %v2187_v59 }
 0x2a9   : > { %v2333_v52 = vpop.permute.xlu1 %2332  ;;  %v6725_v60 = vld [vmem:[#allocation3 + $0x88] sm:$0xff] }
 0x2aa   : > { %2421 = vst.msk [vmem:[#allocation3 + $0x97] sm:$0xff] %vm348_vm5, %v2333_v52 }
 0x2ab   : > { %v2331_v2 = vpop.permute.xlu0 %2330 }
 0x2ac   : > { %2420 = vst.msk [vmem:[#allocation3 + $0x8f] sm:$0xfe] %vm346_vm4, %v2331_v2  ;;  %v6717_v44 = vld [vmem:[#allocation3 + $0x80] sm:$0xff] }
 0x2ad   : > { %2447 = vst.msk [vmem:[#allocation3 + $0x90] sm:$0x1] %vm714_vm6, %v7344_v6  ;;  %v2193_v21 = vpop.permute.xlu1 %2192  ;;  %4673 = vmatprep.mubr.msk.f32.mxu1 %vm854_vm7, %v6717_v44  ;;  %4814 = vmatprep.mubr.msk.f32.mxu0 %vm854_vm7, %v6717_v44 }
 0x2ae   : > { %2279 = vst.msk [vmem:[#allocation3 + $0xa8] sm:$0xff] %vm329_vm2, %v2193_v21  ;;  %4674 = vmatmul.mubr.msk.f32.gmra.mxu1 %vm854_vm7, %v6725_v60  ;;  %4815 = vmatmul.mubr.msk.f32.gmra.mxu0 %vm854_vm7, %v6725_v60 }
 0x2af   : > { %2466 = vst.msk [vmem:[#allocation3 + $0xaf] sm:$0x1] %vm735_vm3, %v7344_v6  ;;  %v2191_v45 = vpop.permute.xlu0 %2190 }
 0x2b0   : > { %2278 = vst.msk [vmem:[#allocation3 + $0xa0] sm:$0xff] %vm329_vm2, %v2191_v45 }
 0x2b1   : > { %v2337_v29 = vpop.permute.xlu1 %2336  ;;  %v6745_v47 = vld [vmem:[#allocation3 + $0x98] sm:$0xff] }
 0x2b2   : > { %2423 = vst.msk [vmem:[#allocation3 + $0xa7] sm:$0xff] %vm348_vm5, %v2337_v29 }
 0x2b3   : > { %v2335_v27 = vpop.permute.xlu0 %2334 }
 0x2b4   : > { %2422 = vst.msk [vmem:[#allocation3 + $0x9f] sm:$0xfe] %vm346_vm4, %v2335_v27  ;;  %v6737_v50 = vld [vmem:[#allocation3 + $0x90] sm:$0xff] }
 0x2b5   : > { %2448 = vst.msk [vmem:[#allocation3 + $0xa0] sm:$0x1] %vm714_vm6, %v7344_v6  ;;  %v2197_v58 = vpop.permute.xlu1 %2196  ;;  %4676 = vmatprep.mubr.msk.f32.mxu1 %vm854_vm7, %v6737_v50  ;;  %4817 = vmatprep.mubr.msk.f32.mxu0 %vm854_vm7, %v6737_v50 }
 0x2b6   : > { %2281 = vst.msk [vmem:[#allocation3 + $0xb8] sm:$0xff] %vm329_vm2, %v2197_v58  ;;  %4677 = vmatmul.mubr.msk.f32.gmra.mxu1 %vm854_vm7, %v6745_v47  ;;  %4818 = vmatmul.mubr.msk.f32.gmra.mxu0 %vm854_vm7, %v6745_v47 }
 0x2b7   : > { %2467 = vst.msk [vmem:[#allocation3 + $0xbf] sm:$0x1] %vm735_vm3, %v7344_v6  ;;  %v2195_v61 = vpop.permute.xlu0 %2194 }
 0x2b8   : > { %2280 = vst.msk [vmem:[#allocation3 + $0xb0] sm:$0xff] %vm329_vm2, %v2195_v61 }
 0x2b9   : > { %v2341_v57 = vpop.permute.xlu1 %2340  ;;  %v6765_v32 = vld [vmem:[#allocation3 + $0xa8] sm:$0xff] }
 0x2ba   : > { %2425 = vst.msk [vmem:[#allocation3 + $0xb7] sm:$0xff] %vm348_vm5, %v2341_v57 }
 0x2bb   : > { %v2339_v33 = vpop.permute.xlu0 %2338 }
 0x2bc   : > { %2424 = vst.msk [vmem:[#allocation3 + $0xaf] sm:$0xfe] %vm346_vm4, %v2339_v33  ;;  %v6757_v63 = vld [vmem:[#allocation3 + $0xa0] sm:$0xff] }
 0x2bd   : > { %2449 = vst.msk [vmem:[#allocation3 + $0xb0] sm:$0x1] %vm714_vm6, %v7344_v6  ;;  %v2201_v23 = vpop.permute.xlu1 %2200  ;;  %4679 = vmatprep.mubr.msk.f32.mxu1 %vm854_vm7, %v6757_v63  ;;  %4820 = vmatprep.mubr.msk.f32.mxu0 %vm854_vm7, %v6757_v63 }
 0x2be   : > { %2283 = vst.msk [vmem:[#allocation3 + $0xc8] sm:$0xff] %vm329_vm2, %v2201_v23  ;;  %4680 = vmatmul.mubr.msk.f32.gmra.mxu1 %vm854_vm7, %v6765_v32  ;;  %4821 = vmatmul.mubr.msk.f32.gmra.mxu0 %vm854_vm7, %v6765_v32 }
 0x2bf   : > { %2468 = vst.msk [vmem:[#allocation3 + $0xcf] sm:$0x1] %vm735_vm3, %v7344_v6  ;;  %v2199_v37 = vpop.permute.xlu0 %2198 }
 0x2c0   : > { %2282 = vst.msk [vmem:[#allocation3 + $0xc0] sm:$0xff] %vm329_vm2, %v2199_v37 }
 0x2c1   : > { %v2345_v13 = vpop.permute.xlu1 %2344  ;;  %v6785_v55 = vld [vmem:[#allocation3 + $0xb8] sm:$0xff] }
 0x2c2   : > { %2427 = vst.msk [vmem:[#allocation3 + $0xc7] sm:$0xff] %vm348_vm5, %v2345_v13 }
 0x2c3   : > { %v2343_v41 = vpop.permute.xlu0 %2342 }
 0x2c4   : > { %2426 = vst.msk [vmem:[#allocation3 + $0xbf] sm:$0xfe] %vm346_vm4, %v2343_v41  ;;  %v6777_v51 = vld [vmem:[#allocation3 + $0xb0] sm:$0xff] }
 0x2c5   : > { %2450 = vst.msk [vmem:[#allocation3 + $0xc0] sm:$0x1] %vm714_vm6, %v7344_v6  ;;  %v2205_v35 = vpop.permute.xlu1 %2204  ;;  %4682 = vmatprep.mubr.msk.f32.mxu1 %vm854_vm7, %v6777_v51  ;;  %4823 = vmatprep.mubr.msk.f32.mxu0 %vm854_vm7, %v6777_v51 }
 0x2c6   : > { %2285 = vst.msk [vmem:[#allocation3 + $0xd8] sm:$0xff] %vm329_vm2, %v2205_v35  ;;  %4683 = vmatmul.mubr.msk.f32.gmra.mxu1 %vm854_vm7, %v6785_v55  ;;  %4824 = vmatmul.mubr.msk.f32.gmra.mxu0 %vm854_vm7, %v6785_v55 }
 0x2c7   : > { %2469 = vst.msk [vmem:[#allocation3 + $0xdf] sm:$0x1] %vm735_vm3, %v7344_v6  ;;  %v2203_v20 = vpop.permute.xlu0 %2202 }
 0x2c8   : > { %2284 = vst.msk [vmem:[#allocation3 + $0xd0] sm:$0xff] %vm329_vm2, %v2203_v20 }
 0x2c9   : > { %v2349_v53 = vpop.permute.xlu1 %2348  ;;  %v6805_v39 = vld [vmem:[#allocation3 + $0xc8] sm:$0xff] }
 0x2ca   : > { %2429 = vst.msk [vmem:[#allocation3 + $0xd7] sm:$0xff] %vm348_vm5, %v2349_v53 }
 0x2cb   : > { %v2347_v30 = vpop.permute.xlu0 %2346 }
 0x2cc   : > { %2428 = vst.msk [vmem:[#allocation3 + $0xcf] sm:$0xfe] %vm346_vm4, %v2347_v30  ;;  %v6797_v54 = vld [vmem:[#allocation3 + $0xc0] sm:$0xff] }
 0x2cd   : > { %2451 = vst.msk [vmem:[#allocation3 + $0xd0] sm:$0x1] %vm714_vm6, %v7344_v6  ;;  %v2209_v28 = vpop.permute.xlu1 %2208  ;;  %4685 = vmatprep.mubr.msk.f32.mxu1 %vm854_vm7, %v6797_v54  ;;  %4826 = vmatprep.mubr.msk.f32.mxu0 %vm854_vm7, %v6797_v54 }
 0x2ce   : > { %2287 = vst.msk [vmem:[#allocation3 + $0xe8] sm:$0xff] %vm329_vm2, %v2209_v28  ;;  %4686 = vmatmul.mubr.msk.f32.gmra.mxu1 %vm854_vm7, %v6805_v39  ;;  %4827 = vmatmul.mubr.msk.f32.gmra.mxu0 %vm854_vm7, %v6805_v39 }
 0x2cf   : > { %2470 = vst.msk [vmem:[#allocation3 + $0xef] sm:$0x1] %vm735_vm3, %v7344_v6  ;;  %v2207_v46 = vpop.permute.xlu0 %2206 }
 0x2d0   : > { %2286 = vst.msk [vmem:[#allocation3 + $0xe0] sm:$0xff] %vm329_vm2, %v2207_v46  ;;  %v4968_v46 = vld [vmem:[%s7296_s2 + $0x118] sm:$0xff] }
 0x2d1   : > { %v2353_v49 = vpop.permute.xlu1 %2352  ;;  %v6825_v26 = vld [vmem:[#allocation3 + $0xd8] sm:$0xff] }
 0x2d2   : > { %2431 = vst.msk [vmem:[#allocation3 + $0xe7] sm:$0xff] %vm348_vm5, %v2353_v49  ;;  %v4969_v49 = vld [vmem:[%s7296_s2 + $0x110] sm:$0xff] }
 0x2d3   : > { %v2351_v25 = vpop.permute.xlu0 %2350 }
 0x2d4   : > { %2430 = vst.msk [vmem:[#allocation3 + $0xdf] sm:$0xfe] %vm346_vm4, %v2351_v25  ;;  %v6817_v43 = vld [vmem:[#allocation3 + $0xd0] sm:$0xff] }
 0x2d5   : > { %2452 = vst.msk [vmem:[#allocation3 + $0xe0] sm:$0x1] %vm714_vm6, %v7344_v6  ;;  %v2213_v24 = vpop.permute.xlu1 %2212  ;;  %4688 = vmatprep.mubr.msk.f32.mxu1 %vm854_vm7, %v6817_v43  ;;  %4829 = vmatprep.mubr.msk.f32.mxu0 %vm854_vm7, %v6817_v43 }
 0x2d6   : > { %2289 = vst.msk [vmem:[#allocation3 + $0xf8] sm:$0xff] %vm329_vm2, %v2213_v24  ;;  %4689 = vmatmul.mubr.msk.f32.gmra.mxu1 %vm854_vm7, %v6825_v26  ;;  %4830 = vmatmul.mubr.msk.f32.gmra.mxu0 %vm854_vm7, %v6825_v26 }
 0x2d7   : > { %2471 = vst.msk [vmem:[#allocation3 + $0xff] sm:$0x1] %vm735_vm3, %v7344_v6  ;;  %v2211_v1 = vpop.permute.xlu0 %2210 }
 0x2d8   : > { %2288 = vst.msk [vmem:[#allocation3 + $0xf0] sm:$0xff] %vm329_vm2, %v2211_v1 }
 0x2d9   : > { %v2357_v59 = vpop.permute.xlu1 %2356  ;;  %v6845_v45 = vld [vmem:[#allocation3 + $0xe8] sm:$0xff] }
 0x2da   : > { %2433 = vst.msk [vmem:[#allocation3 + $0xf7] sm:$0xff] %vm348_vm5, %v2357_v59 }
 0x2db   : > { %v2355_v52 = vpop.permute.xlu0 %2354 }
 0x2dc   : > { %2432 = vst.msk [vmem:[#allocation3 + $0xef] sm:$0xfe] %vm346_vm4, %v2355_v52  ;;  %v6837_v2 = vld [vmem:[#allocation3 + $0xe0] sm:$0xff] }
 0x2dd   : > { %2453 = vst.msk [vmem:[#allocation3 + $0xf0] sm:$0x1] %vm714_vm6, %v7344_v6  ;;  %v2217_v21 = vpop.permute.xlu1 %2216  ;;  %4691 = vmatprep.mubr.msk.f32.mxu1 %vm854_vm7, %v6837_v2  ;;  %4832 = vmatprep.mubr.msk.f32.mxu0 %vm854_vm7, %v6837_v2 }
 0x2de   : > { %2291 = vst.msk [vmem:[#allocation3 + $0x108] sm:$0xff] %vm329_vm2, %v2217_v21  ;;  %4692 = vmatmul.mubr.msk.f32.gmra.mxu1 %vm854_vm7, %v6845_v45  ;;  %4833 = vmatmul.mubr.msk.f32.gmra.mxu0 %vm854_vm7, %v6845_v45 }
 0x2df   : > { %2472 = vst.msk [vmem:[#allocation3 + $0x10f] sm:$0x1] %vm735_vm3, %v7344_v6  ;;  %v2215_v29 = vpop.permute.xlu0 %2214 }
 0x2e0   : > { %2290 = vst.msk [vmem:[#allocation3 + $0x100] sm:$0xff] %vm329_vm2, %v2215_v29 }
 0x2e1   : > { %v2361_v27 = vpop.permute.xlu1 %2360  ;;  %v6865_v33 = vld [vmem:[#allocation3 + $0xf8] sm:$0xff] }
 0x2e2   : > { %2435 = vst.msk [vmem:[#allocation3 + $0x107] sm:$0xff] %vm348_vm5, %v2361_v27 }
 0x2e3   : > { %v2359_v58 = vpop.permute.xlu0 %2358 }
 0x2e4   : > { %2434 = vst.msk [vmem:[#allocation3 + $0xff] sm:$0xfe] %vm346_vm4, %v2359_v58  ;;  %v6857_v61 = vld [vmem:[#allocation3 + $0xf0] sm:$0xff] }
 0x2e5   : > { %2454 = vst.msk [vmem:[#allocation3 + $0x100] sm:$0x1] %vm714_vm6, %v7344_v6  ;;  %v2297_v57 = vpop.permute.xlu1 %2296  ;;  %4694 = vmatprep.mubr.msk.f32.mxu1 %vm854_vm7, %v6857_v61  ;;  %4835 = vmatprep.mubr.msk.f32.mxu0 %vm854_vm7, %v6857_v61 }
 0x2e6   : > { %2403 = vst.msk [vmem:[#allocation3 + $0x7] sm:$0xff] %vm348_vm5, %v2297_v57  ;;  %4695 = vmatmul.mubr.msk.f32.gmra.mxu1 %vm854_vm7, %v6865_v33  ;;  %4836 = vmatmul.mubr.msk.f32.gmra.mxu0 %vm854_vm7, %v6865_v33 }
 0x2e7   : > { %2479 = vst.msk [vmem:[#allocation3 + $0x8] sm:$0xff] %vm854_vm7, %v7344_v6  ;;  %v2295_v23 = vpop.permute.xlu0 %2294 }
 0x2e8   : > { %2402 = vst.msk [vmem:[#allocation3 - $0x1] sm:$0xfe] %vm346_vm4, %v2295_v23 }
 0x2e9   : > { %2438 = vst.msk [vmem:[#allocation3] sm:$0x1] %vm714_vm6, %v7344_v6  ;;  %v2221_v37 = vpop.permute.xlu1 %2220  ;;  %v2559_v20 = vld [vmem:[#allocation3 + $0x108] sm:$0xff] }
 0x2ea   : > { %2478 = vst.msk [vmem:[#allocation3] sm:$0xff] %vm854_vm7, %v7344_v6 }
 0x2eb   : > { %2293 = vst.msk [vmem:[#allocation3 + $0x118] sm:$0xff] %vm329_vm2, %v2221_v37  ;;  %v2219_v13 = vpop.permute.xlu0 %2218 }
 0x2ec   : > { %2473 = vst.msk [vmem:[#allocation3 + $0x11f] sm:$0x1] %vm735_vm3, %v7344_v6  ;;  %v2558_v41 = vld [vmem:[#allocation3 + $0x100] sm:$0xff] }
 0x2ed   : > { %2292 = vst.msk [vmem:[#allocation3 + $0x110] sm:$0xff] %vm329_vm2, %v2219_v13  ;;  %v2365_v35 = vpop.permute.xlu1 %2364  ;;  %4697 = vmatprep.mubr.msk.f32.mxu1 %vm854_vm7, %v2558_v41  ;;  %4838 = vmatprep.mubr.msk.f32.mxu0 %vm854_vm7, %v2558_v41 }
 0x2ee   : > { %2437 = vst.msk [vmem:[#allocation3 + $0x117] sm:$0xff] %vm348_vm5, %v2365_v35  ;;  %4698 = vmatmul.mubr.msk.f32.gmra.mxu1 %vm854_vm7, %v2559_v20  ;;  %4839 = vmatmul.mubr.msk.f32.gmra.mxu0 %vm854_vm7, %v2559_v20  ;;  %v2484_v30 = vld [vmem:[#allocation3 + $0x8] sm:$0xff] }
 0x2ef   : > { %2482 = vst.msk [vmem:[#allocation3 + $0x118] sm:$0xff] %vm854_vm7, %v7344_v6  ;;  %v2363_v53 = vpop.permute.xlu0 %2362 }
 0x2f0   : > { %2436 = vst.msk [vmem:[#allocation3 + $0x10f] sm:$0xfe] %vm346_vm4, %v2363_v53 }
 0x2f1   : > { %2455 = vst.msk [vmem:[#allocation3 + $0x110] sm:$0x1] %vm714_vm6, %v7344_v6  ;;  %v2483_v28 = vld [vmem:[#allocation3] sm:$0xff] }
 0x2f2   : > { %2481 = vst.msk [vmem:[#allocation3 + $0x110] sm:$0xff] %vm854_vm7, %v7344_v6  ;;  %4724 = vmatprep.mubr.msk.f32.mxu1 %vm854_vm7, %v2483_v28  ;;  %v4970_v6 = vld [vmem:[%s7296_s2 + $0x108] sm:$0xff] }
 0x2f3   : > { %4725 = vmatmul.mubr.msk.f32.vlgmr.msra.gmra.mxu1 %vm854_vm7, %v2484_v30 }
 0x2f4   : > { %4856 = vmatpush3.msra.mxu1 %v4968_v46  ;;  %4727 = vmatprep.mubr.msk.f32.mxu1 %vm854_vm7, %v6536_v62  ;;  %v4971_v62 = vld [vmem:[%s7296_s2 + $0x100] sm:$0xff] }
 0x2f5   : > { %4845 = vmatprep.subr.mxu1 %v4969_v49 }
 0x2f6   : > { %4857 = vmatpush3.msra.mxu1 %v4969_v49 }
 0x2f7   : > { %4728 = vmatmul.mubr.msk.f32.gmra.mxu1 %vm854_vm7, %v6544_v48  ;;  %4846 = vmatprep.subr.mxu1 %v4970_v6  ;;  %v4972_v48 = vld [vmem:[%s7296_s2 + $0xf8] sm:$0xff] }
 0x2f8   : > { %4730 = vmatprep.mubr.msk.f32.mxu1 %vm854_vm7, %v6570_v40  ;;  %4858 = vmatpush3.msra.mxu1 %v4970_v6  ;;  %v4973_v40 = vld [vmem:[%s7296_s2 + $0xf0] sm:$0xff] }
 0x2f9   : > { %4847 = vmatprep.subr.mxu1 %v4971_v62 }
 0x2fa   : > { %4859 = vmatpush3.msra.mxu1 %v4971_v62 }
 0x2fb   : > { %4731 = vmatmul.mubr.msk.f32.gmra.mxu1 %vm854_vm7, %v6578_v4  ;;  %4848 = vmatprep.subr.mxu1 %v4972_v48  ;;  %v4974_v4 = vld [vmem:[%s7296_s2 + $0xe8] sm:$0xff] }
 0x2fc   : > { %4733 = vmatprep.mubr.msk.f32.mxu1 %vm854_vm7, %v6601_v0  ;;  %4860 = vmatpush3.msra.mxu1 %v4972_v48  ;;  %v4975_v0 = vld [vmem:[%s7296_s2 + $0xe0] sm:$0xff] }
 0x2fd   : > { %4849 = vmatprep.subr.mxu1 %v4973_v40 }
 0x2fe   : > { %4861 = vmatpush3.msra.mxu1 %v4973_v40 }
 0x2ff   : > { %4734 = vmatmul.mubr.msk.f32.gmra.mxu1 %vm854_vm7, %v6609_v22  ;;  %4850 = vmatprep.subr.mxu1 %v4974_v4  ;;  %v4976_v22 = vld [vmem:[%s7296_s2 + $0xd8] sm:$0xff] }
 0x300   : > { %4736 = vmatprep.mubr.msk.f32.mxu1 %vm854_vm7, %v6630_v5  ;;  %4862 = vmatpush3.msra.mxu1 %v4974_v4  ;;  %v4977_v5 = vld [vmem:[%s7296_s2 + $0xd0] sm:$0xff]  ;;  %v7059_v4 = vld [vmem:[%s7298_s4] ss:$0 sm:$0xff] }
 0x301   : > { %4851 = vmatprep.subr.mxu1 %v4975_v0 }
 0x302   : > { %4863 = vmatpush3.msra.mxu1 %v4975_v0 }
 0x303   : > { %4737 = vmatmul.mubr.msk.f32.gmra.mxu1 %vm854_vm7, %v6638_v3  ;;  %4852 = vmatprep.subr.mxu1 %v4976_v22  ;;  %v4978_v3 = vld [vmem:[%s7296_s2 + $0xc8] sm:$0xff] }
 0x304   : > { %4739 = vmatprep.mubr.msk.f32.mxu1 %vm854_vm7, %v6656_v34  ;;  %4864 = vmatpush3.msra.mxu1 %v4976_v22  ;;  %v4979_v34 = vld [vmem:[%s7296_s2 + $0xc0] sm:$0xff] }
 0x305   : > { %4853 = vmatprep.subr.mxu1 %v4977_v5 }
 0x306   : > { %4865 = vmatpush3.msra.mxu1 %v4977_v5 }
 0x307   : > { %4740 = vmatmul.mubr.msk.f32.gmra.mxu1 %vm854_vm7, %v6665_v36  ;;  %4854 = vmatprep.subr.mxu1 %v4978_v3  ;;  %v3246_v36 = vld [vmem:[#allocation3 + $0x110] sm:$0xff] }
 0x308   : > { %4742 = vmatprep.mubr.msk.f32.mxu1 %vm854_vm7, %v6677_v31  ;;  %4866 = vmatpush3.msra.mxu1 %v4978_v3  ;;  %v3247_v31 = vld [vmem:[#allocation3 + $0x118] sm:$0xff] }
 0x309   : > { %4855 = vmatprep.subr.mxu1 %v4979_v34 }
 0x30a   : > { %4867 = vmatpush3.msra.mxu1 %v4979_v34 }
 0x30b   : > { %4743 = vmatmul.mubr.msk.f32.gmra.mxu1 %vm854_vm7, %v6685_v56 }
 0x30c   : > { %4745 = vmatprep.mubr.msk.f32.mxu1 %vm854_vm7, %v6697_v38 }
 0x30f   : > { %4746 = vmatmul.mubr.msk.f32.gmra.mxu1 %vm854_vm7, %v6705_v42 }
 0x310   : > { %4748 = vmatprep.mubr.msk.f32.mxu1 %vm854_vm7, %v6717_v44 }
 0x313   : > { %4749 = vmatmul.mubr.msk.f32.gmra.mxu1 %vm854_vm7, %v6725_v60 }
 0x314   : > { %4751 = vmatprep.mubr.msk.f32.mxu1 %vm854_vm7, %v6737_v50 }
 0x317   : > { %4752 = vmatmul.mubr.msk.f32.gmra.mxu1 %vm854_vm7, %v6745_v47 }
 0x318   : > { %4754 = vmatprep.mubr.msk.f32.mxu1 %vm854_vm7, %v6757_v63 }
 0x31b   : > { %4755 = vmatmul.mubr.msk.f32.gmra.mxu1 %vm854_vm7, %v6765_v32 }
 0x31c   : > { %4757 = vmatprep.mubr.msk.f32.mxu1 %vm854_vm7, %v6777_v51 }
 0x31f   : > { %4758 = vmatmul.mubr.msk.f32.gmra.mxu1 %vm854_vm7, %v6785_v55 }
 0x320   : > { %4760 = vmatprep.mubr.msk.f32.mxu1 %vm854_vm7, %v6797_v54 }
 0x323   : > { %4761 = vmatmul.mubr.msk.f32.gmra.mxu1 %vm854_vm7, %v6805_v39 }
 0x324   : > { %4763 = vmatprep.mubr.msk.f32.mxu1 %vm854_vm7, %v6817_v43 }
 0x327   : > { %4764 = vmatmul.mubr.msk.f32.gmra.mxu1 %vm854_vm7, %v6825_v26 }
 0x328   : > { %4766 = vmatprep.mubr.msk.f32.mxu1 %vm854_vm7, %v6837_v2 }
 0x32b   : > { %4767 = vmatmul.mubr.msk.f32.gmra.mxu1 %vm854_vm7, %v6845_v45 }
 0x32c   : > { %4769 = vmatprep.mubr.msk.f32.mxu1 %vm854_vm7, %v6857_v61 }
 0x32f   : > { %4770 = vmatmul.mubr.msk.f32.gmra.mxu1 %vm854_vm7, %v6865_v33 }
 0x330   : > { %4841 = vmatprep.mubr.msk.f32.mxu1 %vm854_vm7, %v3246_v36 }
 0x333   : > { %4842 = vmatmul.mubr.msk.f32.vlgmr.msra.gmra.mxu1 %vm854_vm7, %v3247_v31 }
 0x335   : > { %v4654_v56 = vpop.f32.mrf.mxu1 }
 0x337   : > { %v2735_v38 = vpop.f32.mrf.mxu1 }
 0x33e   : > { %v4657_v42 = vpop.f32.mrf.mxu1 }
 0x33f   : > { %v4798_v29 = vpop.f32.mrf.mxu0 }
 0x340   : > { %v2745_v44 = vpop.f32.mrf.mxu1 }
 0x341   : > { %v3423_v58 = vpop.f32.mrf.mxu0 }
 0x346   : > { %v6995_v60 = vpop.f32.mrf.mxu1  ;;  %v4801_v57 = vpop.f32.mrf.mxu0 }
 0x348   : > { %v6997_v50 = vpop.f32.mrf.mxu1  ;;  %v3433_v23 = vpop.f32.mrf.mxu0 }
 0x34e   : > { %v6999_v47 = vpop.f32.mrf.mxu1  ;;  %v4804_v13 = vpop.f32.mrf.mxu0 }
 0x350   : > { %v7001_v63 = vpop.f32.mrf.mxu1  ;;  %v3443_v35 = vpop.f32.mrf.mxu0 }
 0x356   : > { %v7003_v32 = vpop.f32.mrf.mxu1  ;;  %v4807_v53 = vpop.f32.mrf.mxu0 }
 0x358   : > { %v7005_v51 = vpop.f32.mrf.mxu1  ;;  %v3453_v28 = vpop.f32.mrf.mxu0 }
 0x35e   : > { %v7007_v55 = vpop.f32.mrf.mxu1  ;;  %v7049_v49 = vpop.f32.mrf.mxu0 }
 0x360   : > { %v7009_v54 = vpop.f32.mrf.mxu1  ;;  %v7053_v48 = vpop.f32.mrf.mxu0 }
 0x366   : > { %v7011_v39 = vpop.f32.mrf.mxu1  ;;  %v7061_v22 = vpop.f32.mrf.mxu0 }
 0x368   : > { %v7013_v25 = vpop.f32.mrf.mxu1 }
 0x36e   : > { %v7015_v43 = vpop.f32.mrf.mxu1 }
 0x370   : > { %v7017_v24 = vpop.f32.mrf.mxu1 }
 0x376   : > { %v7019_v26 = vpop.f32.mrf.mxu1 }
 0x378   : > { %v7021_v1 = vpop.f32.mrf.mxu1 }
 0x37e   : > { %v7023_v59 = vpop.f32.mrf.mxu1 }
 0x380   : > { %v7025_v52 = vpop.f32.mrf.mxu1 }
 0x386   : > { %v7027_v2 = vpop.f32.mrf.mxu1 }
 0x388   : > { %v7029_v21 = vpop.f32.mrf.mxu1 }
 0x38e   : > { %v7031_v45 = vpop.f32.mrf.mxu1 }
 0x390   : > { %v7033_v27 = vpop.f32.mrf.mxu1 }
 0x396   : > { %v7035_v61 = vpop.f32.mrf.mxu1 }
 0x398   : > { %v7037_v33 = vpop.f32.mrf.mxu1 }
 0x399   : > { %7345 = vst [vmem:[#allocation27_spill] sm:$0xff] %v7037_v33 }
 0x39e   : > { %v7039_v37 = vpop.f32.mrf.mxu1 }
 0x39f   : > { %7346 = vst [vmem:[#allocation28_spill] sm:$0xff] %v7039_v37 }
 0x3a0   : > { %v7041_v41 = vpop.f32.mrf.mxu1 }
 0x3a1   : > { %7347 = vst [vmem:[#allocation29_spill] sm:$0xff] %v7041_v41 }
 0x3a6   : > { %v7043_v20 = vpop.f32.mrf.mxu1 }
 0x3a7   : > { %7348 = vst [vmem:[#allocation30_spill] sm:$0xff] %v7043_v20 }
 0x3a8   : > { %v7045_v30 = vpop.f32.mrf.mxu1 }
 0x3a9   : > { %7349 = vst [vmem:[#allocation31_spill] sm:$0xff] %v7045_v30 }
 0x3ae   : > { %v7047_v46 = vpop.f32.mrf.mxu1 }
 0x3af   : > { %7350 = vst [vmem:[#allocation32_spill] sm:$0xff] %v7047_v46 }
 0x3b0   : > { %v7051_v6 = vpop.f32.mrf.mxu1 }
 0x3b1   : > { %7351 = vst [vmem:[#allocation33_spill] sm:$0xff] %v7051_v6 }
 0x3b3   : > { %v4726_v62 = vpop.f32.mrf.mxu1 }
 0x3b4   : > { %v3062_v40 = vadd.f32 %v4726_v62, %v4654_v56  ;;  %v7066_v56 = vpop.f32.mrf.mxu0 }
 0x3b5   : > { %v3056_v0 = vpop.f32.mrf.mxu1 }
 0x3b6   : > { %v3583_v5 = vadd.f32 %v4798_v29, %v3062_v40  ;;  %v3057_v3 = vadd.f32 %v3056_v0, %v2735_v38  ;;  %v7070_v33 = vpop.f32.mrf.mxu0 }
 0x3b7   : > { %v4729_v34 = vpop.f32.mrf.mxu1 }
 0x3b8   : > { %v3622_v36 = vadd.f32 %v7059_v4, %v3583_v5  ;;  %v3582_v31 = vadd.f32 %v3423_v58, %v3057_v3  ;;  %v3072_v6 = vadd.f32 %v4729_v34, %v4657_v42 }
 0x3b9   : > { %v3066_v46 = vpop.f32.mrf.mxu1 }
 0x3ba   : > { %v3654_v62 = vadd.f32 %v3622_v36, %v5198_v8  ;;  %v3621_v30 = vadd.f32 %v7059_v4, %v3582_v31  ;;  %v3585_v20 = vadd.f32 %v4801_v57, %v3072_v6  ;;  %v3067_v41 = vadd.f32 %v3066_v46, %v2745_v44 }
 0x3bb   : > { %v4732_v37 = vpop.f32.mrf.mxu1 }
 0x3bc   : > { %v3686_v38 = vmax.f32 %v3654_v62, 0.0  ;;  %v3653_v29 = vadd.f32 %v3621_v30, %v5195_v7  ;;  %v3624_v40 = vadd.f32 %v7059_v4, %v3585_v20  ;;  %v3584_v0 = vadd.f32 %v3433_v23, %v3067_v41  ;;  %v7082_v23 = vpop.f32.mrf.mxu0 }
 0x3bd   : > { %v3082_v42 = vadd.f32 %v4732_v37, %v6995_v60  ;;  %v3076_v58 = vpop.f32.mrf.mxu1 }
 0x3be   : > { %3718 = vst.msk [vmem:[%s7075_s11 + $0x8] sm:$0xff] %vm307_vm1, %v3686_v38  ;;  %v3685_v8 = vmax.f32 %v3653_v29, 0.0  ;;  %v3656_v44 = vadd.f32 %v3624_v40, %v5206_v10  ;;  %v3623_v57 = vadd.f32 %v7059_v4, %v3584_v0  ;;  %v3077_v7 = vadd.f32 %v3076_v58, %v6997_v50  ;;  %v7089_v5 = vpop.f32.mrf.mxu0 }
 0x3bf   : > { %v3587_v30 = vadd.f32 %v4804_v13, %v3082_v42  ;;  %v4735_v20 = vpop.f32.mrf.mxu1 }
 0x3c0   : > { %3717 = vst.msk [vmem:[%s7075_s11] sm:$0xff] %vm307_vm1, %v3685_v8  ;;  %v3688_v60 = vmax.f32 %v3656_v44, 0.0  ;;  %v3655_v37 = vadd.f32 %v3623_v57, %v5201_v9  ;;  %v3586_v41 = vadd.f32 %v3443_v35, %v3077_v7  ;;  %v3092_v46 = vadd.f32 %v4735_v20, %v6999_v47  ;;  %v3493_v40 = vpop.f32.mrf.mxu0 }
 0x3c1   : > { %v3626_v6 = vadd.f32 %v7059_v4, %v3587_v30  ;;  %v3086_v10 = vpop.f32.mrf.mxu1 }
 0x3c2   : > { %3720 = vst.msk [vmem:[%s7075_s11 + $0x18] sm:$0xff] %vm307_vm1, %v3688_v60  ;;  %v3687_v50 = vmax.f32 %v3655_v37, 0.0  ;;  %v3625_v13 = vadd.f32 %v7059_v4, %v3586_v41  ;;  %v3589_v3 = vadd.f32 %v4807_v53, %v3092_v46  ;;  %v3087_v34 = vadd.f32 %v3086_v10, %v7001_v63  ;;  %v4822_v58 = vpop.f32.mrf.mxu0 }
 0x3c3   : > { %v3658_v36 = vadd.f32 %v3626_v6, %v5212_v12  ;;  %v4738_v9 = vpop.f32.mrf.mxu1 }
 0x3c4   : > { %3719 = vst.msk [vmem:[%s7075_s11 + $0x10] sm:$0xff] %vm307_vm1, %v3687_v50  ;;  %v3657_v47 = vadd.f32 %v3625_v13, %v5209_v11  ;;  %v3628_v35 = vadd.f32 %v7059_v4, %v3589_v3  ;;  %v3588_v31 = vadd.f32 %v3453_v28, %v3087_v34  ;;  %v3102_v62 = vadd.f32 %v4738_v9, %v7003_v32  ;;  %v3503_v60 = vpop.f32.mrf.mxu0 }
 0x3c5   : > { %v3690_v38 = vmax.f32 %v3658_v36, 0.0  ;;  %v3096_v29 = vpop.f32.mrf.mxu1 }
 0x3c6   : > { %v3689_v53 = vmax.f32 %v3657_v47, 0.0  ;;  %v3660_v63 = vadd.f32 %v3628_v35, %v5227_v15  ;;  %v3627_v12 = vadd.f32 %v7059_v4, %v3588_v31  ;;  %v3591_v0 = vadd.f32 %v7049_v49, %v3102_v62 }
 0x3c7   : > { %3722 = vst.msk [vmem:[%s7075_s11 + $0x28] sm:$0xff] %vm307_vm1, %v3690_v38  ;;  %v3097_v11 = vadd.f32 %v3096_v29, %v7005_v51  ;;  %v4741_v42 = vpop.f32.mrf.mxu1  ;;  %v7353_v38 = vld [vmem:[#allocation7_spill] sm:$0xff] }
 0x3c8   : > { %3721 = vst.msk [vmem:[%s7075_s11 + $0x20] sm:$0xff] %vm307_vm1, %v3689_v53  ;;  %v3692_v32 = vmax.f32 %v3660_v63, 0.0  ;;  %v3659_v28 = vadd.f32 %v3627_v12, %v5224_v14  ;;  %v3630_v8 = vadd.f32 %v7059_v4, %v3591_v0  ;;  %v3112_v15 = vadd.f32 %v4741_v42, %v7007_v55 }
 0x3c9   : > { %v3590_v44 = vadd.f32 %v7053_v48, %v3097_v11  ;;  %v3106_v57 = vpop.f32.mrf.mxu1 }
 0x3ca   : > { %3724 = vst.msk [vmem:[%s7075_s11 + $0x38] sm:$0xff] %vm307_vm1, %v3692_v32  ;;  %v3691_v49 = vmax.f32 %v3659_v28, 0.0  ;;  %v3662_v51 = vadd.f32 %v3630_v8, %v5239_v17  ;;  %v3593_v7 = vadd.f32 %v7061_v22, %v3112_v15  ;;  %v3107_v30 = vadd.f32 %v3106_v57, %v7009_v54  ;;  %v4825_v22 = vpop.f32.mrf.mxu0  ;;  %v7354_v32 = vld [vmem:[#allocation10_spill] sm:$0xff] }
 0x3cb   : > { %v3629_v20 = vadd.f32 %v7059_v4, %v3590_v44  ;;  %v4744_v14 = vpop.f32.mrf.mxu1 }
 0x3cc   : > { %3723 = vst.msk [vmem:[%s7075_s11 + $0x30] sm:$0xff] %vm307_vm1, %v3691_v49  ;;  %v3694_v55 = vmax.f32 %v3662_v51, 0.0  ;;  %v3632_v48 = vadd.f32 %v7059_v4, %v3593_v7  ;;  %v3592_v37 = vadd.f32 %v7066_v56, %v3107_v30  ;;  %v3122_v41 = vadd.f32 %v4744_v14, %v7011_v39  ;;  %v3513_v9 = vpop.f32.mrf.mxu0  ;;  %v7356_v30 = vld [vmem:[#allocation12_spill] sm:$0xff] }
 0x3cd   : > { %v3661_v17 = vadd.f32 %v3629_v20, %v5230_v16  ;;  %v3116_v46 = vpop.f32.mrf.mxu1 }
 0x3ce   : > { %3726 = vst.msk [vmem:[%s7075_s11 + $0x48] sm:$0xff] %vm307_vm1, %v3694_v55  ;;  %v3664_v54 = vadd.f32 %v3632_v48, %v5245_v19  ;;  %v3631_v6 = vadd.f32 %v7059_v4, %v3592_v37  ;;  %v3595_v10 = vadd.f32 %v7070_v33, %v3122_v41  ;;  %v3117_v50 = vadd.f32 %v3116_v46, %v7013_v25  ;;  %v7352_v33 = vld [vmem:[#allocation8_spill] sm:$0xff] }
 0x3cf   : > { %v3693_v13 = vmax.f32 %v3661_v17, 0.0  ;;  %v4747_v56 = vpop.f32.mrf.mxu1 }
 0x3d0   : > { %v3696_v3 = vmax.f32 %v3664_v54, 0.0  ;;  %v3663_v39 = vadd.f32 %v3631_v6, %v5242_v18  ;;  %v3634_v16 = vadd.f32 %v7059_v4, %v3595_v10  ;;  %v3594_v34 = vadd.f32 %v7082_v23, %v3117_v50  ;;  %v4828_v23 = vpop.f32.mrf.mxu0  ;;  %v7358_v50 = vld [vmem:[#allocation14_spill] sm:$0xff] }
 0x3d1   : > { %3725 = vst.msk [vmem:[%s7075_s11 + $0x40] sm:$0xff] %vm307_vm1, %v3693_v13  ;;  %v3132_v19 = vadd.f32 %v4747_v56, %v7015_v43  ;;  %v3126_v36 = vpop.f32.mrf.mxu1 }
 0x3d2   : > { %3728 = vst.msk [vmem:[%s7075_s11 + $0x58] sm:$0xff] %vm307_vm1, %v3696_v3  ;;  %v3695_v25 = vmax.f32 %v3663_v39, 0.0  ;;  %v3666_v47 = vadd.f32 %v3634_v16, %v7352_v33  ;;  %v3633_v35 = vadd.f32 %v7059_v4, %v3594_v34  ;;  %v3127_v18 = vadd.f32 %v3126_v36, %v7017_v24  ;;  %v3523_v15 = vpop.f32.mrf.mxu0 }
 0x3d3   : > { %v3597_v31 = vadd.f32 %v7089_v5, %v3132_v19  ;;  %v4750_v62 = vpop.f32.mrf.mxu1 }
 0x3d4   : > { %3727 = vst.msk [vmem:[%s7075_s11 + $0x50] sm:$0xff] %vm307_vm1, %v3695_v25  ;;  %v3698_v43 = vmax.f32 %v3666_v47, 0.0  ;;  %v3665_v29 = vadd.f32 %v3633_v35, %v7353_v38  ;;  %v3596_v53 = vadd.f32 %v3493_v40, %v3127_v18  ;;  %v3142_v63 = vadd.f32 %v4750_v62, %v7019_v26  ;;  %v7355_v26 = vld [vmem:[#allocation9_spill] sm:$0xff]  ;;  %v7360_v47 = vld [vmem:[#allocation16_spill] sm:$0xff] }
 0x3d5   : > { %v3636_v12 = vadd.f32 %v7059_v4, %v3597_v31  ;;  %v3136_v0 = vpop.f32.mrf.mxu1 }
 0x3d6   : > { %3730 = vst.msk [vmem:[%s7075_s11 + $0x68] sm:$0xff] %vm307_vm1, %v3698_v43  ;;  %v3697_v11 = vmax.f32 %v3665_v29, 0.0  ;;  %v3635_v24 = vadd.f32 %v7059_v4, %v3596_v53  ;;  %v3599_v5 = vadd.f32 %v4822_v58, %v3142_v63  ;;  %v3137_v42 = vadd.f32 %v3136_v0, %v7021_v1  ;;  %v4831_v58 = vpop.f32.mrf.mxu0  ;;  %v7361_v29 = vld [vmem:[#allocation15_spill] sm:$0xff] }
 0x3d7   : > { %v3668_v28 = vadd.f32 %v3636_v12, %v7354_v32  ;;  %v4753_v8 = vpop.f32.mrf.mxu1  ;;  %v7363_v32 = vld [vmem:[#allocation27_spill] sm:$0xff] }
 0x3d8   : > { %3729 = vst.msk [vmem:[%s7075_s11 + $0x60] sm:$0xff] %vm307_vm1, %v3697_v11  ;;  %v3667_v40 = vadd.f32 %v3635_v24, %v7355_v26  ;;  %v3638_v44 = vadd.f32 %v7059_v4, %v3599_v5  ;;  %v3598_v57 = vadd.f32 %v3503_v60, %v3137_v42  ;;  %v3152_v49 = vadd.f32 %v4753_v8, %v7023_v59  ;;  %v7357_v59 = vld [vmem:[#allocation11_spill] sm:$0xff]  ;;  %v3533_v10 = vpop.f32.mrf.mxu0  ;;  %v7362_v24 = vld [vmem:[#allocation18_spill] sm:$0xff] }
 0x3d9   : > { %v3700_v51 = vmax.f32 %v3668_v28, 0.0  ;;  %v3146_v7 = vpop.f32.mrf.mxu1 }
 0x3da   : > { %v3699_v1 = vmax.f32 %v3667_v40, 0.0  ;;  %v3670_v20 = vadd.f32 %v3638_v44, %v7356_v30  ;;  %v3637_v14 = vadd.f32 %v7059_v4, %v3598_v57  ;;  %v3601_v55 = vadd.f32 %v4825_v22, %v3152_v49  ;;  %v4834_v16 = vpop.f32.mrf.mxu0  ;;  %v7364_v40 = vld [vmem:[#allocation17_spill] sm:$0xff]  ;;  %v7365_v57 = vld [vmem:[#allocation28_spill] sm:$0xff] }
 0x3db   : > { %3732 = vst.msk [vmem:[%s7075_s11 + $0x78] sm:$0xff] %vm307_vm1, %v3700_v51  ;;  %v3147_v48 = vadd.f32 %v3146_v7, %v7025_v52  ;;  %v4756_v37 = vpop.f32.mrf.mxu1 }
 0x3dc   : > { %3731 = vst.msk [vmem:[%s7075_s11 + $0x70] sm:$0xff] %vm307_vm1, %v3699_v1  ;;  %v3702_v60 = vmax.f32 %v3670_v20, 0.0  ;;  %v3669_v41 = vadd.f32 %v3637_v14, %v7357_v59  ;;  %v3640_v17 = vadd.f32 %v7059_v4, %v3601_v55  ;;  %v3162_v46 = vadd.f32 %v4756_v37, %v7027_v2  ;;  %v3543_v43 = vpop.f32.mrf.mxu0  ;;  %v7366_v14 = vld [vmem:[#allocation29_spill] sm:$0xff] }
 0x3dd   : > { %v3600_v54 = vadd.f32 %v3513_v9, %v3147_v48  ;;  %v3156_v6 = vpop.f32.mrf.mxu1  ;;  %v7359_v9 = vld [vmem:[#allocation13_spill] sm:$0xff]  ;;  %v7367_v48 = vld [vmem:[#allocation20_spill] sm:$0xff] }
 0x3de   : > { %3734 = vst.msk [vmem:[%s7075_s11 + $0x88] sm:$0xff] %vm307_vm1, %v3702_v60  ;;  %v3701_v22 = vmax.f32 %v3669_v41, 0.0  ;;  %v3672_v52 = vadd.f32 %v3640_v17, %v7358_v50  ;;  %v3603_v13 = vadd.f32 %v4828_v23, %v3162_v46  ;;  %v3157_v56 = vadd.f32 %v3156_v6, %v7029_v21  ;;  %v4837_v11 = vpop.f32.mrf.mxu0  ;;  %v7368_v41 = vld [vmem:[#allocation19_spill] sm:$0xff]  ;;  %v7369_v6 = vld [vmem:[#allocation30_spill] sm:$0xff] }
 0x3df   : > { %v3639_v3 = vadd.f32 %v7059_v4, %v3600_v54  ;;  %v4759_v39 = vpop.f32.mrf.mxu1 }
 0x3e0   : > { %3733 = vst.msk [vmem:[%s7075_s11 + $0x80] sm:$0xff] %vm307_vm1, %v3701_v22  ;;  %v3704_v34 = vmax.f32 %v3672_v52, 0.0  ;;  %v3642_v2 = vadd.f32 %v7059_v4, %v3603_v13  ;;  %v3602_v19 = vadd.f32 %v3523_v15, %v3157_v56  ;;  %v3172_v36 = vadd.f32 %v4759_v39, %v7031_v45  ;;  %v7370_v13 = vld [vmem:[#allocation22_spill] sm:$0xff] }
 0x3e1   : > { %v3671_v25 = vadd.f32 %v3639_v3, %v7359_v9  ;;  %v3166_v33 = vpop.f32.mrf.mxu1  ;;  %v7372_v9 = vld [vmem:[#allocation21_spill] sm:$0xff] }
 0x3e2   : > { %3736 = vst.msk [vmem:[%s7075_s11 + $0x98] sm:$0xff] %vm307_vm1, %v3704_v34  ;;  %v3674_v21 = vadd.f32 %v3642_v2, %v7360_v47  ;;  %v3641_v35 = vadd.f32 %v7059_v4, %v3602_v19  ;;  %v3605_v18 = vadd.f32 %v4831_v58, %v3172_v36  ;;  %v3167_v31 = vadd.f32 %v3166_v33, %v7033_v27  ;;  %v3553_v58 = vpop.f32.mrf.mxu0 }
 0x3e3   : > { %v3703_v62 = vmax.f32 %v3671_v25, 0.0  ;;  %v4762_v23 = vpop.f32.mrf.mxu1 }
 0x3e4   : > { %v3706_v38 = vmax.f32 %v3674_v21, 0.0  ;;  %v3673_v45 = vadd.f32 %v3641_v35, %v7361_v29  ;;  %v3644_v53 = vadd.f32 %v7059_v4, %v3605_v18  ;;  %v3604_v63 = vadd.f32 %v3533_v10, %v3167_v31  ;;  %v4840_v59 = vpop.f32.mrf.mxu0  ;;  %v7373_v18 = vld [vmem:[#allocation24_spill] sm:$0xff] }
 0x3e5   : > { %3735 = vst.msk [vmem:[%s7075_s11 + $0x90] sm:$0xff] %vm307_vm1, %v3703_v62  ;;  %v3182_v12 = vadd.f32 %v4762_v23, %v7035_v61  ;;  %v3176_v0 = vpop.f32.mrf.mxu1  ;;  %v7374_v62 = vld [vmem:[#allocation32_spill] sm:$0xff] }
 0x3e6   : > { %3738 = vst.msk [vmem:[%s7075_s11 + $0xa8] sm:$0xff] %vm307_vm1, %v3706_v38  ;;  %v3705_v27 = vmax.f32 %v3673_v45, 0.0  ;;  %v3676_v5 = vadd.f32 %v3644_v53, %v7362_v24  ;;  %v3643_v42 = vadd.f32 %v7059_v4, %v3604_v63  ;;  %v3177_v28 = vadd.f32 %v3176_v0, %v7363_v32  ;;  %v3563_v19 = vpop.f32.mrf.mxu0  ;;  %v7375_v45 = vld [vmem:[#allocation33_spill] sm:$0xff] }
 0x3e7   : > { %v3607_v8 = vadd.f32 %v4834_v16, %v3182_v12  ;;  %v4765_v15 = vpop.f32.mrf.mxu1  ;;  %v7371_v16 = vld [vmem:[#allocation31_spill] sm:$0xff] }
 0x3e8   : > { %3737 = vst.msk [vmem:[%s7075_s11 + $0xa0] sm:$0xff] %vm307_vm1, %v3705_v27  ;;  %v3708_v26 = vmax.f32 %v3676_v5, 0.0  ;;  %v3675_v61 = vadd.f32 %v3643_v42, %v7364_v40  ;;  %v3606_v44 = vadd.f32 %v3543_v43, %v3177_v28  ;;  %v3192_v49 = vadd.f32 %v4765_v15, %v7365_v57  ;;  %v7376_v12 = vld [vmem:[#allocation23_spill] sm:$0xff]  ;;  %v7377_v42 = vld [vmem:[#allocation26_spill] sm:$0xff]  ;;  %v7378_v15 = vld [vmem:[#allocation25_spill] sm:$0xff] }
 0x3e9   : > { %v3646_v51 = vadd.f32 %v7059_v4, %v3607_v8  ;;  %v3186_v7 = vpop.f32.mrf.mxu1 }
 0x3ea   : > { %3740 = vst.msk [vmem:[%s7075_s11 + $0xb8] sm:$0xff] %vm307_vm1, %v3708_v26  ;;  %v3707_v1 = vmax.f32 %v3675_v61, 0.0  ;;  %v3645_v30 = vadd.f32 %v7059_v4, %v3606_v44  ;;  %v3609_v20 = vadd.f32 %v4837_v11, %v3192_v49  ;;  %v3187_v55 = vadd.f32 %v3186_v7, %v7366_v14 }
 0x3eb   : > { %v3678_v37 = vadd.f32 %v3646_v51, %v7367_v48  ;;  %v4768_v60 = vpop.f32.mrf.mxu1 }
 0x3ec   : > { %3739 = vst.msk [vmem:[%s7075_s11 + $0xb0] sm:$0xff] %vm307_vm1, %v3707_v1  ;;  %v3677_v17 = vadd.f32 %v3645_v30, %v7368_v41  ;;  %v3648_v46 = vadd.f32 %v7059_v4, %v3609_v20  ;;  %v3608_v54 = vadd.f32 %v3553_v58, %v3187_v55  ;;  %v3202_v10 = vadd.f32 %v4768_v60, %v7369_v6 }
 0x3ed   : > { %v3710_v22 = vmax.f32 %v3678_v37, 0.0  ;;  %v3196_v50 = vpop.f32.mrf.mxu1 }
 0x3ee   : > { %v3709_v52 = vmax.f32 %v3677_v17, 0.0  ;;  %v3680_v56 = vadd.f32 %v3648_v46, %v7370_v13  ;;  %v3647_v3 = vadd.f32 %v7059_v4, %v3608_v54  ;;  %v3611_v39 = vadd.f32 %v4840_v59, %v3202_v10 }
 0x3ef   : > { %3742 = vst.msk [vmem:[%s7075_s11 + $0xc8] sm:$0xff] %vm307_vm1, %v3710_v22  ;;  %v3197_v34 = vadd.f32 %v3196_v50, %v7371_v16  ;;  %v4771_v2 = vpop.f32.mrf.mxu1 }
 0x3f0   : > { %3741 = vst.msk [vmem:[%s7075_s11 + $0xc0] sm:$0xff] %vm307_vm1, %v3709_v52  ;;  %v3712_v36 = vmax.f32 %v3680_v56, 0.0  ;;  %v3679_v25 = vadd.f32 %v3647_v3, %v7372_v9  ;;  %v3650_v33 = vadd.f32 %v7059_v4, %v3611_v39  ;;  %v3212_v23 = vadd.f32 %v4771_v2, %v7374_v62 }
 0x3f1   : > { %v3610_v47 = vadd.f32 %v3563_v19, %v3197_v34  ;;  %v3206_v21 = vpop.f32.mrf.mxu1 }
 0x3f2   : > { %3744 = vst.msk [vmem:[%s7075_s11 + $0xd8] sm:$0xff] %vm307_vm1, %v3712_v36  ;;  %v3711_v35 = vmax.f32 %v3679_v25, 0.0  ;;  %v3682_v31 = vadd.f32 %v3650_v33, %v7373_v18  ;;  %v3207_v53 = vadd.f32 %v3206_v21, %v7375_v45 }
 0x3f3   : > { %v3649_v43 = vadd.f32 %v7059_v4, %v3610_v47  ;;  %v4843_v38 = vpop.f32.mrf.mxu1 }
 0x3f4   : > { %3743 = vst.msk [vmem:[%s7075_s11 + $0xd0] sm:$0xff] %vm307_vm1, %v3711_v35  ;;  %v3714_v29 = vmax.f32 %v3682_v31, 0.0  ;;  %v3613_v63 = vadd.f32 %v4843_v38, %v3212_v23 }
 0x3f5   : > { %v3681_v0 = vadd.f32 %v3649_v43, %v7376_v12  ;;  %v3573_v11 = vpop.f32.mrf.mxu1 }
 0x3f6   : > { %3746 = vst.msk [vmem:[%s7075_s11 + $0xe8] sm:$0xff] %vm307_vm1, %v3714_v29  ;;  %v3652_v27 = vadd.f32 %v7059_v4, %v3613_v63  ;;  %v3612_v24 = vadd.f32 %v3573_v11, %v3207_v53 }
 0x3f7   : > { %v3713_v5 = vmax.f32 %v3681_v0, 0.0 }
 0x3f8   : > { %v3684_v32 = vadd.f32 %v3652_v27, %v7377_v42  ;;  %v3651_v28 = vadd.f32 %v7059_v4, %v3612_v24 }
 0x3f9   : > { %3745 = vst.msk [vmem:[%s7075_s11 + $0xe0] sm:$0xff] %vm307_vm1, %v3713_v5 }
 0x3fa   : > { %v3716_v8 = vmax.f32 %v3684_v32, 0.0  ;;  %v3683_v26 = vadd.f32 %v3651_v28, %v7378_v15 }
 0x3fc   : > { %3748 = vst.msk [vmem:[%s7075_s11 + $0xf8] sm:$0xff] %vm307_vm1, %v3716_v8  ;;  %v3715_v4 = vmax.f32 %v3683_v26, 0.0 }
 0x3fe   : > { %3747 = vst.msk [vmem:[%s7075_s11 + $0xf0] sm:$0xff] %vm307_vm1, %v3715_v4 }
 0x3ff   : > { %4993 = shalt.err (!%p4990_p5)
}
 0x400   : > { %s4994_s29 = scalar_lea.hbm %s7239_s15, 4096  ;;  %s4998_s8 = scalar_lea.hbm %s7299_s5, 8192 }
 0x401   : > { %p4995_p6 = scmp.ne.s32.totalorder %s7239_s15, %s4994_s29  ;;  %p4999_p10 = scmp.lt.s32.totalorder %s7239_s15, %s7299_s5 }
 0x402   : > { %p5000_p11 = scmp.lt.s32.totalorder %s4998_s8, %s4994_s29 }
 0x403   : > { %p4996_p7 = pnand %p4995_p6, %p5134_p4 }
 0x404   : > { %p5001_p12 = por %p5000_p11, %p4999_p10 }
 0x405   : > { %p4997_p9 = pneg %p4996_p7 }
 0x407   : > { %p5002_p13 = pnand %p5001_p12, %p4997_p9 }
 0x409   : > { %5005 = shalt.err (!%p5002_p13)
}
 0x40a   : > { %s5062_s13 = smov 128   ;;  %s5063_s10 = smov 8  }
 0x40b   : > { %4868 = dma.vmem_to_hbm [thread:$0]  (%p5134_p4), %s7241_s12, 4096, %s7239_s15, %s7249_s21, %s5062_s13, %s5062_s13, %s5063_s10  }
 0x40c PF: > { %p4874_p0 = scmp.ge.s32.totalorder %s5056_s23, 2  ;;  %s3781_s14 = sand.u32 1, %s5036_s18  }
 0x40d   : > { %s3782_s16 = scalar_lea.sflag [#allocation5], %s3781_s14 }
 0x40e   : > { %p4871_p1 = pnand %p4874_p0, %p5141_p8 }
 0x410   : > { %p4872_p2 = pneg %p4871_p1 }
 0x412   : > { %5031 = dma.done.wait (%p4872_p2), %s3782_s16, 4096  }
 0x413   : > { %5033 = vsyncadd (%p4872_p2), %s3782_s16, 4294963200  ;;  %s18_s23 = sadd.s32 1, %s5056_s23   ;;  %s7379_s18 = smov %s5040_s19 }
 0x414   : > { %p15_p3 = scmp.ge.s32.totalorder %s18_s23, 4   ;;  %s7380_s19 = smov %s5044_s20 }
 0x415   : > { %s7381_s20 = smov %s5147_s6  ;;  %s7382_s21 = smov %s5052_s22 }
 0x416   : > { %s7383_s22 = smov %s7385_s26  ;;  %17 = sbr.rel (!%p15_p3) target bundleno = 4 (0x4), region = 92 }
 0x41b   :  { %3787 = vsyncpa [#allocation5], 1 }
 0x41c   :  { %3789 = vsyncpa [#allocation5 + $0x1], 1 }

</bundles_post_ra>
